<compile_context>
chip_gen: v6e
topology: v6e:2x2x1
jax: 0.10.0
libtpu: 0.0.40
codegen_flags: <defaults>
</compile_context>

<pallas_src>
import jax
import jax.numpy as jnp
from jax.experimental import pallas as pl
from jax.experimental.pallas import tpu as pltpu

NEG_SLOPE = 0.2      # PyG GATConv default negative_slope
MASK_VAL = -1e30     # additive mask value for non-edges / cross-graph pairs


def _leaky_relu(x):
    # max-form (slope > 0 => identical to the where-form, one fewer VPU op per vreg)
    return jnp.maximum(x, NEG_SLOPE * x)


def _elu(x):
    return jnp.where(x > 0, x, jnp.exp(x) - 1.0)


# --------------------------------------------------------------------------- kernel

def _build_kernel(*, heads, hidden, fin, hh, offs):
    r_w1, r_a1, r_b1, r_w2, r_a2, r_b2, r_wf, r_bf = offs

    def gat_layer(x, adj_bias, w, a_stack, bias, head_sel):
        """One GATConv (concat=True) over a node tile, all heads batched.

        x:        [M, Fin]    node features of the tile
        adj_bias: [M, M]      additive mask (0 = edge j->i incl. self loop, -1e30 else)
        w:        [Fin, HH]   per-head weights, head-concatenated
        a_stack:  [2H, HH]    rows 0:H = dst, rows H:2H = src row-block-diag att vectors
        bias:     [1, HH]
        head_sel: [H, HH]     bool one-hot column -> head mask
        """
        h_all = jnp.dot(x, w, preferred_element_type=jnp.float32)           # [M, HH]

        # Fused (dst; src) attention coefficients: ONE MXU matmul -> [2H, M].
        alpha = jnp.einsum('hk,nk->hn', a_stack, h_all,
                           preferred_element_type=jnp.float32)              # [2H, M]
        a_dst = alpha[:heads]                                               # [H, M]
        a_src = alpha[heads:2 * heads]                                      # [H, M]

        # e[h, i, j] = leaky_relu(a_dst.h_i + a_src.h_j), masked additively.
        s = a_dst[:, :, None] + a_src[:, None, :]                           # [H, M, M]
        e = jnp.maximum(s, NEG_SLOPE * s)                                   # leaky_relu
        e = e + adj_bias[None, :, :]
        e = e - jnp.max(e, axis=-1, keepdims=True)                          # safe exp
        p = jnp.exp(e)                                                      # unnormalized
        denom = jnp.sum(p, axis=-1, keepdims=True)                          # [H, M, 1]

        # Pre-masked RHS: head h only sees its own feature block; one batched MXU
        # matmul, plain sum over heads -- no broadcast_to, no lane-axis concatenate.
        h_masked = jnp.where(head_sel[:, None, :], h_all[None, :, :], 0.0)  # [H, M, HH]
        agg = jnp.einsum('hnm,hmf->hnf', p, h_masked,
                         preferred_element_type=jnp.float32)                # [H, M, HH]

        # Flash-style: normalize AFTER aggregation (tiny [H,M,HH] multiply).
        recip = pl.reciprocal(denom, approx=True)                           # [H, M, 1]
        return jnp.sum(agg * recip, axis=0) + bias                          # [M, HH]

    def kernel(x_ref, adjm_ref, gatc_ref, fcc_ref, out_ref):
        x = x_ref[...]                                                      # [M, Fin]

        # int8 {0,1} mask -> additive f32 bias (0 / -1e30), built once per tile.
        adj_bias = (adjm_ref[0].astype(jnp.float32) - 1.0) * jnp.float32(1e30)

        # Packed constants: static 8-row-aligned slices of the two constant slabs.
        w1 = gatc_ref[r_w1:r_w1 + fin, :]
        a1 = gatc_ref[r_a1:r_a1 + 2 * heads, :]
        b1 = gatc_ref[r_b1:r_b1 + 1, :]
        w2 = gatc_ref[r_w2:r_w2 + hh, :]
        a2 = gatc_ref[r_a2:r_a2 + 2 * heads, :]
        b2 = gatc_ref[r_b2:r_b2 + 1, :]
        wf = fcc_ref[r_wf:r_wf + hh, :]
        bf = fcc_ref[r_bf:r_bf + 1, :]

        # One-hot head -> column-block mask, built in-kernel (no DMA, no int divide).
        col = jax.lax.broadcasted_iota(jnp.int32, (heads, hh), 1)
        lo = jax.lax.broadcasted_iota(jnp.int32, (heads, hh), 0) * hidden
        head_sel = (col >= lo) & (col < lo + hidden)                        # [H, HH] bool

        h1 = _elu(gat_layer(x, adj_bias, w1, a1, b1, head_sel))
        # F.dropout(x, training=self.training): eval mode -> identity.
        h2 = _elu(gat_layer(h1, adj_bias, w2, a2, b2, head_sel))

        # FC1 and FC2 folded into a single lane-dense (128-wide) matmul + bias.
        out = jnp.dot(h2, wf, preferred_element_type=jnp.float32) + bf
        out_ref[...] = out.astype(out_ref.dtype)

    return kernel


# --------------------------------------------------------------------------- wrapper

def _row_block_diag(a):
    """[H, Fh] -> [H, H*Fh] with a[h] placed in head h's column block."""
    h, fh = a.shape
    return (jnp.eye(h, dtype=a.dtype)[:, :, None] * a[None, :, :]).reshape(h, h * fh)


def gatemb_forward(x, adj, params, *, heads, hidden, graphs_per_tile):
    """x: [B, N, Fin]; adj: [B, N, N] with adj[g, i, j] = 1 iff edge j -> i (+ self loops)."""
    b, n, fin = x.shape
    assert b % graphs_per_tile == 0
    n_tiles = b // graphs_per_tile
    m = graphs_per_tile * n                      # nodes per grid tile (matmul M dim)
    assert m % 8 == 0
    hh = heads * hidden
    assert params["w1"].shape == (fin, hh)
    out_ch = params["wf2"].shape[1]
    out_pad = ((out_ch + 127) // 128) * 128      # lane-dense output width

    x_flat = x.reshape(b * n, fin).astype(jnp.float32)

    # int8 block-diagonal edge mask per tile (vectorized: no Python .at[].set loop).
    adj_t = adj.reshape(n_tiles, graphs_per_tile, n, n)
    eye_g = jnp.eye(graphs_per_tile, dtype=adj.dtype)
    blockdiag = jnp.einsum('tgij,gh->tgihj', adj_t, eye_g).reshape(n_tiles, m, m)
    adj_mask = (blockdiag > 0).astype(jnp.int8)                    # [n_tiles, M, M]

    # Fused (dst; src) row-block-diagonal attention matrices: [2H, HH].
    a1 = jnp.concatenate([_row_block_diag(params["ad1"]),
                          _row_block_diag(params["as1"])], axis=0)
    a2 = jnp.concatenate([_row_block_diag(params["ad2"]),
                          _row_block_diag(params["as2"])], axis=0)

    # FC1 . FC2 folded (no nonlinearity between them -> exact), padded to 128 lanes.
    wf = params["wf1"] @ params["wf2"]
    bf = params["bf1"] @ params["wf2"] + params["bf2"]
    wf_pad = jnp.zeros((hh, out_pad), jnp.float32).at[:, :out_ch].set(wf)
    bf_pad = jnp.zeros((1, out_pad), jnp.float32).at[:, :out_ch].set(bf)

    # Pack all GAT constants into ONE [*, HH] slab with 8-row-aligned blocks,
    # and the fused FC into ONE [*, out_pad] slab -> 4 input DMAs total.
    def rup8(v):
        return ((v + 7) // 8) * 8

    r_w1 = 0
    r_a1 = r_w1 + rup8(fin)
    r_b1 = r_a1 + rup8(2 * heads)
    r_w2 = r_b1 + 8
    r_a2 = r_w2 + rup8(hh)
    r_b2 = r_a2 + rup8(2 * heads)
    gatc = jnp.zeros((r_b2 + 8, hh), jnp.float32)
    gatc = gatc.at[r_w1:r_w1 + fin].set(params["w1"])
    gatc = gatc.at[r_a1:r_a1 + 2 * heads].set(a1)
    gatc = gatc.at[r_b1:r_b1 + 1].set(params["b1"])
    gatc = gatc.at[r_w2:r_w2 + hh].set(params["w2"])
    gatc = gatc.at[r_a2:r_a2 + 2 * heads].set(a2)
    gatc = gatc.at[r_b2:r_b2 + 1].set(params["b2"])

    r_wf = 0
    r_bf = rup8(hh)
    fcc = jnp.zeros((r_bf + 8, out_pad), jnp.float32)
    fcc = fcc.at[r_wf:r_wf + hh].set(wf_pad)
    fcc = fcc.at[r_bf:r_bf + 1].set(bf_pad)

    kernel = _build_kernel(heads=heads, hidden=hidden, fin=fin, hh=hh,
                           offs=(r_w1, r_a1, r_b1, r_w2, r_a2, r_b2, r_wf, r_bf))

    out_flat = pl.pallas_call(
        kernel,
        out_shape=jax.ShapeDtypeStruct((b * n, out_pad), jnp.float32),
        grid=(n_tiles,),
        in_specs=[
            pl.BlockSpec((m, fin), lambda t: (t, 0)),          # node-feature tile
            pl.BlockSpec((1, m, m), lambda t: (t, 0, 0)),      # int8 block-diag mask
            pl.BlockSpec(gatc.shape, lambda t: (0, 0)),        # packed GAT constants
            pl.BlockSpec(fcc.shape, lambda t: (0, 0)),         # packed fused FC
        ],
        out_specs=pl.BlockSpec((m, out_pad), lambda t: (t, 0)),
        compiler_params=pltpu.CompilerParams(
            dimension_semantics=("parallel",),                 # independent graph tiles
            vmem_limit_bytes=32 * 1024 * 1024),
    )(x_flat, adj_mask, gatc, fcc)
    return out_flat[:, :out_ch].reshape(b, n, out_ch)


# --------------------------------------------------------------------------- reference

def _reference_forward(x, adj, prm, heads, hidden):
    """Pure-JAX per-head reference (mirrors PyG GATConv math on one graph)."""
    def gat(xx, w, a_src, a_dst, bias):
        h_all = xx @ w
        outs = []
        for hd in range(heads):
            h = h_all[:, hd * hidden:(hd + 1) * hidden]
            asrc = jnp.sum(h * a_src[hd][None, :], -1, keepdims=True)
            adst = jnp.sum(h * a_dst[hd][None, :], -1, keepdims=True)
            e = jnp.where(adj > 0, _leaky_relu(adst + asrc.T), jnp.float32(MASK_VAL))
            e = e - jnp.max(e, -1, keepdims=True)
            p = jnp.exp(e)
            p = p / jnp.sum(p, -1, keepdims=True)
            outs.append(p @ h)
        return jnp.concatenate(outs, -1) + bias

    h1 = _elu(gat(x, prm["w1"], prm["as1"], prm["ad1"], prm["b1"]))
    h2 = _elu(gat(h1, prm["w2"], prm["as2"], prm["ad2"], prm["b2"]))
    f1 = h2 @ prm["wf1"] + prm["bf1"]
    return f1 @ prm["wf2"] + prm["bf2"]


def init_params(key, in_channels, hidden, out_channels, heads):
    ks = jax.random.split(key, 12)
    hh = heads * hidden

    def w(k, shape, fan_in):
        return jax.random.normal(k, shape, jnp.float32) / jnp.sqrt(jnp.float32(fan_in))

    return {
        # conv1: GATConv(in_channels, hidden, heads)
        "w1": w(ks[0], (in_channels, hh), in_channels),
        "as1": w(ks[1], (heads, hidden), hidden),
        "ad1": w(ks[2], (heads, hidden), hidden),
        "b1": 0.01 * jax.random.normal(ks[3], (1, hh), jnp.float32),
        # conv2: GATConv(hidden*heads, hidden, heads)
        "w2": w(ks[4], (hh, hh), hh),
        "as2": w(ks[5], (heads, hidden), hidden),
        "ad2": w(ks[6], (heads, hidden), hidden),
        "b2": 0.01 * jax.random.normal(ks[7], (1, hh), jnp.float32),
        # FC1: Linear(hidden*heads, 64), FC2: Linear(64, out_channels)
        "wf1": w(ks[8], (hh, 64), hh),
        "bf1": 0.01 * jax.random.normal(ks[9], (1, 64), jnp.float32),
        "wf2": w(ks[10], (64, out_channels), 64),
        "bf2": 0.01 * jax.random.normal(ks[11], (1, out_channels), jnp.float32),
    }


if __name__ == "__main__":
    N = 16                 # nodes per graph
    B = 16                 # graphs in the batch
    GRAPHS_PER_TILE = 8    # 8 graphs * 16 nodes = 128-row tiles -> matmul M = 128
    E = 48                 # directed edges per graph
    IN_CH = 8
    HIDDEN = 8
    OUT_CH = 4
    HEADS = 3

    key = jax.random.PRNGKey(0)
    k_x, k_e, k_p = jax.random.split(key, 3)

    x = jax.random.normal(k_x, (B, N, IN_CH), jnp.float32)

    # Per-graph random edge_index ([2, E], PyG convention) -> dense adjacency with
    # adj[i, j] = 1 iff edge j -> i, plus self loops (add_self_loops=True, deduped).
    eye = jnp.eye(N, dtype=jnp.float32)
    adjs = []
    for kg in jax.random.split(k_e, B):
        ks, kd = jax.random.split(kg)
        src = jax.random.randint(ks, (E,), 0, N)
        dst = jax.random.randint(kd, (E,), 0, N)
        a = jnp.zeros((N, N), jnp.float32).at[dst, src].set(1.0)
        adjs.append(jnp.maximum(a, eye))
    adj = jnp.stack(adjs)                                   # [B, N, N]

    params = init_params(k_p, IN_CH, HIDDEN, OUT_CH, HEADS)

    out = gatemb_forward(x, adj, params, heads=HEADS, hidden=HIDDEN,
                         graphs_per_tile=GRAPHS_PER_TILE)
    out = jax.block_until_ready(out)

    ref = jnp.stack([_reference_forward(x[g], adj[g], params, HEADS, HIDDEN)
                     for g in range(B)])

    assert out.shape == (B, N, OUT_CH)
    assert bool(jnp.all(jnp.isfinite(out)))
    # approx-reciprocal softmax + FC1.FC2 fold + batched accumulation order => loosened tol
    assert bool(jnp.allclose(out, ref, rtol=5e-3, atol=5e-3)), "mismatch vs reference"
    print("KERNEL_OK")
</pallas_src>

<mosaic_0001>
module attributes {stable_mosaic.version = 11 : i64} {
  func.func @kernel(%arg0: i32, %arg1: memref<128x8xf32, #tpu.memory_space<vmem>>, %arg2: memref<1x128x128xi8, #tpu.memory_space<vmem>>, %arg3: memref<64x24xf32, #tpu.memory_space<vmem>>, %arg4: memref<32x128xf32, #tpu.memory_space<vmem>>, %arg5: memref<128x128xf32, #tpu.memory_space<vmem>>) attributes {dimension_semantics = [#tpu.dimension_semantics<parallel>], iteration_bounds = array<i64: 2>, scalar_prefetch = 0 : i64, scratch_operands = 0 : i64, tpu.core_type = #tpu.core_type<tc>, window_params = [{transform_indices = @transform_0, window_bounds = array<i64: 128, 8>}, {transform_indices = @transform_1, window_bounds = array<i64: 1, 128, 128>}, {pipeline_mode = #tpu.pipeline_mode<synchronous>, transform_indices = @transform_2, window_bounds = array<i64: 64, 24>}, {pipeline_mode = #tpu.pipeline_mode<synchronous>, transform_indices = @transform_3, window_bounds = array<i64: 32, 128>}, {transform_indices = @transform_4, window_bounds = array<i64: 128, 128>}]} {
    %c0 = arith.constant 0 : index
    %c0_0 = arith.constant 0 : index
    %0 = vector.load %arg1[%c0, %c0_0] : memref<128x8xf32, #tpu.memory_space<vmem>>, vector<128x8xf32>
    %c0_1 = arith.constant 0 : index
    %c0_2 = arith.constant 0 : index
    %c0_3 = arith.constant 0 : index
    %1 = vector.load %arg2[%c0_1, %c0_2, %c0_3] : memref<1x128x128xi8, #tpu.memory_space<vmem>>, vector<1x128x128xi8>
    %2 = vector.shape_cast %1 : vector<1x128x128xi8> to vector<128x128xi8>
    %3 = arith.sitofp %2 : vector<128x128xi8> to vector<128x128xf32>
    %cst = arith.constant 1.000000e+00 : f32
    %4 = vector.broadcast %cst : f32 to vector<128x128xf32>
    %5 = arith.subf %3, %4 : vector<128x128xf32>
    %cst_4 = arith.constant 1.000000e+30 : f32
    %6 = vector.broadcast %cst_4 : f32 to vector<128x128xf32>
    %7 = arith.mulf %5, %6 : vector<128x128xf32>
    %c0_5 = arith.constant 0 : index
    %c0_6 = arith.constant 0 : index
    %8 = vector.load %arg3[%c0_5, %c0_6] : memref<64x24xf32, #tpu.memory_space<vmem>>, vector<8x24xf32>
    %c8 = arith.constant 8 : index
    %c0_7 = arith.constant 0 : index
    %9 = vector.load %arg3[%c8, %c0_7] : memref<64x24xf32, #tpu.memory_space<vmem>>, vector<6x24xf32>
    %c16 = arith.constant 16 : index
    %c0_8 = arith.constant 0 : index
    %10 = vector.load %arg3[%c16, %c0_8] : memref<64x24xf32, #tpu.memory_space<vmem>>, vector<1x24xf32>
    %c24 = arith.constant 24 : index
    %c0_9 = arith.constant 0 : index
    %11 = vector.load %arg3[%c24, %c0_9] : memref<64x24xf32, #tpu.memory_space<vmem>>, vector<24x24xf32>
    %c48 = arith.constant 48 : index
    %c0_10 = arith.constant 0 : index
    %12 = vector.load %arg3[%c48, %c0_10] : memref<64x24xf32, #tpu.memory_space<vmem>>, vector<6x24xf32>
    %c56 = arith.constant 56 : index
    %c0_11 = arith.constant 0 : index
    %13 = vector.load %arg3[%c56, %c0_11] : memref<64x24xf32, #tpu.memory_space<vmem>>, vector<1x24xf32>
    %c0_12 = arith.constant 0 : index
    %c0_13 = arith.constant 0 : index
    %14 = vector.load %arg4[%c0_12, %c0_13] : memref<32x128xf32, #tpu.memory_space<vmem>>, vector<24x128xf32>
    %c24_14 = arith.constant 24 : index
    %c0_15 = arith.constant 0 : index
    %15 = vector.load %arg4[%c24_14, %c0_15] : memref<32x128xf32, #tpu.memory_space<vmem>>, vector<1x128xf32>
    %16 = tpu.iota {dimensions = array<i32: 1>} : vector<3x24xi32>
    %17 = tpu.iota {dimensions = array<i32: 0>} : vector<3x24xi32>
    %c8_i32 = arith.constant 8 : i32
    %18 = vector.broadcast %c8_i32 : i32 to vector<3x24xi32>
    %19 = arith.muli %17, %18 : vector<3x24xi32>
    %20 = arith.cmpi sge, %16, %19 : vector<3x24xi32>
    %c8_i32_16 = arith.constant 8 : i32
    %21 = vector.broadcast %c8_i32_16 : i32 to vector<3x24xi32>
    %22 = arith.addi %19, %21 : vector<3x24xi32>
    %23 = arith.cmpi slt, %16, %22 : vector<3x24xi32>
    %24 = arith.andi %20, %23 : vector<3x24xi1>
    %cst_17 = arith.constant dense<0.000000e+00> : vector<128x24xf32>
    %25 = tpu.matmul %0, %8, %cst_17 {dimension_numbers = #tpu.dot_dimension_numbers<[1], [0], [0], [1], [0, 0, 1, 1], [], []>} : vector<128x8xf32>, vector<8x24xf32>, vector<128x24xf32> -> vector<128x24xf32>
    "tpu.trace_start"() <{level = 10 : i32, message = "hk,nk->hn"}> : () -> ()
    %cst_18 = arith.constant dense<0.000000e+00> : vector<6x128xf32>
    %26 = tpu.matmul %9, %25, %cst_18 {dimension_numbers = #tpu.dot_dimension_numbers<[1], [1], [0], [0], [0, 0, 1, 0], [], []>} : vector<6x24xf32>, vector<128x24xf32>, vector<6x128xf32> -> vector<6x128xf32>
    "tpu.trace_stop"() : () -> ()
    %27 = vector.extract_strided_slice %26 {offsets = [0, 0], sizes = [3, 128], strides = [1, 1]} : vector<6x128xf32> to vector<3x128xf32>
    %28 = vector.extract_strided_slice %26 {offsets = [3, 0], sizes = [3, 128], strides = [1, 1]} : vector<6x128xf32> to vector<3x128xf32>
    %29 = vector.shape_cast %27 : vector<3x128xf32> to vector<3x128x1xf32>
    %30 = vector.shape_cast %28 : vector<3x128xf32> to vector<3x1x128xf32>
    %31 = vector.broadcast %29 : vector<3x128x1xf32> to vector<3x128x128xf32>
    %32 = vector.broadcast %30 : vector<3x1x128xf32> to vector<3x128x128xf32>
    %33 = arith.addf %31, %32 : vector<3x128x128xf32>
    %cst_19 = arith.constant 2.000000e-01 : f32
    %34 = vector.broadcast %cst_19 : f32 to vector<3x128x128xf32>
    %35 = arith.mulf %34, %33 : vector<3x128x128xf32>
    %36 = arith.maximumf %33, %35 : vector<3x128x128xf32>
    %37 = vector.shape_cast %7 : vector<128x128xf32> to vector<1x128x128xf32>
    %38 = vector.broadcast %37 : vector<1x128x128xf32> to vector<3x128x128xf32>
    %39 = arith.addf %36, %38 : vector<3x128x128xf32>
    %cst_20 = arith.constant dense<0xFF800000> : vector<3x128xf32>
    %40 = vector.multi_reduction <maximumf>, %39, %cst_20 [2] : vector<3x128x128xf32> to vector<3x128xf32>
    %41 = vector.shape_cast %40 : vector<3x128xf32> to vector<3x128x1xf32>
    %42 = vector.broadcast %41 : vector<3x128x1xf32> to vector<3x128x128xf32>
    %43 = arith.subf %39, %42 : vector<3x128x128xf32>
    %44 = math.exp %43 : vector<3x128x128xf32>
    %cst_21 = arith.constant dense<0.000000e+00> : vector<3x128xf32>
    %45 = vector.multi_reduction <add>, %44, %cst_21 [2] : vector<3x128x128xf32> to vector<3x128xf32>
    %46 = vector.shape_cast %45 : vector<3x128xf32> to vector<3x128x1xf32>
    %47 = vector.shape_cast %24 : vector<3x24xi1> to vector<3x1x24xi1>
    %48 = vector.shape_cast %25 : vector<128x24xf32> to vector<1x128x24xf32>
    %cst_22 = arith.constant 0.000000e+00 : f32
    %49 = vector.shape_cast %47 : vector<3x1x24xi1> to vector<3x1x24xi1>
    %50 = vector.broadcast %49 : vector<3x1x24xi1> to vector<3x128x24xi1>
    %51 = vector.shape_cast %48 : vector<1x128x24xf32> to vector<1x128x24xf32>
    %52 = vector.broadcast %51 : vector<1x128x24xf32> to vector<3x128x24xf32>
    %53 = vector.broadcast %cst_22 : f32 to vector<3x128x24xf32>
    %54 = arith.select %50, %52, %53 : vector<3x128x24xi1>, vector<3x128x24xf32>
    "tpu.trace_start"() <{level = 10 : i32, message = "hnm,hmf->hnf"}> : () -> ()
    %cst_23 = arith.constant dense<0.000000e+00> : vector<3x128x24xf32>
    %55 = tpu.matmul %44, %54, %cst_23 {dimension_numbers = #tpu.dot_dimension_numbers<[2], [1], [1], [2], [0, 0, 0, 1, 1, 2], [0], [0]>} : vector<3x128x128xf32>, vector<3x128x24xf32>, vector<3x128x24xf32> -> vector<3x128x24xf32>
    "tpu.trace_stop"() : () -> ()
    %56 = tpu.reciprocal %46 {approx = true} : vector<3x128x1xf32> -> vector<3x128x1xf32>
    %57 = vector.broadcast %56 : vector<3x128x1xf32> to vector<3x128x24xf32>
    %58 = arith.mulf %55, %57 : vector<3x128x24xf32>
    %cst_24 = arith.constant dense<0.000000e+00> : vector<128x24xf32>
    %59 = vector.multi_reduction <add>, %58, %cst_24 [0] : vector<3x128x24xf32> to vector<128x24xf32>
    %60 = vector.broadcast %10 : vector<1x24xf32> to vector<128x24xf32>
    %61 = arith.addf %59, %60 : vector<128x24xf32>
    %cst_25 = arith.constant 0.000000e+00 : f32
    %62 = vector.broadcast %cst_25 : f32 to vector<128x24xf32>
    %63 = arith.cmpf ogt, %61, %62 : vector<128x24xf32>
    %64 = math.exp %61 : vector<128x24xf32>
    %cst_26 = arith.constant 1.000000e+00 : f32
    %65 = vector.broadcast %cst_26 : f32 to vector<128x24xf32>
    %66 = arith.subf %64, %65 : vector<128x24xf32>
    %67 = arith.select %63, %61, %66 : vector<128x24xi1>, vector<128x24xf32>
    %cst_27 = arith.constant dense<0.000000e+00> : vector<128x24xf32>
    %68 = tpu.matmul %67, %11, %cst_27 {dimension_numbers = #tpu.dot_dimension_numbers<[1], [0], [0], [1], [0, 0, 1, 1], [], []>} : vector<128x24xf32>, vector<24x24xf32>, vector<128x24xf32> -> vector<128x24xf32>
    "tpu.trace_start"() <{level = 10 : i32, message = "hk,nk->hn"}> : () -> ()
    %cst_28 = arith.constant dense<0.000000e+00> : vector<6x128xf32>
    %69 = tpu.matmul %12, %68, %cst_28 {dimension_numbers = #tpu.dot_dimension_numbers<[1], [1], [0], [0], [0, 0, 1, 0], [], []>} : vector<6x24xf32>, vector<128x24xf32>, vector<6x128xf32> -> vector<6x128xf32>
    "tpu.trace_stop"() : () -> ()
    %70 = vector.extract_strided_slice %69 {offsets = [0, 0], sizes = [3, 128], strides = [1, 1]} : vector<6x128xf32> to vector<3x128xf32>
    %71 = vector.extract_strided_slice %69 {offsets = [3, 0], sizes = [3, 128], strides = [1, 1]} : vector<6x128xf32> to vector<3x128xf32>
    %72 = vector.shape_cast %70 : vector<3x128xf32> to vector<3x128x1xf32>
    %73 = vector.shape_cast %71 : vector<3x128xf32> to vector<3x1x128xf32>
    %74 = vector.broadcast %72 : vector<3x128x1xf32> to vector<3x128x128xf32>
    %75 = vector.broadcast %73 : vector<3x1x128xf32> to vector<3x128x128xf32>
    %76 = arith.addf %74, %75 : vector<3x128x128xf32>
    %cst_29 = arith.constant 2.000000e-01 : f32
    %77 = vector.broadcast %cst_29 : f32 to vector<3x128x128xf32>
    %78 = arith.mulf %77, %76 : vector<3x128x128xf32>
    %79 = arith.maximumf %76, %78 : vector<3x128x128xf32>
    %80 = vector.shape_cast %7 : vector<128x128xf32> to vector<1x128x128xf32>
    %81 = vector.broadcast %80 : vector<1x128x128xf32> to vector<3x128x128xf32>
    %82 = arith.addf %79, %81 : vector<3x128x128xf32>
    %cst_30 = arith.constant dense<0xFF800000> : vector<3x128xf32>
    %83 = vector.multi_reduction <maximumf>, %82, %cst_30 [2] : vector<3x128x128xf32> to vector<3x128xf32>
    %84 = vector.shape_cast %83 : vector<3x128xf32> to vector<3x128x1xf32>
    %85 = vector.broadcast %84 : vector<3x128x1xf32> to vector<3x128x128xf32>
    %86 = arith.subf %82, %85 : vector<3x128x128xf32>
    %87 = math.exp %86 : vector<3x128x128xf32>
    %cst_31 = arith.constant dense<0.000000e+00> : vector<3x128xf32>
    %88 = vector.multi_reduction <add>, %87, %cst_31 [2] : vector<3x128x128xf32> to vector<3x128xf32>
    %89 = vector.shape_cast %88 : vector<3x128xf32> to vector<3x128x1xf32>
    %90 = vector.shape_cast %24 : vector<3x24xi1> to vector<3x1x24xi1>
    %91 = vector.shape_cast %68 : vector<128x24xf32> to vector<1x128x24xf32>
    %cst_32 = arith.constant 0.000000e+00 : f32
    %92 = vector.shape_cast %90 : vector<3x1x24xi1> to vector<3x1x24xi1>
    %93 = vector.broadcast %92 : vector<3x1x24xi1> to vector<3x128x24xi1>
    %94 = vector.shape_cast %91 : vector<1x128x24xf32> to vector<1x128x24xf32>
    %95 = vector.broadcast %94 : vector<1x128x24xf32> to vector<3x128x24xf32>
    %96 = vector.broadcast %cst_32 : f32 to vector<3x128x24xf32>
    %97 = arith.select %93, %95, %96 : vector<3x128x24xi1>, vector<3x128x24xf32>
    "tpu.trace_start"() <{level = 10 : i32, message = "hnm,hmf->hnf"}> : () -> ()
    %cst_33 = arith.constant dense<0.000000e+00> : vector<3x128x24xf32>
    %98 = tpu.matmul %87, %97, %cst_33 {dimension_numbers = #tpu.dot_dimension_numbers<[2], [1], [1], [2], [0, 0, 0, 1, 1, 2], [0], [0]>} : vector<3x128x128xf32>, vector<3x128x24xf32>, vector<3x128x24xf32> -> vector<3x128x24xf32>
    "tpu.trace_stop"() : () -> ()
    %99 = tpu.reciprocal %89 {approx = true} : vector<3x128x1xf32> -> vector<3x128x1xf32>
    %100 = vector.broadcast %99 : vector<3x128x1xf32> to vector<3x128x24xf32>
    %101 = arith.mulf %98, %100 : vector<3x128x24xf32>
    %cst_34 = arith.constant dense<0.000000e+00> : vector<128x24xf32>
    %102 = vector.multi_reduction <add>, %101, %cst_34 [0] : vector<3x128x24xf32> to vector<128x24xf32>
    %103 = vector.broadcast %13 : vector<1x24xf32> to vector<128x24xf32>
    %104 = arith.addf %102, %103 : vector<128x24xf32>
    %cst_35 = arith.constant 0.000000e+00 : f32
    %105 = vector.broadcast %cst_35 : f32 to vector<128x24xf32>
    %106 = arith.cmpf ogt, %104, %105 : vector<128x24xf32>
    %107 = math.exp %104 : vector<128x24xf32>
    %cst_36 = arith.constant 1.000000e+00 : f32
    %108 = vector.broadcast %cst_36 : f32 to vector<128x24xf32>
    %109 = arith.subf %107, %108 : vector<128x24xf32>
    %110 = arith.select %106, %104, %109 : vector<128x24xi1>, vector<128x24xf32>
    %cst_37 = arith.constant dense<0.000000e+00> : vector<128x128xf32>
    %111 = tpu.matmul %110, %14, %cst_37 {dimension_numbers = #tpu.dot_dimension_numbers<[1], [0], [0], [1], [0, 0, 1, 1], [], []>} : vector<128x24xf32>, vector<24x128xf32>, vector<128x128xf32> -> vector<128x128xf32>
    %112 = vector.broadcast %15 : vector<1x128xf32> to vector<128x128xf32>
    %113 = arith.addf %111, %112 : vector<128x128xf32>
    %c0_38 = arith.constant 0 : index
    %c0_39 = arith.constant 0 : index
    %114 = vector.load %arg5[%c0_38, %c0_39] : memref<128x128xf32, #tpu.memory_space<vmem>>, vector<128x128xf32>
    tpu.vector_store %arg5[%c0_38, %c0_39], %113 {strides = array<i32>} : memref<128x128xf32, #tpu.memory_space<vmem>>, vector<128x128xf32>,
    return
  }
  func.func @transform_0(%arg0: i32) -> (i32, i32) {
    %c0_i32 = arith.constant 0 : i32
    %c0_i32_0 = arith.constant 0 : i32
    return %arg0, %c0_i32 : i32, i32
  }
  func.func @transform_1(%arg0: i32) -> (i32, i32, i32) {
    %c0_i32 = arith.constant 0 : i32
    %c0_i32_0 = arith.constant 0 : i32
    %c0_i32_1 = arith.constant 0 : i32
    return %arg0, %c0_i32, %c0_i32_0 : i32, i32, i32
  }
  func.func @transform_2(%arg0: i32) -> (i32, i32) {
    %c0_i32 = arith.constant 0 : i32
    %c0_i32_0 = arith.constant 0 : i32
    %c0_i32_1 = arith.constant 0 : i32
    return %c0_i32, %c0_i32_0 : i32, i32
  }
  func.func @transform_3(%arg0: i32) -> (i32, i32) {
    %c0_i32 = arith.constant 0 : i32
    %c0_i32_0 = arith.constant 0 : i32
    %c0_i32_1 = arith.constant 0 : i32
    return %c0_i32, %c0_i32_0 : i32, i32
  }
  func.func @transform_4(%arg0: i32) -> (i32, i32) {
    %c0_i32 = arith.constant 0 : i32
    %c0_i32_0 = arith.constant 0 : i32
    return %arg0, %c0_i32 : i32, i32
  }
}

</mosaic_0001>

<bundles_post_ra>
// kernel: tpu_custom_call.1
= control target key start
LH: loop header
LB: loop body
LE: loop exit
PB: predicated region body
PF: predicated region fallthrough
CT: control target
= control target key end

     0   :  { %9 = vsyncpa [#allocation3], 0  ;;  %s8283_s0 = inlined_call_operand.vmem [shape: f32[256,8], index: 0, kind: input, shape index: {}]   ;;  %s8284_s1 = inlined_call_operand.vmem [shape: s8[2,128,128], index: 1, kind: input, shape index: {}]   ;;  %s8285_s2 = inlined_call_operand.vmem [shape: f32[64,24], index: 2, kind: input, shape index: {}]   ;;  %s8286_s3 = inlined_call_operand.vmem [shape: f32[32,128], index: 3, kind: input, shape index: {}]   ;;  %s8287_s4 = inlined_call_operand.hbm [shape: f32[256,128], index: 4, kind: output, shape index: {}]  }
   0x1   :  { %11 = vsyncpa [#allocation3 + $0x1], 0  ;;  %s5991_s15 = smov 0   ;;  %s5993_s16 = smov 0  }
   0x2   :  { %s5995_s17 = smov 0   ;;  %s5997_s18 = smov 0  }
   0x3 LB: > { %s6012_s19 = sadd.s32 4294967295, %s5957_s18   ;;  %s4386_s20 = sadd.s32 4294967294, %s5957_s18   ;;  %s5957_s18 = sphi %s5997_s18, %s8502_s18   ;;  %s5953_s17 = sphi %s5995_s17, %s8501_s17   ;;  %s5949_s16 = sphi %s5993_s16, %s8500_s16   ;;  %s5945_s15 = sphi %s5991_s15, %s8499_s15  }
   0x4   : > { %s6016_s21 = sadd.s32 1, %s5957_s18   ;;  %s118_s22 = sadd.s32 1, %s5953_s17 }
   0x5   : > { %s115_s23 = ssub.s32 %s5957_s18, %s6016_s21  ;;  %p128_p0 = scmp.ne.s32.totalorder %s5953_s17, %s5949_s16 }
   0x6   : > { %p116_p1 = scmp.eq.s32.totalorder %s115_s23, 0  ;;  %p129_p2 = scmp.eq.s32.totalorder %s6012_s19, 1 }
   0x7   : > { %p134_p3 = scmp.ne.s32.totalorder %s5949_s16, %s5945_s15  ;;  %p135_p4 = scmp.eq.s32.totalorder %s4386_s20, 1 }
   0x8   : > { %s6027_s24 = scalar_select %p116_p1, %s5953_s17, %s118_s22  }
   0x9   : > { %p6029_p5 = por %p129_p2, %p128_p0  ;;  %p6033_p6 = por %p135_p4, %p134_p3 }
   0xa   : > { %p4389_p7 = scmp.ge.s32.totalorder %s5957_s18, 1  ;;  %p176_p8 = scmp.lt.s32.totalorder %s5957_s18, 3 }
   0xc   : > { %p177_p9 = pnand %p4389_p7, %p176_p8 }
   0xe   : > { %180 = sbr.rel (%p177_p9) target bundleno = 2364 (0x93c), region = 36 }
  0x13   : > { %v303_v0 = vld [vmem:[%s8285_s2] sm:$0xff]  ;;  %s4391_s29 = sshll.u32 %s6012_s19, 4  ;;  %vm324_vm0 = vcmask 64512   ;;  %v8290_v17 = vmov 0.0   ;;  %vm5960_vm1 = vmmov 0   ;;  %v315_v18 = vlaneseq  ;;  %p213_p11 = scmp.lt.s32.totalorder %s6012_s19, 1 }
  0x14   : > { %4912 = vmatprep.subr.mxu0 %v303_v0  ;;  %p208_p10 = scmp.lt.s32.totalorder %s4391_s29, 31  ;;  %4938 = vmatprep.subr.mxu1 %v8290_v17  ;;  %v5961_v23 = vmov 1966171168   ;;  %v5962_v30 = vmov 0   ;;  %vm518_vm6 = vcmask 195584   ;;  %v8392_v48 = vmov 0 }
  0x15   : > { %4913 = vmatpush3.msra.mxu0 %v303_v0  ;;  %4970 = vmatprep.mubr.msk.f32.mxu1 %vm5960_vm1, %v8290_v17  ;;  %v6083_v19 = vshrl.u32 %v315_v18, 7  ;;  %v316_v21 = vand.u32 127, %v315_v18  ;;  %v844_v24 = vunpack.c.l.s4 %v5961_v23  ;;  %v8397_v59 = vmov 0  ;;  %v304_v60 = vld [vmem:[%s8285_s2 + $0x8] sm:$0x3f]  ;;  %s214_s10 = scalar_select %p213_p11, %s6012_s19, 1 }
  0x16   : > { %s8504_s29 = smov (!%p208_p10, %s4391_s29), 31  ;;  %s204_s22 = sand.u32 1, %s5949_s16  }
  0x17   : > { %s4392_s30 = sshll.u32 %s8504_s29, 3  ;;  %8382 = vst [vmem:[#allocation5_spill] sm:$0xff] %v6083_v19  ;;  %v319_v20 = vmul.u32 8, %v6083_v19  ;;  %v845_v26 = vunpack.c.0.s8 %v844_v24  ;;  %v6116_v41 = vsub.s32 0, %v6083_v19  ;;  %v8289_v0 = vsub.s32 1, %v6083_v19  ;;  %s4629_s11 = sshll.u32 %s214_s10, 5 }
  0x18   : > { %s6046_s7 = scalar_lea.vmem %s8283_s0, %s4392_s30  ;;  %s6417_s14 = scalar_lea.vmem %s8284_s1, %s4629_s11 }
  0x19   : > { %v219_v1 = vld [vmem:[%s6046_s7] sm:$0xff]  ;;  %v220_v2 = vld [vmem:[%s6046_s7 + $0x8] sm:$0xff]  ;;  %v221_v3 = vld [vmem:[%s6046_s7 + $0x10] sm:$0xff]  ;;  %v321_v22 = vadd.s32 8, %v319_v20  ;;  %vm320_vm2 = vcmp.ge.s32.totalorder %v316_v21, %v319_v20  ;;  %v6093_v29 = vsub.s32 %v845_v26, %v6083_v19  ;;  %8391 = vst [vmem:[#allocation14_spill] sm:$0xff] %v6116_v41  ;;  %s4390_s23 = sshll.u32 %s204_s22, 7 }
  0x1a   : > { %4914 = vmatprep.mubr.msk.f32.mxu0 %vm324_vm0, %v219_v1  ;;  %v222_v4 = vld [vmem:[%s6046_s7 + $0x18] sm:$0xff]  ;;  %v223_v5 = vld [vmem:[%s6046_s7 + $0x20] sm:$0xff]  ;;  %v224_v6 = vld [vmem:[%s6046_s7 + $0x28] sm:$0xff]  ;;  %s8214_s29 = scalar_lea.vmem [#allocation2], %s4390_s23  ;;  %s4630_s30 = sshll.u32 %s6012_s19, 11 }
  0x1b   : > { %4915 = vmatmul.mubr.msk.f32.vlgmr.msra.gmra.mxu0 %vm324_vm0, %v220_v2  ;;  %v225_v7 = vld [vmem:[%s6046_s7 + $0x30] sm:$0xff]  ;;  %v226_v8 = vld [vmem:[%s6046_s7 + $0x38] sm:$0xff]  ;;  %v227_v9 = vld [vmem:[%s6046_s7 + $0x40] sm:$0xff]  ;;  %vm322_vm3 = vcmp.lt.s32.totalorder %v316_v21, %v321_v22  ;;  %8386 = vst [vmem:[#allocation9_spill] sm:$0xff] %v6093_v29  ;;  %v8288_v2 = vsub.s32 2, %v6083_v19  ;;  %s4312_s5 = sshll.u32 %s8214_s29, 4  ;;  %s8235_s8 = scalar_lea.hbm %s8287_s4, %s4630_s30  ;;  %s8237_s5 = int_to_ptr.vmem [resolvable:$true] %s4312_s5 }
  0x1c   : > { %4917 = vmatprep.mubr.msk.f32.mxu0 %vm324_vm0, %v221_v3  ;;  %v228_v10 = vld [vmem:[%s6046_s7 + $0x48] sm:$0xff]  ;;  %v229_v11 = vld [vmem:[%s6046_s7 + $0x50] sm:$0xff]  ;;  %v230_v12 = vld [vmem:[%s6046_s7 + $0x58] sm:$0xff]  ;;  %s8243_s9 = scalar_lea.sflag [#allocation3], %s204_s22  ;;  %s5897_s19 = scalar_lea.vmem %s8237_s5, 2048 }
  0x1d   : > { %v231_v13 = vld [vmem:[%s6046_s7 + $0x60] sm:$0xff]  ;;  %v232_v14 = vld [vmem:[%s6046_s7 + $0x68] sm:$0xff]  ;;  %v233_v15 = vld [vmem:[%s6046_s7 + $0x70] sm:$0xff]  ;;  %p5898_p12 = scmp.ne.s32.totalorder %s8237_s5, %s5897_s19  ;;  %s5963_s10 = smov [#allocation2]  }
  0x1e   : > { %v234_v16 = vld [vmem:[%s6046_s7 + $0x78] sm:$0xff]  ;;  %vm323_vm4 = vmand %vm320_vm2, %vm322_vm3  ;;  %s5901_s11 = sshll.u32 %s5963_s10, 4  ;;  %s5902_s11 = int_to_ptr.vmem [resolvable:$false] %s5901_s11 }
  0x1f   : > { %4918 = vmatmul.mubr.msk.f32.gmra.mxu0 %vm324_vm0, %v222_v4  ;;  %v1424_v31 = vsel %vm323_vm4, 1, %v5962_v30  ;;  %p5899_p13 = pnand %p5898_p12, %p6029_p5  ;;  %s5903_s12 = scalar_lea.vmem %s5902_s11, 4096 }
  0x20   : > { %4920 = vmatprep.mubr.msk.f32.mxu0 %vm324_vm0, %v223_v5  ;;  %v1431_v34 = vrot.slane %v1424_v31, %v6093_v29  ;;  %p5904_p1 = scmp.lt.s32.totalorder %s8237_s5, %s5902_s11  ;;  %p5905_p2 = scmp.lt.s32.totalorder %s5903_s12, %s5897_s19 }
  0x21   : > { %p5900_p0 = pneg %p5899_p13 }
  0x22   : > { %v6106_v37 = vrot.slane %v1431_v34, %v6093_v29  ;;  %v1432_v51 = vcombine.high %v1431_v34, %v1431_v34  ;;  %p5906_p3 = por %p5905_p2, %p5904_p1 }
  0x23   : > { %4921 = vmatmul.mubr.msk.f32.gmra.mxu0 %vm324_vm0, %v224_v6  ;;  %v235_v6 = vld [vmem:[%s6417_s14] sm:$0xff] }
  0x24   : > { %4923 = vmatprep.mubr.msk.f32.mxu0 %vm324_vm0, %v225_v7  ;;  %vm1448_vm5 = vcmp.ne.s32.totalorder %v6106_v37, 0  ;;  %v1446_v52 = vrot.slane %v1432_v51, %v6093_v29  ;;  %v1447_v56 = vcombine.high %v6106_v37, %v6106_v37  ;;  %v239_v7 = vunpack.c.0.s8 %v235_v6  ;;  %p5907_p4 = pnand %p5906_p3, %p5900_p0 }
  0x25   : > { %v1451_v42 = vsel %vm1448_vm5, 1, %v5962_v30 }
  0x26   : > { %v1457_v45 = vrot.slane %v1451_v42, %v6116_v41  ;;  %vm1449_vm8 = vcmp.ne.s32.totalorder %v1446_v52, 0  ;;  %vm1450_vm10 = vcmp.ne.s32.totalorder %v1447_v56, 0  ;;  %v6430_v56 = vld [vmem:[%s6417_s14 + $0x10] sm:$0xff] }
  0x27   : > { %4924 = vmatmul.mubr.msk.f32.gmra.mxu0 %vm324_vm0, %v226_v8  ;;  %v1452_v53 = vsel %vm1449_vm8, 1, %v5962_v30  ;;  %v1453_v57 = vsel %vm1450_vm10, 1, %v5962_v30 }
  0x28   : > { %4926 = vmatprep.mubr.msk.f32.mxu0 %vm324_vm0, %v227_v9  ;;  %vm6128_vm7 = vcmp.eq.s32.totalorder %v1457_v45, 1  ;;  %v1461_v54 = vrot.slane %v1452_v53, %v6116_v41  ;;  %v1465_v58 = vrot.slane %v1453_v57, %v6116_v41  ;;  %v241_v9 = vunpack.c.2.s8 %v235_v6 }
  0x29   : > { %v8393_v48 = vsel %vm6128_vm7, 4294967295, %v8392_v48 }
  0x2a   : > { %8394 = vst [vmem:[#allocation15_spill] sm:$0xff] %v8393_v48  ;;  %vm6253_vm9 = vcmp.eq.s32.totalorder %v1461_v54, 1  ;;  %vm6291_vm11 = vcmp.eq.s32.totalorder %v1465_v58, 1 }
  0x2b   : > { %4927 = vmatmul.mubr.msk.f32.gmra.mxu0 %vm324_vm0, %v228_v10  ;;  %v8398_v59 = vsel %vm6291_vm11, 4294967295, %v8397_v59  ;;  %v240_v10 = vunpack.c.1.s8 %v235_v6 }
  0x2c   : > { %4929 = vmatprep.mubr.msk.f32.mxu0 %vm324_vm0, %v229_v11  ;;  %8399 = vst [vmem:[#allocation16_spill] sm:$0xff] %v8398_v59  ;;  %v255_v11 = vcvt.s32.f32 %v239_v7 }
  0x2e   : > { %v4395_v18 = vadd.f32 -1.0, %v255_v11 }
  0x2f   : > { %4930 = vmatmul.mubr.msk.f32.gmra.mxu0 %vm324_vm0, %v230_v12  ;;  %v242_v12 = vunpack.c.3.s8 %v235_v6 }
  0x30   : > { %4932 = vmatprep.mubr.msk.f32.mxu0 %vm324_vm0, %v231_v13  ;;  %v6427_v42 = vmul.f32 1e+30, %v4395_v18 }
  0x31   : > { %v258_v20 = vcvt.s32.f32 %v242_v12 }
  0x32   : > { %8400 = vst [vmem:[#allocation17_spill] sm:$0xff] %v6427_v42 }
  0x33   : > { %4933 = vmatmul.mubr.msk.f32.gmra.mxu0 %vm324_vm0, %v232_v14  ;;  %v236_v14 = vld [vmem:[%s6417_s14 + $0x8] sm:$0xff]  ;;  %v4398_v45 = vadd.f32 -1.0, %v258_v20  ;;  %v248_v20 = vunpack.c.1.s8 %v6430_v56 }
  0x34   : > { %4935 = vmatprep.mubr.msk.f32.mxu0 %vm324_vm0, %v233_v15  ;;  %v257_v15 = vcvt.s32.f32 %v241_v9  ;;  %v243_v21 = vunpack.c.0.s8 %v236_v14  ;;  %v244_v37 = vunpack.c.1.s8 %v236_v14  ;;  %v245_v52 = vunpack.c.2.s8 %v236_v14 }
  0x35   : > { %v6438_v6 = vmul.f32 1e+30, %v4398_v45  ;;  %v247_v9 = vunpack.c.0.s8 %v6430_v56 }
  0x36   : > { %v4397_v26 = vadd.f32 -1.0, %v257_v15  ;;  %v259_v51 = vcvt.s32.f32 %v243_v21  ;;  %v249_v21 = vunpack.c.2.s8 %v6430_v56 }
  0x37   : > { %4936 = vmatmul.mubr.msk.f32.gmra.mxu0 %vm324_vm0, %v234_v16  ;;  %v256_v16 = vcvt.s32.f32 %v240_v10  ;;  %8403 = vst [vmem:[#allocation20_spill] sm:$0xff] %v6438_v6 }
  0x38   : > { %v4399_v7 = vadd.f32 -1.0, %v259_v51 }
  0x39   : > { %v4396_v30 = vadd.f32 -1.0, %v256_v16 }
  0xdb   : > { %v6086_v25 = vpop.f32.mrf.mxu0 }
  0xdc   : > { %8383 = vst [vmem:[#allocation6_spill] sm:$0xff] %v6086_v25 }
  0xdd   : > { %v6088_v27 = vpop.f32.mrf.mxu0 }
  0xde   : > { %8384 = vst [vmem:[#allocation7_spill] sm:$0xff] %v6088_v27 }
  0xdf   : > { %v6090_v28 = vpop.f32.mrf.mxu0 }
  0xe0   : > { %8385 = vst [vmem:[#allocation8_spill] sm:$0xff] %v6090_v28 }
  0xe1   : > { %v6096_v32 = vpop.f32.mrf.mxu0 }
  0xe2   : > { %8387 = vst [vmem:[#allocation10_spill] sm:$0xff] %v6096_v32 }
  0xe3   : > { %v6098_v33 = vpop.f32.mrf.mxu0 }
  0xe4   : > { %8388 = vst [vmem:[#allocation11_spill] sm:$0xff] %v6098_v33 }
  0xe5   : > { %v6101_v35 = vpop.f32.mrf.mxu0 }
  0xe6   : > { %8389 = vst [vmem:[#allocation12_spill] sm:$0xff] %v6101_v35 }
  0xe7   : > { %v6103_v36 = vpop.f32.mrf.mxu0 }
  0xe9   : > { %v6108_v38 = vpop.f32.mrf.mxu0 }
  0xea   : > { %8390 = vst [vmem:[#allocation13_spill] sm:$0xff] %v6108_v38 }
  0xeb   : > { %v6110_v39 = vpop.f32.mrf.mxu0 }
  0xed   : > { %v6113_v40 = vpop.f32.mrf.mxu0 }
  0xef   : > { %v6119_v43 = vpop.f32.mrf.mxu0 }
  0xf1   : > { %v6121_v44 = vpop.f32.mrf.mxu0 }
  0xf3   : > { %v6124_v46 = vpop.f32.mrf.mxu0 }
  0xf5   : > { %v6126_v47 = vpop.f32.mrf.mxu0 }
  0xf7   : > { %v6132_v49 = vpop.f32.mrf.mxu0 }
  0xf8   : > { %4939 = vmatpush3.xpose.msk.msra.mxu1 %vm518_vm6, %v6132_v49  ;;  %4973 = vmatprep.subr.msk.mxu0 %vm6128_vm7, %v6132_v49 }
  0xf9   : > { %v6139_v50 = vpop.f32.mrf.mxu0  ;;  %4974 = vmatpush3.msk.msra.mxu0 %vm6128_vm7, %v6132_v49  ;;  %4940 = vmatprep.subr.mxu1 %v8290_v17 }
  0xfa   : > { %4975 = vmatprep.subr.msk.mxu0 %vm6128_vm7, %v6139_v50 }
  0xfb   : > { %4976 = vmatpush3.msk.msra.mxu0 %vm6128_vm7, %v6139_v50 }
  0xfc   : > { %4941 = vmatpush3.xpose.msk.msra.mxu1 %vm518_vm6, %v6139_v50  ;;  %4977 = vmatprep.subr.msk.mxu0 %vm6128_vm7, %v6124_v46 }
  0xfd   : > { %4978 = vmatpush3.msk.msra.mxu0 %vm6128_vm7, %v6124_v46  ;;  %4942 = vmatprep.subr.mxu1 %v8290_v17 }
  0xfe   : > { %4979 = vmatprep.subr.msk.mxu0 %vm6128_vm7, %v6126_v47 }
  0xff   : > { %4980 = vmatpush3.msk.msra.mxu0 %vm6128_vm7, %v6126_v47 }
 0x100   : > { %4943 = vmatpush3.xpose.msk.msra.mxu1 %vm518_vm6, %v6124_v46  ;;  %4981 = vmatprep.subr.msk.mxu0 %vm6128_vm7, %v6119_v43 }
 0x101   : > { %4982 = vmatpush3.msk.msra.mxu0 %vm6128_vm7, %v6119_v43  ;;  %4944 = vmatprep.subr.mxu1 %v8290_v17 }
 0x102   : > { %4983 = vmatprep.subr.msk.mxu0 %vm6128_vm7, %v6121_v44 }
 0x103   : > { %4984 = vmatpush3.msk.msra.mxu0 %vm6128_vm7, %v6121_v44 }
 0x104   : > { %4945 = vmatpush3.xpose.msk.msra.mxu1 %vm518_vm6, %v6126_v47  ;;  %4985 = vmatprep.subr.msk.mxu0 %vm6128_vm7, %v6110_v39 }
 0x105   : > { %4986 = vmatpush3.msk.msra.mxu0 %vm6128_vm7, %v6110_v39  ;;  %4946 = vmatprep.subr.mxu1 %v8290_v17 }
 0x106   : > { %4987 = vmatprep.subr.msk.mxu0 %vm6128_vm7, %v6113_v40 }
 0x107   : > { %4988 = vmatpush3.msk.msra.mxu0 %vm6128_vm7, %v6113_v40 }
 0x108   : > { %4947 = vmatpush3.xpose.msk.msra.mxu1 %vm518_vm6, %v6119_v43  ;;  %4989 = vmatprep.subr.msk.mxu0 %vm6128_vm7, %v6103_v36 }
 0x109   : > { %4990 = vmatpush3.msk.msra.mxu0 %vm6128_vm7, %v6103_v36  ;;  %4948 = vmatprep.subr.mxu1 %v8290_v17 }
 0x10a   : > { %4991 = vmatprep.subr.msk.mxu0 %vm6128_vm7, %v6108_v38 }
 0x10b   : > { %4992 = vmatpush3.msk.msra.mxu0 %vm6128_vm7, %v6108_v38 }
 0x10c   : > { %4949 = vmatpush3.xpose.msk.msra.mxu1 %vm518_vm6, %v6121_v44  ;;  %4993 = vmatprep.subr.msk.mxu0 %vm6128_vm7, %v6098_v33 }
 0x10d   : > { %4994 = vmatpush3.msk.msra.mxu0 %vm6128_vm7, %v6098_v33  ;;  %4950 = vmatprep.subr.mxu1 %v8290_v17 }
 0x10e   : > { %4995 = vmatprep.subr.msk.mxu0 %vm6128_vm7, %v6101_v35 }
 0x10f   : > { %4996 = vmatpush3.msk.msra.mxu0 %vm6128_vm7, %v6101_v35 }
 0x110   : > { %4951 = vmatpush3.xpose.msk.msra.mxu1 %vm518_vm6, %v6110_v39  ;;  %4997 = vmatprep.subr.msk.mxu0 %vm6128_vm7, %v6090_v28 }
 0x111   : > { %4998 = vmatpush3.msk.msra.mxu0 %vm6128_vm7, %v6090_v28  ;;  %4952 = vmatprep.subr.mxu1 %v8290_v17 }
 0x112   : > { %4999 = vmatprep.subr.msk.mxu0 %vm6128_vm7, %v6096_v32 }
 0x113   : > { %5000 = vmatpush3.msk.msra.mxu0 %vm6128_vm7, %v6096_v32 }
 0x114   : > { %4953 = vmatpush3.xpose.msk.msra.mxu1 %vm518_vm6, %v6113_v40  ;;  %5001 = vmatprep.subr.msk.mxu0 %vm6128_vm7, %v6086_v25 }
 0x115   : > { %5002 = vmatpush3.msk.msra.mxu0 %vm6128_vm7, %v6086_v25  ;;  %4954 = vmatprep.subr.mxu1 %v8290_v17 }
 0x116   : > { %5003 = vmatprep.subr.msk.mxu0 %vm6128_vm7, %v6088_v27 }
 0x117   : > { %5004 = vmatpush3.msk.msra.mxu0 %vm6128_vm7, %v6088_v27 }
 0x118   : > { %4955 = vmatpush3.xpose.msk.msra.mxu1 %vm518_vm6, %v6103_v36  ;;  %5029 = vmatprep.subr.msk.mxu0 %vm6253_vm9, %v6132_v49 }
 0x119   : > { %4956 = vmatprep.subr.mxu1 %v8290_v17 }
 0x11c   : > { %4957 = vmatpush3.xpose.msk.msra.mxu1 %vm518_vm6, %v6108_v38 }
 0x11d   : > { %4958 = vmatprep.subr.mxu1 %v8290_v17 }
 0x120   : > { %4959 = vmatpush3.xpose.msk.msra.mxu1 %vm518_vm6, %v6098_v33 }
 0x121   : > { %4960 = vmatprep.subr.mxu1 %v8290_v17 }
 0x124   : > { %4961 = vmatpush3.xpose.msk.msra.mxu1 %vm518_vm6, %v6101_v35 }
 0x125   : > { %4962 = vmatprep.subr.mxu1 %v8290_v17 }
 0x128   : > { %4963 = vmatpush3.xpose.msk.msra.mxu1 %vm518_vm6, %v6090_v28 }
 0x129   : > { %4964 = vmatprep.subr.mxu1 %v8290_v17 }
 0x12c   : > { %4965 = vmatpush3.xpose.msk.msra.mxu1 %vm518_vm6, %v6096_v32 }
 0x12d   : > { %4966 = vmatprep.subr.mxu1 %v8290_v17 }
 0x130   : > { %4967 = vmatpush3.xpose.msk.msra.mxu1 %vm518_vm6, %v6086_v25 }
 0x131   : > { %4968 = vmatprep.subr.mxu1 %v8290_v17 }
 0x134   : > { %4969 = vmatpush3.xpose.msk.msra.mxu1 %vm518_vm6, %v6088_v27 }
 0x135   : > { %5085 = vmatprep.subr.msk.mxu1 %vm6291_vm11, %v6132_v49 }
 0x137   : > { %4971 = vmatmul.mubr.msk.f32.vlgmr.msra.gmra.mxu1 %vm518_vm6, %v304_v60  ;;  %v6432_v60 = vmul.f32 1e+30, %v4397_v26 }
 0x138   : > { %5086 = vmatpush3.msk.msra.mxu1 %vm6291_vm11, %v6132_v49 }
 0x139   : > { %5087 = vmatprep.subr.msk.mxu1 %vm6291_vm11, %v6139_v50  ;;  %8401 = vst [vmem:[#allocation18_spill] sm:$0xff] %v6432_v60 }
 0x13a   : > { %5088 = vmatpush3.msk.msra.mxu1 %vm6291_vm11, %v6139_v50 }
 0x13b   : > { %5089 = vmatprep.subr.msk.mxu1 %vm6291_vm11, %v6124_v46 }
 0x13c   : > { %5090 = vmatpush3.msk.msra.mxu1 %vm6291_vm11, %v6124_v46 }
 0x13d   : > { %5091 = vmatprep.subr.msk.mxu1 %vm6291_vm11, %v6126_v47 }
 0x13e   : > { %5092 = vmatpush3.msk.msra.mxu1 %vm6291_vm11, %v6126_v47 }
 0x13f   : > { %5093 = vmatprep.subr.msk.mxu1 %vm6291_vm11, %v6119_v43 }
 0x140   : > { %5094 = vmatpush3.msk.msra.mxu1 %vm6291_vm11, %v6119_v43 }
 0x141   : > { %5095 = vmatprep.subr.msk.mxu1 %vm6291_vm11, %v6121_v44 }
 0x142   : > { %5096 = vmatpush3.msk.msra.mxu1 %vm6291_vm11, %v6121_v44 }
 0x143   : > { %5097 = vmatprep.subr.msk.mxu1 %vm6291_vm11, %v6110_v39 }
 0x144   : > { %5098 = vmatpush3.msk.msra.mxu1 %vm6291_vm11, %v6110_v39 }
 0x145   : > { %5099 = vmatprep.subr.msk.mxu1 %vm6291_vm11, %v6113_v40 }
 0x146   : > { %5100 = vmatpush3.msk.msra.mxu1 %vm6291_vm11, %v6113_v40 }
 0x147   : > { %5101 = vmatprep.subr.msk.mxu1 %vm6291_vm11, %v6103_v36 }
 0x148   : > { %5102 = vmatpush3.msk.msra.mxu1 %vm6291_vm11, %v6103_v36 }
 0x149   : > { %5103 = vmatprep.subr.msk.mxu1 %vm6291_vm11, %v6108_v38 }
 0x14a   : > { %5104 = vmatpush3.msk.msra.mxu1 %vm6291_vm11, %v6108_v38 }
 0x14b   : > { %5105 = vmatprep.subr.msk.mxu1 %vm6291_vm11, %v6098_v33 }
 0x14c   : > { %5106 = vmatpush3.msk.msra.mxu1 %vm6291_vm11, %v6098_v33 }
 0x14d   : > { %5107 = vmatprep.subr.msk.mxu1 %vm6291_vm11, %v6101_v35 }
 0x14e   : > { %5108 = vmatpush3.msk.msra.mxu1 %vm6291_vm11, %v6101_v35 }
 0x14f   : > { %5109 = vmatprep.subr.msk.mxu1 %vm6291_vm11, %v6090_v28 }
 0x150   : > { %5110 = vmatpush3.msk.msra.mxu1 %vm6291_vm11, %v6090_v28 }
 0x151   : > { %5111 = vmatprep.subr.msk.mxu1 %vm6291_vm11, %v6096_v32 }
 0x152   : > { %5112 = vmatpush3.msk.msra.mxu1 %vm6291_vm11, %v6096_v32 }
 0x153   : > { %5113 = vmatprep.subr.msk.mxu1 %vm6291_vm11, %v6086_v25 }
 0x154   : > { %5114 = vmatpush3.msk.msra.mxu1 %vm6291_vm11, %v6086_v25 }
 0x155   : > { %5115 = vmatprep.subr.msk.mxu1 %vm6291_vm11, %v6088_v27 }
 0x156   : > { %5116 = vmatpush3.msk.msra.mxu1 %vm6291_vm11, %v6088_v27 }
 0x157   : > { %5171 = vmatprep.subr.mxu1 %v8290_v17 }
 0x1f7   : > { %v6398_v61 = vpop.f32.mrf.mxu1 }
 0x1f8   : > { %v643_v62 = vrot.slane %v6398_v61, %v6116_v41  ;;  %v710_v1 = vrot.slane %v6398_v61, %v8289_v0  ;;  %v777_v3 = vrot.slane %v6398_v61, %v8288_v2  ;;  %v849_v4 = vrot.slane %v6398_v61, %v6093_v29 }
 0x1f9   : > { %v4972_v63 = vpop.f32.mrf.mxu1 }
 0x1fa   : > { %653 = vbcast.lane.b32.xlu1 %v643_v62, 272  ;;  %645 = vbcast.lane.b32.xlu0 %v643_v62, 256  ;;  %v857_v5 = vcombine.high %v849_v4, %v849_v4  ;;  %v246_v63 = vunpack.c.3.s8 %v236_v14  ;;  %v842_v14 = vcombine.high %v6398_v61, %v6398_v61 }
 0x1fc   : > { %v872_v8 = vrot.slane %v857_v5, %v6093_v29  ;;  %v260_v5 = vcvt.s32.f32 %v244_v37  ;;  %v262_v18 = vcvt.s32.f32 %v246_v63  ;;  %v263_v37 = vcvt.s32.f32 %v247_v9 }
 0x1fe   : > { %657 = vbcast.lane.b32.xlu1 %v643_v62, 280  ;;  %649 = vbcast.lane.b32.xlu0 %v643_v62, 264  ;;  %v880_v13 = vcombine.high %v872_v8, %v872_v8  ;;  %v261_v8 = vcvt.s32.f32 %v245_v52  ;;  %v4402_v63 = vadd.f32 -1.0, %v262_v18 }
 0x200   : > { %v6423_v22 = vrot.slane %v880_v13, %v6116_v41  ;;  %v4401_v61 = vadd.f32 -1.0, %v261_v8 }
 0x202   : > { %665 = vbcast.lane.b32.xlu1 %v643_v62, 296  ;;  %661 = vbcast.lane.b32.xlu0 %v643_v62, 288 }
 0x206   : > { %673 = vbcast.lane.b32.xlu1 %v643_v62, 312  ;;  %669 = vbcast.lane.b32.xlu0 %v643_v62, 304 }
 0x20a   : > { %681 = vbcast.lane.b32.xlu1 %v643_v62, 328  ;;  %677 = vbcast.lane.b32.xlu0 %v643_v62, 320 }
 0x20e   : > { %689 = vbcast.lane.b32.xlu1 %v643_v62, 344  ;;  %685 = vbcast.lane.b32.xlu0 %v643_v62, 336 }
 0x212   : > { %697 = vbcast.lane.b32.xlu1 %v643_v62, 360  ;;  %693 = vbcast.lane.b32.xlu0 %v643_v62, 352 }
 0x216   : > { %705 = vbcast.lane.b32.xlu1 %v643_v62, 376  ;;  %701 = vbcast.lane.b32.xlu0 %v643_v62, 368  ;;  %v6434_v62 = vmul.f32 1e+30, %v4396_v30  ;;  %v4400_v30 = vadd.f32 -1.0, %v260_v5 }
 0x218   : > { %8402 = vst [vmem:[#allocation19_spill] sm:$0xff] %v6434_v62  ;;  %v6466_v9 = vmul.f32 1e+30, %v4400_v30 }
 0x21a   : > { %716 = vbcast.lane.b32.xlu1 %v710_v1, 264  ;;  %712 = vbcast.lane.b32.xlu0 %v710_v1, 256  ;;  %8405 = vst [vmem:[#allocation22_spill] sm:$0xff] %v6466_v9 }
 0x21e   : > { %783 = vbcast.lane.b32.xlu1 %v777_v3, 264  ;;  %779 = vbcast.lane.b32.xlu0 %v777_v3, 256 }
 0x222   : > { %724 = vbcast.lane.b32.xlu1 %v710_v1, 280  ;;  %720 = vbcast.lane.b32.xlu0 %v710_v1, 272 }
 0x226   : > { %791 = vbcast.lane.b32.xlu1 %v777_v3, 280  ;;  %787 = vbcast.lane.b32.xlu0 %v777_v3, 272 }
 0x22a   : > { %732 = vbcast.lane.b32.xlu1 %v710_v1, 296  ;;  %728 = vbcast.lane.b32.xlu0 %v710_v1, 288 }
 0x22e   : > { %799 = vbcast.lane.b32.xlu1 %v777_v3, 296  ;;  %795 = vbcast.lane.b32.xlu0 %v777_v3, 288 }
 0x232   : > { %740 = vbcast.lane.b32.xlu1 %v710_v1, 312  ;;  %736 = vbcast.lane.b32.xlu0 %v710_v1, 304 }
 0x236   : > { %807 = vbcast.lane.b32.xlu1 %v777_v3, 312  ;;  %803 = vbcast.lane.b32.xlu0 %v777_v3, 304 }
 0x23a   : > { %748 = vbcast.lane.b32.xlu1 %v710_v1, 328  ;;  %744 = vbcast.lane.b32.xlu0 %v710_v1, 320 }
 0x23e   : > { %815 = vbcast.lane.b32.xlu1 %v777_v3, 328  ;;  %811 = vbcast.lane.b32.xlu0 %v777_v3, 320 }
 0x242   : > { %756 = vbcast.lane.b32.xlu1 %v710_v1, 344  ;;  %752 = vbcast.lane.b32.xlu0 %v710_v1, 336 }
 0x246   : > { %823 = vbcast.lane.b32.xlu1 %v777_v3, 344  ;;  %819 = vbcast.lane.b32.xlu0 %v777_v3, 336 }
 0x24a   : > { %764 = vbcast.lane.b32.xlu1 %v710_v1, 360  ;;  %760 = vbcast.lane.b32.xlu0 %v710_v1, 352 }
 0x24e   : > { %831 = vbcast.lane.b32.xlu1 %v777_v3, 360  ;;  %827 = vbcast.lane.b32.xlu0 %v777_v3, 352 }
 0x252   : > { %772 = vbcast.lane.b32.xlu1 %v710_v1, 376  ;;  %768 = vbcast.lane.b32.xlu0 %v710_v1, 368 }
 0x256   : > { %839 = vbcast.lane.b32.xlu1 %v777_v3, 376  ;;  %835 = vbcast.lane.b32.xlu0 %v777_v3, 368 }
 0x26c   : > { %v654_v23 = vpop.permute.xlu1 %653  ;;  %v646_v24 = vpop.permute.xlu0 %645 }
 0x26d   : > { %v898_v31 = vadd.f32 %v6423_v22, %v654_v23  ;;  %v896_v34 = vadd.f32 %v6423_v22, %v646_v24 }
 0x26f   : > { %v946_v53 = vmul.f32 0.2, %v898_v31  ;;  %v944_v54 = vmul.f32 0.2, %v896_v34 }
 0x270   : > { %v658_v57 = vpop.permute.xlu1 %657  ;;  %v650_v58 = vpop.permute.xlu0 %649 }
 0x271   : > { %v899_v1 = vadd.f32 %v6423_v22, %v658_v57  ;;  %v897_v3 = vadd.f32 %v6423_v22, %v650_v58  ;;  %v992_v4 = vmax.f32 %v896_v34, %v944_v54  ;;  %v994_v13 = vmax.f32 %v898_v31, %v946_v53  ;;  %v6460_v54 = vld [vmem:[%s6417_s14 + $0x18] sm:$0xff] }
 0x272   : > { %v6451_v34 = vmul.f32 1e+30, %v4399_v7 }
 0x273   : > { %v947_v10 = vmul.f32 0.2, %v899_v1  ;;  %v945_v11 = vmul.f32 0.2, %v897_v3  ;;  %v6442_v12 = vadd.f32 %v992_v4, %v6427_v42  ;;  %v6454_v52 = vadd.f32 %v994_v13, %v6432_v60 }
 0x274   : > { %v666_v15 = vpop.permute.xlu1 %665  ;;  %v662_v16 = vpop.permute.xlu0 %661  ;;  %8404 = vst [vmem:[#allocation21_spill] sm:$0xff] %v6451_v34  ;;  %v265_v4 = vcvt.s32.f32 %v249_v21  ;;  %v4403_v13 = vadd.f32 -1.0, %v263_v37 }
 0x275   : > { %v901_v23 = vadd.f32 %v6423_v22, %v666_v15  ;;  %v900_v24 = vadd.f32 %v6423_v22, %v662_v16  ;;  %1088 = vmax.xlane.f32.xlu0 %v6442_v12  ;;  %v993_v26 = vmax.f32 %v897_v3, %v945_v11  ;;  %v995_v31 = vmax.f32 %v899_v1, %v947_v10 }
 0x276   : > { %v264_v3 = vcvt.s32.f32 %v248_v20  ;;  %v250_v1 = vunpack.c.3.s8 %v6430_v56  ;;  %v6472_v11 = vmul.f32 1e+30, %v4401_v61  ;;  %v251_v15 = vunpack.c.0.s8 %v6460_v54 }
 0x277   : > { %v949_v45 = vmul.f32 0.2, %v901_v23  ;;  %v948_v51 = vmul.f32 0.2, %v900_v24  ;;  %v6457_v53 = vadd.f32 %v993_v26, %v6434_v62  ;;  %v6470_v10 = vadd.f32 %v995_v31, %v6438_v6 }
 0x278   : > { %v674_v57 = vpop.permute.xlu1 %673  ;;  %v670_v58 = vpop.permute.xlu0 %669  ;;  %8406 = vst [vmem:[#allocation23_spill] sm:$0xff] %v6472_v11  ;;  %v6478_v26 = vmul.f32 1e+30, %v4402_v63  ;;  %v4404_v30 = vadd.f32 -1.0, %v264_v3  ;;  %v253_v63 = vunpack.c.2.s8 %v6460_v54 }
 0x279   : > { %v903_v5 = vadd.f32 %v6423_v22, %v674_v57  ;;  %v902_v7 = vadd.f32 %v6423_v22, %v670_v58  ;;  %1092 = vmax.xlane.f32.xlu0 %v6454_v52  ;;  %v996_v8 = vmax.f32 %v900_v24, %v948_v51  ;;  %v997_v20 = vmax.f32 %v901_v23, %v949_v45 }
 0x27a   : > { %1090 = vmax.xlane.f32.xlu1 %v6457_v53  ;;  %8407 = vst [vmem:[#allocation24_spill] sm:$0xff] %v6478_v26  ;;  %v4405_v51 = vadd.f32 -1.0, %v265_v4  ;;  %v266_v57 = vcvt.s32.f32 %v250_v1  ;;  %v252_v58 = vunpack.c.1.s8 %v6460_v54  ;;  %v6485_v23 = vmul.f32 1e+30, %v4403_v13 }
 0x27b   : > { %v951_v56 = vmul.f32 0.2, %v903_v5  ;;  %v950_v16 = vmul.f32 0.2, %v902_v7  ;;  %v6476_v18 = vadd.f32 %v996_v8, %v6451_v34  ;;  %v267_v45 = vcvt.s32.f32 %v251_v15 }
 0x27c   : > { %v682_v21 = vpop.permute.xlu1 %681  ;;  %v678_v24 = vpop.permute.xlu0 %677  ;;  %8408 = vst [vmem:[#allocation25_spill] sm:$0xff] %v6485_v23  ;;  %v6489_v1 = vadd.f32 %v997_v20, %v6466_v9  ;;  %v6495_v2 = vmul.f32 1e+30, %v4404_v30  ;;  %v4406_v13 = vadd.f32 -1.0, %v266_v57  ;;  %v268_v0 = vcvt.s32.f32 %v252_v58 }
 0x27d   : > { %v905_v31 = vadd.f32 %v6423_v22, %v682_v21  ;;  %v904_v61 = vadd.f32 %v6423_v22, %v678_v24  ;;  %1094 = vmax.xlane.f32.xlu0 %v6470_v10  ;;  %v998_v37 = vmax.f32 %v902_v7, %v950_v16  ;;  %v999_v8 = vmax.f32 %v903_v5, %v951_v56 }
 0x27e   : > { %1096 = vmax.xlane.f32.xlu1 %v6476_v18  ;;  %v856_v7 = vrot.slane %v842_v14, %v6093_v29  ;;  %8409 = vst [vmem:[#allocation26_spill] sm:$0xff] %v6495_v2  ;;  %v6497_v5 = vmul.f32 1e+30, %v4405_v51  ;;  %v4407_v14 = vadd.f32 -1.0, %v267_v45  ;;  %v269_v17 = vcvt.s32.f32 %v253_v63 }
 0x27f   : > { %v953_v3 = vmul.f32 0.2, %v905_v31  ;;  %v952_v4 = vmul.f32 0.2, %v904_v61  ;;  %v6492_v21 = vadd.f32 %v998_v37, %v6472_v11  ;;  %v6504_v37 = vadd.f32 %v999_v8, %v6478_v26 }
 0x280   : > { %v690_v16 = vpop.permute.xlu1 %689  ;;  %v686_v24 = vpop.permute.xlu0 %685  ;;  %8410 = vst [vmem:[#allocation27_spill] sm:$0xff] %v6497_v5  ;;  %v254_v30 = vunpack.c.3.s8 %v6460_v54  ;;  %v865_v59 = vrot.slane %v856_v7, %v6093_v29  ;;  %v4408_v63 = vadd.f32 -1.0, %v268_v0  ;;  %v6517_v48 = vmul.f32 1e+30, %v4407_v14 }
 0x281   : > { %v907_v15 = vadd.f32 %v6423_v22, %v690_v16  ;;  %v906_v56 = vadd.f32 %v6423_v22, %v686_v24  ;;  %1098 = vmax.xlane.f32.xlu0 %v6489_v1  ;;  %v1000_v20 = vmax.f32 %v904_v61, %v952_v4  ;;  %v1001_v16 = vmax.f32 %v905_v31, %v953_v3 }
 0x282   : > { %1100 = vmax.xlane.f32.xlu1 %v6492_v21  ;;  %v858_v24 = vcombine.high %v856_v7, %v856_v7  ;;  %v6511_v4 = vmul.f32 1e+30, %v4406_v13  ;;  %v4409_v31 = vadd.f32 -1.0, %v269_v17  ;;  %v270_v3 = vcvt.s32.f32 %v254_v30 }
 0x283   : > { %v955_v51 = vmul.f32 0.2, %v907_v15  ;;  %v954_v19 = vmul.f32 0.2, %v906_v56  ;;  %v6508_v57 = vadd.f32 %v1000_v20, %v6485_v23  ;;  %v6520_v13 = vadd.f32 %v1001_v16, %v6495_v2 }
 0x284   : > { %v698_v61 = vpop.permute.xlu1 %697  ;;  %v694_v58 = vpop.permute.xlu0 %693  ;;  %8411 = vst [vmem:[#allocation28_spill] sm:$0xff] %v6511_v4  ;;  %v6527_v0 = vrot.slane %v865_v59, %v6116_v41  ;;  %v6536_v30 = vmul.f32 1e+30, %v4408_v63  ;;  %v4410_v16 = vadd.f32 -1.0, %v270_v3 }
 0x285   : > { %v909_v8 = vadd.f32 %v6423_v22, %v698_v61  ;;  %v908_v45 = vadd.f32 %v6423_v22, %v694_v58  ;;  %1102 = vmax.xlane.f32.xlu0 %v6504_v37  ;;  %v1002_v54 = vmax.f32 %v906_v56, %v954_v19  ;;  %v1003_v20 = vmax.f32 %v907_v15, %v955_v51 }
 0x286   : > { %1104 = vmax.xlane.f32.xlu1 %v6508_v57  ;;  %v879_v58 = vrot.slane %v858_v24, %v6093_v29  ;;  %v6538_v51 = vmul.f32 1e+30, %v4409_v31  ;;  %v6550_v31 = vmul.f32 1e+30, %v4410_v16 }
 0x287   : > { %v957_v7 = vmul.f32 0.2, %v909_v8  ;;  %v956_v27 = vmul.f32 0.2, %v908_v45  ;;  %v6523_v61 = vadd.f32 %v1002_v54, %v6497_v5  ;;  %v6534_v14 = vadd.f32 %v1003_v20, %v6511_v4 }
 0x288   : > { %v706_v25 = vpop.permute.xlu1 %705  ;;  %v702_v19 = vpop.permute.xlu0 %701  ;;  %8412 = vst [vmem:[#allocation29_spill] sm:$0xff] %v6538_v51  ;;  %v6547_v63 = vrot.slane %v879_v58, %v6116_v41  ;;  %8413 = vst [vmem:[#allocation30_spill] sm:$0xff] %v6550_v31 }
 0x289   : > { %v911_v15 = vadd.f32 %v6423_v22, %v706_v25  ;;  %v910_v17 = vadd.f32 %v6423_v22, %v702_v19  ;;  %1106 = vmax.xlane.f32.xlu0 %v6520_v13  ;;  %v1004_v56 = vmax.f32 %v908_v45, %v956_v27  ;;  %v1005_v25 = vmax.f32 %v909_v8, %v957_v7 }
 0x28a   : > { %1108 = vmax.xlane.f32.xlu1 %v6523_v61 }
 0x28b   : > { %v959_v24 = vmul.f32 0.2, %v911_v15  ;;  %v958_v59 = vmul.f32 0.2, %v910_v17  ;;  %v6541_v54 = vadd.f32 %v1004_v56, %v6517_v48  ;;  %v6553_v8 = vadd.f32 %v1005_v25, %v6536_v30 }
 0x28c   : > { %v717_v22 = vpop.permute.xlu1 %716  ;;  %v713_v19 = vpop.permute.xlu0 %712 }
 0x28d   : > { %v913_v27 = vadd.f32 %v6527_v0, %v717_v22  ;;  %v912_v45 = vadd.f32 %v6527_v0, %v713_v19  ;;  %1110 = vmax.xlane.f32.xlu0 %v6534_v14  ;;  %v1006_v20 = vmax.f32 %v910_v17, %v958_v59  ;;  %v1007_v3 = vmax.f32 %v911_v15, %v959_v24 }
 0x28e   : > { %1112 = vmax.xlane.f32.xlu1 %v6541_v54 }
 0x28f   : > { %v961_v56 = vmul.f32 0.2, %v913_v27  ;;  %v960_v29 = vmul.f32 0.2, %v912_v45  ;;  %v6556_v7 = vadd.f32 %v1006_v20, %v6538_v51  ;;  %v6563_v15 = vadd.f32 %v1007_v3, %v6550_v31 }
 0x290   : > { %v784_v22 = vpop.permute.xlu1 %783  ;;  %v780_v19 = vpop.permute.xlu0 %779 }
 0x291   : > { %v929_v17 = vadd.f32 %v6547_v63, %v784_v22  ;;  %v928_v58 = vadd.f32 %v6547_v63, %v780_v19  ;;  %1114 = vmax.xlane.f32.xlu0 %v6553_v8  ;;  %v1008_v59 = vmax.f32 %v912_v45, %v960_v29  ;;  %v1009_v20 = vmax.f32 %v913_v27, %v961_v56 }
 0x292   : > { %1116 = vmax.xlane.f32.xlu1 %v6556_v7 }
 0x293   : > { %v977_v16 = vmul.f32 0.2, %v929_v17  ;;  %v976_v24 = vmul.f32 0.2, %v928_v58  ;;  %v6566_v25 = vadd.f32 %v1008_v59, %v6427_v42  ;;  %v6573_v35 = vadd.f32 %v1009_v20, %v6434_v62 }
 0x294   : > { %v725_v41 = vpop.permute.xlu1 %724  ;;  %v721_v32 = vpop.permute.xlu0 %720 }
 0x295   : > { %v915_v22 = vadd.f32 %v6527_v0, %v725_v41  ;;  %v914_v19 = vadd.f32 %v6527_v0, %v721_v32  ;;  %1118 = vmax.xlane.f32.xlu0 %v6563_v15  ;;  %v1024_v29 = vmax.f32 %v928_v58, %v976_v24  ;;  %v1025_v45 = vmax.f32 %v929_v17, %v977_v16 }
 0x296   : > { %1120 = vmax.xlane.f32.xlu1 %v6566_v25 }
 0x297   : > { %v963_v3 = vmul.f32 0.2, %v915_v22  ;;  %v962_v28 = vmul.f32 0.2, %v914_v19  ;;  %v6576_v59 = vadd.f32 %v1024_v29, %v6427_v42  ;;  %v6583_v17 = vadd.f32 %v1025_v45, %v6434_v62 }
 0x298   : > { %v792_v27 = vpop.permute.xlu1 %791  ;;  %v788_v56 = vpop.permute.xlu0 %787 }
 0x299   : > { %v931_v41 = vadd.f32 %v6547_v63, %v792_v27  ;;  %v930_v32 = vadd.f32 %v6547_v63, %v788_v56  ;;  %1122 = vmax.xlane.f32.xlu0 %v6573_v35  ;;  %v1010_v58 = vmax.f32 %v914_v19, %v962_v28  ;;  %v1011_v29 = vmax.f32 %v915_v22, %v963_v3 }
 0x29a   : > { %1152 = vmax.xlane.f32.xlu1 %v6576_v59 }
 0x29b   : > { %v979_v16 = vmul.f32 0.2, %v931_v41  ;;  %v978_v24 = vmul.f32 0.2, %v930_v32  ;;  %v6586_v20 = vadd.f32 %v1010_v58, %v6432_v60  ;;  %v6593_v38 = vadd.f32 %v1011_v29, %v6438_v6 }
 0x29c   : > { %v733_v42 = vpop.permute.xlu1 %732  ;;  %v729_v33 = vpop.permute.xlu0 %728 }
 0x29d   : > { %8414 = vst [vmem:[#allocation31_spill] sm:$0xff] %v6586_v20  ;;  %v917_v27 = vadd.f32 %v6527_v0, %v733_v42  ;;  %v916_v56 = vadd.f32 %v6527_v0, %v729_v33  ;;  %1154 = vmax.xlane.f32.xlu0 %v6583_v17  ;;  %v1026_v28 = vmax.f32 %v930_v32, %v978_v24 }
 0x29e   : > { %1124 = vmax.xlane.f32.xlu1 %v6586_v20  ;;  %v1027_v19 = vmax.f32 %v931_v41, %v979_v16 }
 0x29f   : > { %v965_v45 = vmul.f32 0.2, %v917_v27  ;;  %v964_v62 = vmul.f32 0.2, %v916_v56  ;;  %v6596_v58 = vadd.f32 %v1026_v28, %v6432_v60 }
 0x2a0   : > { %v800_v22 = vpop.permute.xlu1 %799  ;;  %v796_v3 = vpop.permute.xlu0 %795  ;;  %v6603_v41 = vadd.f32 %v1027_v19, %v6438_v6 }
 0x2a1   : > { %8415 = vst [vmem:[#allocation32_spill] sm:$0xff] %v6596_v58  ;;  %v933_v42 = vadd.f32 %v6547_v63, %v800_v22  ;;  %v932_v33 = vadd.f32 %v6547_v63, %v796_v3  ;;  %1126 = vmax.xlane.f32.xlu0 %v6593_v38  ;;  %v1012_v32 = vmax.f32 %v916_v56, %v964_v62 }
 0x2a2   : > { %1156 = vmax.xlane.f32.xlu1 %v6596_v58  ;;  %v1013_v28 = vmax.f32 %v917_v27, %v965_v45 }
 0x2a3   : > { %v981_v16 = vmul.f32 0.2, %v933_v42  ;;  %v980_v24 = vmul.f32 0.2, %v932_v33  ;;  %v6606_v29 = vadd.f32 %v1012_v32, %v6451_v34 }
 0x2a4   : > { %v741_v60 = vpop.permute.xlu1 %740  ;;  %v737_v20 = vpop.permute.xlu0 %736  ;;  %v6613_v58 = vadd.f32 %v1013_v28, %v6466_v9 }
 0x2a5   : > { %8416 = vst [vmem:[#allocation33_spill] sm:$0xff] %v6606_v29  ;;  %v919_v22 = vadd.f32 %v6527_v0, %v741_v60  ;;  %v918_v3 = vadd.f32 %v6527_v0, %v737_v20  ;;  %1158 = vmax.xlane.f32.xlu0 %v6603_v41  ;;  %v1028_v62 = vmax.f32 %v932_v33, %v980_v24 }
 0x2a6   : > { %1128 = vmax.xlane.f32.xlu1 %v6606_v29  ;;  %v1029_v56 = vmax.f32 %v933_v42, %v981_v16 }
 0x2a7   : > { %v967_v19 = vmul.f32 0.2, %v919_v22  ;;  %v966_v6 = vmul.f32 0.2, %v918_v3  ;;  %v6616_v32 = vadd.f32 %v1028_v62, %v6451_v34 }
 0x2a8   : > { %v808_v27 = vpop.permute.xlu1 %807  ;;  %v804_v45 = vpop.permute.xlu0 %803  ;;  %v6623_v42 = vadd.f32 %v1029_v56, %v6466_v9 }
 0x2a9   : > { %8417 = vst [vmem:[#allocation34_spill] sm:$0xff] %v6616_v32  ;;  %v935_v60 = vadd.f32 %v6547_v63, %v808_v27  ;;  %v934_v20 = vadd.f32 %v6547_v63, %v804_v45  ;;  %1130 = vmax.xlane.f32.xlu0 %v6613_v58  ;;  %v1014_v33 = vmax.f32 %v918_v3, %v966_v6 }
 0x2aa   : > { %1160 = vmax.xlane.f32.xlu1 %v6616_v32  ;;  %v1015_v62 = vmax.f32 %v919_v22, %v967_v19 }
 0x2ab   : > { %v983_v16 = vmul.f32 0.2, %v935_v60  ;;  %v982_v24 = vmul.f32 0.2, %v934_v20  ;;  %v6626_v28 = vadd.f32 %v1014_v33, %v6472_v11 }
 0x2ac   : > { %v749_v34 = vpop.permute.xlu1 %748  ;;  %v745_v29 = vpop.permute.xlu0 %744  ;;  %v6633_v32 = vadd.f32 %v1015_v62, %v6478_v26 }
 0x2ad   : > { %8418 = vst [vmem:[#allocation35_spill] sm:$0xff] %v6626_v28  ;;  %v921_v27 = vadd.f32 %v6527_v0, %v749_v34  ;;  %v920_v45 = vadd.f32 %v6527_v0, %v745_v29  ;;  %1162 = vmax.xlane.f32.xlu0 %v6623_v42  ;;  %v1030_v6 = vmax.f32 %v934_v20, %v982_v24 }
 0x2ae   : > { %1132 = vmax.xlane.f32.xlu1 %v6626_v28  ;;  %v1031_v3 = vmax.f32 %v935_v60, %v983_v16 }
 0x2af   : > { %v969_v56 = vmul.f32 0.2, %v921_v27  ;;  %v968_v9 = vmul.f32 0.2, %v920_v45  ;;  %v6636_v33 = vadd.f32 %v1030_v6, %v6472_v11 }
 0x2b0   : > { %v816_v22 = vpop.permute.xlu1 %815  ;;  %v812_v19 = vpop.permute.xlu0 %811  ;;  %v6643_v60 = vadd.f32 %v1031_v3, %v6478_v26 }
 0x2b1   : > { %8419 = vst [vmem:[#allocation36_spill] sm:$0xff] %v6636_v33  ;;  %v937_v34 = vadd.f32 %v6547_v63, %v816_v22  ;;  %v936_v29 = vadd.f32 %v6547_v63, %v812_v19  ;;  %1134 = vmax.xlane.f32.xlu0 %v6633_v32  ;;  %v1016_v20 = vmax.f32 %v920_v45, %v968_v9 }
 0x2b2   : > { %1164 = vmax.xlane.f32.xlu1 %v6636_v33  ;;  %v1017_v6 = vmax.f32 %v921_v27, %v969_v56 }
 0x2b3   : > { %v985_v16 = vmul.f32 0.2, %v937_v34  ;;  %v984_v24 = vmul.f32 0.2, %v936_v29  ;;  %v6646_v62 = vadd.f32 %v1016_v20, %v6485_v23 }
 0x2b4   : > { %v757_v11 = vpop.permute.xlu1 %756  ;;  %v753_v28 = vpop.permute.xlu0 %752  ;;  %v6653_v33 = vadd.f32 %v1017_v6, %v6495_v2 }
 0x2b5   : > { %8420 = vst [vmem:[#allocation37_spill] sm:$0xff] %v6646_v62  ;;  %v923_v22 = vadd.f32 %v6527_v0, %v757_v11  ;;  %v922_v19 = vadd.f32 %v6527_v0, %v753_v28  ;;  %1166 = vmax.xlane.f32.xlu0 %v6643_v60  ;;  %v1032_v9 = vmax.f32 %v936_v29, %v984_v24 }
 0x2b6   : > { %1136 = vmax.xlane.f32.xlu1 %v6646_v62  ;;  %v1033_v45 = vmax.f32 %v937_v34, %v985_v16 }
 0x2b7   : > { %v971_v3 = vmul.f32 0.2, %v923_v22  ;;  %v970_v26 = vmul.f32 0.2, %v922_v19  ;;  %v6656_v20 = vadd.f32 %v1032_v9, %v6485_v23 }
 0x2b8   : > { %v824_v27 = vpop.permute.xlu1 %823  ;;  %v820_v56 = vpop.permute.xlu0 %819  ;;  %v6663_v34 = vadd.f32 %v1033_v45, %v6495_v2 }
 0x2b9   : > { %8421 = vst [vmem:[#allocation38_spill] sm:$0xff] %v6656_v20  ;;  %v939_v11 = vadd.f32 %v6547_v63, %v824_v27  ;;  %v938_v28 = vadd.f32 %v6547_v63, %v820_v56  ;;  %1138 = vmax.xlane.f32.xlu0 %v6653_v33  ;;  %v1018_v29 = vmax.f32 %v922_v19, %v970_v26 }
 0x2ba   : > { %1168 = vmax.xlane.f32.xlu1 %v6656_v20  ;;  %v1019_v9 = vmax.f32 %v923_v22, %v971_v3 }
 0x2bb   : > { %v987_v16 = vmul.f32 0.2, %v939_v11  ;;  %v986_v24 = vmul.f32 0.2, %v938_v28  ;;  %v6666_v6 = vadd.f32 %v1018_v29, %v6497_v5 }
 0x2bc   : > { %v765_v23 = vpop.permute.xlu1 %764  ;;  %v761_v62 = vpop.permute.xlu0 %760  ;;  %v6673_v20 = vadd.f32 %v1019_v9, %v6511_v4 }
 0x2bd   : > { %8422 = vst [vmem:[#allocation39_spill] sm:$0xff] %v6666_v6  ;;  %v925_v27 = vadd.f32 %v6527_v0, %v765_v23  ;;  %v924_v56 = vadd.f32 %v6527_v0, %v761_v62  ;;  %1170 = vmax.xlane.f32.xlu0 %v6663_v34  ;;  %v1034_v26 = vmax.f32 %v938_v28, %v986_v24 }
 0x2be   : > { %1140 = vmax.xlane.f32.xlu1 %v6666_v6  ;;  %v1035_v19 = vmax.f32 %v939_v11, %v987_v16 }
 0x2bf   : > { %v973_v45 = vmul.f32 0.2, %v925_v27  ;;  %v972_v2 = vmul.f32 0.2, %v924_v56  ;;  %v6676_v29 = vadd.f32 %v1034_v26, %v6497_v5 }
 0x2c0   : > { %v832_v22 = vpop.permute.xlu1 %831  ;;  %v828_v3 = vpop.permute.xlu0 %827  ;;  %v6683_v11 = vadd.f32 %v1035_v19, %v6511_v4 }
 0x2c1   : > { %8423 = vst [vmem:[#allocation40_spill] sm:$0xff] %v6676_v29  ;;  %v941_v23 = vadd.f32 %v6547_v63, %v832_v22  ;;  %v940_v62 = vadd.f32 %v6547_v63, %v828_v3  ;;  %1142 = vmax.xlane.f32.xlu0 %v6673_v20  ;;  %v1020_v28 = vmax.f32 %v924_v56, %v972_v2 }
 0x2c2   : > { %1172 = vmax.xlane.f32.xlu1 %v6676_v29  ;;  %v1021_v26 = vmax.f32 %v925_v27, %v973_v45 }
 0x2c3   : > { %v989_v16 = vmul.f32 0.2, %v941_v23  ;;  %v988_v24 = vmul.f32 0.2, %v940_v62  ;;  %v6686_v9 = vadd.f32 %v1020_v28, %v6517_v48 }
 0x2c4   : > { %v773_v5 = vpop.permute.xlu1 %772  ;;  %v769_v6 = vpop.permute.xlu0 %768  ;;  %v6693_v29 = vadd.f32 %v1021_v26, %v6536_v30 }
 0x2c5   : > { %v927_v22 = vadd.f32 %v6527_v0, %v773_v5  ;;  %v926_v3 = vadd.f32 %v6527_v0, %v769_v6  ;;  %1174 = vmax.xlane.f32.xlu0 %v6683_v11  ;;  %v1036_v2 = vmax.f32 %v940_v62, %v988_v24  ;;  %v1037_v56 = vmax.f32 %v941_v23, %v989_v16 }
 0x2c6   : > { %1144 = vmax.xlane.f32.xlu1 %v6686_v9 }
 0x2c7   : > { %v975_v19 = vmul.f32 0.2, %v927_v22  ;;  %v974_v4 = vmul.f32 0.2, %v926_v3  ;;  %v6696_v28 = vadd.f32 %v1036_v2, %v6517_v48  ;;  %v6703_v23 = vadd.f32 %v1037_v56, %v6536_v30 }
 0x2c8   : > { %v840_v27 = vpop.permute.xlu1 %839  ;;  %v836_v45 = vpop.permute.xlu0 %835 }
 0x2c9   : > { %v943_v5 = vadd.f32 %v6547_v63, %v840_v27  ;;  %v942_v0 = vadd.f32 %v6547_v63, %v836_v45  ;;  %1146 = vmax.xlane.f32.xlu0 %v6693_v29  ;;  %v1022_v6 = vmax.f32 %v926_v3, %v974_v4  ;;  %v1023_v26 = vmax.f32 %v927_v22, %v975_v19 }
 0x2ca   : > { %1176 = vmax.xlane.f32.xlu1 %v6696_v28 }
 0x2cb   : > { %v991_v62 = vmul.f32 0.2, %v943_v5  ;;  %v990_v16 = vmul.f32 0.2, %v942_v0  ;;  %v6706_v24 = vadd.f32 %v1022_v6, %v6538_v51  ;;  %v6711_v63 = vadd.f32 %v1023_v26, %v6550_v31 }
 0x2cd   : > { %1178 = vmax.xlane.f32.xlu0 %v6703_v23  ;;  %v1038_v2 = vmax.f32 %v942_v0, %v990_v16  ;;  %v1039_v3 = vmax.f32 %v943_v5, %v991_v62 }
 0x2ce   : > { %1148 = vmax.xlane.f32.xlu1 %v6706_v24 }
 0x2cf   : > { %v6714_v4 = vadd.f32 %v1038_v2, %v6538_v51  ;;  %v6719_v56 = vadd.f32 %v1039_v3, %v6550_v31 }
 0x2d1   : > { %1150 = vmax.xlane.f32.xlu0 %v6711_v63 }
 0x2d2   : > { %1180 = vmax.xlane.f32.xlu1 %v6714_v4 }
 0x2d5   : > { %1182 = vmax.xlane.f32.xlu0 %v6719_v56 }
 0x2fe   : > { %v1089_v22 = vpop.xlane.xlu0 %1088 }
 0x2ff   : > { %v1184_v19 = vsub.f32 %v6442_v12, %v1089_v22 }
 0x301   : > { %v1232_v27 = vmul.f32 1.442695, %v1184_v19 }
 0x302   : > { %v1093_v45 = vpop.xlane.xlu0 %1092 }
 0x303   : > { %5449 = vpow2.f32 %v1232_v27  ;;  %v1186_v0 = vsub.f32 %v6454_v52, %v1093_v45  ;;  %v1091_v6 = vpop.xlane.xlu1 %1090 }
 0x304   : > { %v1185_v5 = vsub.f32 %v6457_v53, %v1091_v6 }
 0x305   : > { %v1236_v62 = vmul.f32 1.442695, %v1186_v0 }
 0x306   : > { %v1234_v16 = vmul.f32 1.442695, %v1185_v5  ;;  %v1095_v26 = vpop.xlane.xlu0 %1094 }
 0x307   : > { %v1187_v2 = vsub.f32 %v6470_v10, %v1095_v26  ;;  %v1097_v3 = vpop.xlane.xlu1 %1096 }
 0x308   : > { %5451 = vpow2.f32 %v1234_v16  ;;  %v1188_v51 = vsub.f32 %v6476_v18, %v1097_v3 }
 0x309   : > { %5453 = vpow2.f32 %v1236_v62  ;;  %v1238_v31 = vmul.f32 1.442695, %v1187_v2 }
 0x30a   : > { %v1240_v12 = vmul.f32 1.442695, %v1188_v51  ;;  %v1099_v22 = vpop.xlane.xlu0 %1098 }
 0x30b   : > { %5455 = vpow2.f32 %v1238_v31  ;;  %v1189_v19 = vsub.f32 %v6489_v1, %v1099_v22  ;;  %v1101_v52 = vpop.xlane.xlu1 %1100 }
 0x30c   : > { %5457 = vpow2.f32 %v1240_v12  ;;  %v1190_v53 = vsub.f32 %v6492_v21, %v1101_v52 }
 0x30d   : > { %v1242_v27 = vmul.f32 1.442695, %v1189_v19 }
 0x30e   : > { %v1244_v45 = vmul.f32 1.442695, %v1190_v53  ;;  %v1103_v0 = vpop.xlane.xlu0 %1102 }
 0x30f   : > { %5459 = vpow2.f32 %v1242_v27  ;;  %v1191_v10 = vsub.f32 %v6504_v37, %v1103_v0  ;;  %v1105_v6 = vpop.xlane.xlu1 %1104 }
 0x310   : > { %v5450_v5 = vpop.eup %5449  ;;  %5461 = vpow2.f32 %v1244_v45  ;;  %v1192_v18 = vsub.f32 %v6508_v57, %v1105_v6 }
 0x311   : > { %v1246_v51 = vmul.f32 1.442695, %v1191_v10  ;;  %1328 = vadd.xlane.f32.xlu1 %v5450_v5  ;;  %5005 = vmatprep.mubr.f32.mxu0 %v5450_v5 }
 0x312   : > { %v1248_v31 = vmul.f32 1.442695, %v1192_v18  ;;  %v1107_v1 = vpop.xlane.xlu0 %1106 }
 0x313   : > { %5463 = vpow2.f32 %v1246_v51  ;;  %v1193_v62 = vsub.f32 %v6520_v13, %v1107_v1  ;;  %v1109_v21 = vpop.xlane.xlu1 %1108 }
 0x314   : > { %5465 = vpow2.f32 %v1248_v31  ;;  %v1194_v16 = vsub.f32 %v6523_v61, %v1109_v21 }
 0x315   : > { %v5452_v26 = vpop.eup %5451  ;;  %v1250_v2 = vmul.f32 1.442695, %v1193_v62 }
 0x316   : > { %v6733_v37 = vpop.eup %5453  ;;  %v1252_v3 = vmul.f32 1.442695, %v1194_v16  ;;  %1330 = vadd.xlane.f32.xlu1 %v5452_v26  ;;  %5006 = vmatmul.mubr.f32.vlgmr.msra.gmra.mxu0 %v5452_v26  ;;  %v1111_v57 = vpop.xlane.xlu0 %1110 }
 0x317   : > { %5467 = vpow2.f32 %v1250_v2  ;;  %5030 = vmatpush3.msk.msra.mxu0 %vm6253_vm9, %v6132_v49  ;;  %v1195_v12 = vsub.f32 %v6534_v14, %v1111_v57  ;;  %v1113_v13 = vpop.xlane.xlu1 %1112  ;;  %5008 = vmatprep.mubr.f32.mxu0 %v6733_v37  ;;  %v8425_v2 = vld [vmem:[#allocation13_spill] sm:$0xff] }
 0x318   : > { %v6740_v22 = vpop.eup %5455  ;;  %5469 = vpow2.f32 %v1252_v3  ;;  %v1196_v61 = vsub.f32 %v6541_v54, %v1113_v13  ;;  %5031 = vmatprep.subr.msk.mxu0 %vm6253_vm9, %v6139_v50 }
 0x319   : > { %v6746_v19 = vpop.eup %5457  ;;  %v1254_v52 = vmul.f32 1.442695, %v1195_v12  ;;  %5032 = vmatpush3.msk.msra.mxu0 %vm6253_vm9, %v6139_v50 }
 0x31a   : > { %v1256_v49 = vmul.f32 1.442695, %v1196_v61  ;;  %5033 = vmatprep.subr.msk.mxu0 %vm6253_vm9, %v6124_v46  ;;  %5009 = vmatmul.mubr.f32.gmra.mxu0 %v6740_v22  ;;  %v1115_v14 = vpop.xlane.xlu0 %1114 }
 0x31b   : > { %5471 = vpow2.f32 %v1254_v52  ;;  %5034 = vmatpush3.msk.msra.mxu0 %vm6253_vm9, %v6124_v46  ;;  %v1197_v54 = vsub.f32 %v6553_v8, %v1115_v14  ;;  %v1117_v53 = vpop.xlane.xlu1 %1116  ;;  %5011 = vmatprep.mubr.f32.mxu0 %v6746_v19 }
 0x31c   : > { %v6760_v27 = vpop.eup %5459  ;;  %5473 = vpow2.f32 %v1256_v49  ;;  %v1198_v50 = vsub.f32 %v6556_v7, %v1117_v53  ;;  %5035 = vmatprep.subr.msk.mxu0 %vm6253_vm9, %v6126_v47  ;;  %v8427_v49 = vld [vmem:[#allocation32_spill] sm:$0xff] }
 0x31d   : > { %v6766_v45 = vpop.eup %5461  ;;  %v1258_v0 = vmul.f32 1.442695, %v1197_v54  ;;  %5036 = vmatpush3.msk.msra.mxu0 %vm6253_vm9, %v6126_v47  ;;  %v8428_v54 = vld [vmem:[#allocation12_spill] sm:$0xff] }
 0x31e   : > { %v1260_v46 = vmul.f32 1.442695, %v1198_v50  ;;  %5037 = vmatprep.subr.msk.mxu0 %vm6253_vm9, %v6119_v43  ;;  %5012 = vmatmul.mubr.f32.gmra.mxu0 %v6760_v27  ;;  %v1119_v8 = vpop.xlane.xlu0 %1118 }
 0x31f   : > { %5475 = vpow2.f32 %v1258_v0  ;;  %5038 = vmatpush3.msk.msra.mxu0 %vm6253_vm9, %v6119_v43  ;;  %v1199_v7 = vsub.f32 %v6563_v15, %v1119_v8  ;;  %v1121_v10 = vpop.xlane.xlu1 %1120  ;;  %5014 = vmatprep.mubr.f32.mxu0 %v6766_v45  ;;  %v8429_v0 = vld [vmem:[#allocation8_spill] sm:$0xff] }
 0x320   : > { %v6780_v6 = vpop.eup %5463  ;;  %5477 = vpow2.f32 %v1260_v46  ;;  %v1200_v47 = vsub.f32 %v6566_v25, %v1121_v10  ;;  %5039 = vmatprep.subr.msk.mxu0 %vm6253_vm9, %v6121_v44 }
 0x321   : > { %v6786_v5 = vpop.eup %5465  ;;  %v1262_v18 = vmul.f32 1.442695, %v1199_v7  ;;  %5040 = vmatpush3.msk.msra.mxu0 %vm6253_vm9, %v6121_v44 }
 0x322   : > { %v1264_v43 = vmul.f32 1.442695, %v1200_v47  ;;  %5041 = vmatprep.subr.msk.mxu0 %vm6253_vm9, %v6110_v39  ;;  %5015 = vmatmul.mubr.f32.gmra.mxu0 %v6780_v6  ;;  %v1123_v15 = vpop.xlane.xlu0 %1122  ;;  %v8430_v47 = vld [vmem:[#allocation33_spill] sm:$0xff] }
 0x323   : > { %5479 = vpow2.f32 %v1262_v18  ;;  %5042 = vmatpush3.msk.msra.mxu0 %vm6253_vm9, %v6110_v39  ;;  %v1201_v25 = vsub.f32 %v6573_v35, %v1123_v15  ;;  %v1153_v51 = vpop.xlane.xlu1 %1152  ;;  %5017 = vmatprep.mubr.f32.mxu0 %v6786_v5 }
 0x324   : > { %v6800_v31 = vpop.eup %5467  ;;  %5481 = vpow2.f32 %v1264_v43  ;;  %v1216_v44 = vsub.f32 %v6576_v59, %v1153_v51  ;;  %5043 = vmatprep.subr.msk.mxu0 %vm6253_vm9, %v6113_v40  ;;  %v8431_v43 = vld [vmem:[#allocation10_spill] sm:$0xff] }
 0x325   : > { %v6806_v1 = vpop.eup %5469  ;;  %v1266_v62 = vmul.f32 1.442695, %v1201_v25  ;;  %5044 = vmatpush3.msk.msra.mxu0 %vm6253_vm9, %v6113_v40  ;;  %v8424_v40 = vld [vmem:[#allocation31_spill] sm:$0xff] }
 0x326   : > { %v1296_v35 = vmul.f32 1.442695, %v1216_v44  ;;  %5045 = vmatprep.subr.msk.mxu0 %vm6253_vm9, %v6103_v36  ;;  %5018 = vmatmul.mubr.f32.gmra.mxu0 %v6800_v31  ;;  %v1155_v39 = vpop.xlane.xlu0 %1154 }
 0x327   : > { %5483 = vpow2.f32 %v1266_v62  ;;  %5046 = vmatpush3.msk.msra.mxu0 %vm6253_vm9, %v6103_v36  ;;  %v1217_v59 = vsub.f32 %v6583_v17, %v1155_v39  ;;  %v1125_v21 = vpop.xlane.xlu1 %1124  ;;  %5020 = vmatprep.mubr.f32.mxu0 %v6806_v1  ;;  %v8426_v17 = vld [vmem:[#allocation11_spill] sm:$0xff] }
 0x328   : > { %v6820_v16 = vpop.eup %5471  ;;  %5485 = vpow2.f32 %v1296_v35  ;;  %v1202_v26 = vsub.f32 %v8424_v40, %v1125_v21  ;;  %5047 = vmatprep.subr.msk.mxu0 %vm6253_vm9, %v8425_v2 }
 0x329   : > { %v6826_v3 = vpop.eup %5473  ;;  %v1298_v57 = vmul.f32 1.442695, %v1217_v59  ;;  %5048 = vmatpush3.msk.msra.mxu0 %vm6253_vm9, %v8425_v2  ;;  %v8433_v59 = vld [vmem:[#allocation34_spill] sm:$0xff]  ;;  %v8434_v2 = vld [vmem:[#allocation7_spill] sm:$0xff] }
 0x32a   : > { %v1268_v36 = vmul.f32 1.442695, %v1202_v26  ;;  %5049 = vmatprep.subr.msk.mxu0 %vm6253_vm9, %v8426_v17  ;;  %5021 = vmatmul.mubr.f32.gmra.mxu0 %v6820_v16  ;;  %v1127_v12 = vpop.xlane.xlu0 %1126 }
 0x32b   : > { %5487 = vpow2.f32 %v1298_v57  ;;  %5050 = vmatpush3.msk.msra.mxu0 %vm6253_vm9, %v8426_v17  ;;  %v1203_v13 = vsub.f32 %v6593_v38, %v1127_v12  ;;  %v1157_v61 = vpop.xlane.xlu1 %1156  ;;  %5023 = vmatprep.mubr.f32.mxu0 %v6826_v3 }
 0x32c   : > { %v6840_v52 = vpop.eup %5475  ;;  %5489 = vpow2.f32 %v1268_v36  ;;  %v1218_v14 = vsub.f32 %v8427_v49, %v1157_v61  ;;  %5051 = vmatprep.subr.msk.mxu0 %vm6253_vm9, %v8428_v54 }
 0x32d   : > { %v6846_v53 = vpop.eup %5477  ;;  %v1270_v50 = vmul.f32 1.442695, %v1203_v13  ;;  %5052 = vmatpush3.msk.msra.mxu0 %vm6253_vm9, %v8428_v54  ;;  %v8435_v13 = vld [vmem:[#allocation35_spill] sm:$0xff] }
 0x32e   : > { %v1300_v38 = vmul.f32 1.442695, %v1218_v14  ;;  %5053 = vmatprep.subr.msk.mxu0 %vm6253_vm9, %v8429_v0  ;;  %5024 = vmatmul.mubr.f32.gmra.mxu0 %v6840_v52  ;;  %v1159_v46 = vpop.xlane.xlu0 %1158 }
 0x32f   : > { %5491 = vpow2.f32 %v1270_v50  ;;  %5054 = vmatpush3.msk.msra.mxu0 %vm6253_vm9, %v8429_v0  ;;  %v1219_v8 = vsub.f32 %v6603_v41, %v1159_v46  ;;  %v1129_v7 = vpop.xlane.xlu1 %1128  ;;  %5026 = vmatprep.mubr.f32.mxu0 %v6846_v53  ;;  %v8432_v41 = vld [vmem:[#allocation6_spill] sm:$0xff]  ;;  %v8436_v46 = vld [vmem:[#allocation36_spill] sm:$0xff] }
 0x330   : > { %v6860_v10 = vpop.eup %5479  ;;  %5493 = vpow2.f32 %v1300_v38  ;;  %v1204_v18 = vsub.f32 %v8430_v47, %v1129_v7  ;;  %5055 = vmatprep.subr.msk.mxu0 %vm6253_vm9, %v8431_v43 }
 0x331   : > { %v5482_v15 = vpop.eup %5481  ;;  %v1302_v25 = vmul.f32 1.442695, %v1219_v8  ;;  %5056 = vmatpush3.msk.msra.mxu0 %vm6253_vm9, %v8431_v43 }
 0x332   : > { %v1272_v51 = vmul.f32 1.442695, %v1204_v18  ;;  %5057 = vmatprep.subr.msk.mxu0 %vm6253_vm9, %v8432_v41  ;;  %1360 = vadd.xlane.f32.xlu0 %v5482_v15  ;;  %v1131_v44 = vpop.xlane.xlu0 %1130 }
 0x333   : > { %5495 = vpow2.f32 %v1302_v25  ;;  %5027 = vmatmul.mubr.f32.gmra.mxu0 %v6860_v10  ;;  %v1205_v62 = vsub.f32 %v6613_v58, %v1131_v44  ;;  %v1161_v35 = vpop.xlane.xlu1 %1160 }
 0x334   : > { %v5484_v39 = vpop.eup %5483  ;;  %5497 = vpow2.f32 %v1272_v51  ;;  %5058 = vmatpush3.msk.msra.mxu0 %vm6253_vm9, %v8432_v41  ;;  %v1220_v21 = vsub.f32 %v8433_v59, %v1161_v35  ;;  %5061 = vmatprep.mubr.f32.mxu0 %v5482_v15 }
 0x335   : > { %v5486_v40 = vpop.eup %5485  ;;  %v1274_v26 = vmul.f32 1.442695, %v1205_v62  ;;  %5059 = vmatprep.subr.msk.mxu0 %vm6253_vm9, %v8434_v2 }
 0x336   : > { %v1304_v57 = vmul.f32 1.442695, %v1220_v21  ;;  %5060 = vmatpush3.msk.msra.mxu0 %vm6253_vm9, %v8434_v2  ;;  %5117 = vmatprep.mubr.f32.mxu1 %v5486_v40  ;;  %v1163_v58 = vpop.xlane.xlu0 %1162 }
 0x337   : > { %5499 = vpow2.f32 %v1274_v26  ;;  %1392 = vadd.xlane.f32.xlu1 %v5486_v40  ;;  %1362 = vadd.xlane.f32.xlu0 %v5484_v39  ;;  %v1221_v36 = vsub.f32 %v6623_v42, %v1163_v58  ;;  %v1133_v17 = vpop.xlane.xlu1 %1132 }
 0x338   : > { %v5488_v12 = vpop.eup %5487  ;;  %5501 = vpow2.f32 %v1304_v57  ;;  %5062 = vmatmul.mubr.f32.vlgmr.msra.gmra.mxu0 %v5484_v39  ;;  %v1206_v61 = vsub.f32 %v8435_v13, %v1133_v17 }
 0x339   : > { %v5490_v49 = vpop.eup %5489  ;;  %v1306_v14 = vmul.f32 1.442695, %v1221_v36  ;;  %5118 = vmatmul.mubr.f32.vlgmr.msra.gmra.mxu1 %v5488_v12 }
 0x33a   : > { %v1276_v54 = vmul.f32 1.442695, %v1206_v61  ;;  %5064 = vmatprep.mubr.f32.mxu0 %v5490_v49  ;;  %v1135_v50 = vpop.xlane.xlu0 %1134 }
 0x33b   : > { %5503 = vpow2.f32 %v1306_v14  ;;  %1332 = vadd.xlane.f32.xlu1 %v6733_v37  ;;  %1394 = vadd.xlane.f32.xlu0 %v5488_v12  ;;  %v1207_v38 = vsub.f32 %v6633_v32, %v1135_v50  ;;  %v1165_v0 = vpop.xlane.xlu1 %1164  ;;  %v8437_v32 = vld [vmem:[#allocation37_spill] sm:$0xff] }
 0x33c   : > { %v5492_v42 = vpop.eup %5491  ;;  %5505 = vpow2.f32 %v1276_v54  ;;  %v1222_v8 = vsub.f32 %v8436_v46, %v1165_v0 }
 0x33d   : > { %v5494_v7 = vpop.eup %5493  ;;  %v1278_v47 = vmul.f32 1.442695, %v1207_v38  ;;  %5065 = vmatmul.mubr.f32.gmra.mxu0 %v5492_v42 }
 0x33e   : > { %v1308_v18 = vmul.f32 1.442695, %v1222_v8  ;;  %5120 = vmatprep.mubr.f32.mxu1 %v5494_v7  ;;  %v1167_v43 = vpop.xlane.xlu0 %1166 }
 0x33f   : > { %5507 = vpow2.f32 %v1278_v47  ;;  %1334 = vadd.xlane.f32.xlu1 %v6740_v22  ;;  %1364 = vadd.xlane.f32.xlu0 %v5490_v49  ;;  %v1223_v37 = vsub.f32 %v6643_v60, %v1167_v43  ;;  %v1137_v15 = vpop.xlane.xlu1 %1136  ;;  %v8438_v60 = vld [vmem:[#allocation38_spill] sm:$0xff] }
 0x340   : > { %v5496_v25 = vpop.eup %5495  ;;  %5509 = vpow2.f32 %v1308_v18  ;;  %v1208_v51 = vsub.f32 %v8437_v32, %v1137_v15 }
 0x341   : > { %v5498_v41 = vpop.eup %5497  ;;  %v1310_v44 = vmul.f32 1.442695, %v1223_v37  ;;  %5121 = vmatmul.mubr.f32.gmra.mxu1 %v5496_v25 }
 0x342   : > { %v1280_v62 = vmul.f32 1.442695, %v1208_v51  ;;  %5067 = vmatprep.mubr.f32.mxu0 %v5498_v41  ;;  %v1139_v35 = vpop.xlane.xlu0 %1138 }
 0x343   : > { %5511 = vpow2.f32 %v1310_v44  ;;  %1396 = vadd.xlane.f32.xlu1 %v5494_v7  ;;  %1366 = vadd.xlane.f32.xlu0 %v5492_v42  ;;  %v1209_v39 = vsub.f32 %v6653_v33, %v1139_v35  ;;  %v1169_v22 = vpop.xlane.xlu1 %1168  ;;  %v8439_v33 = vld [vmem:[#allocation39_spill] sm:$0xff] }
 0x344   : > { %v5500_v59 = vpop.eup %5499  ;;  %5513 = vpow2.f32 %v1280_v62  ;;  %v1224_v21 = vsub.f32 %v8438_v60, %v1169_v22 }
 0x345   : > { %v5502_v40 = vpop.eup %5501  ;;  %v1282_v26 = vmul.f32 1.442695, %v1209_v39  ;;  %5068 = vmatmul.mubr.f32.gmra.mxu0 %v5500_v59 }
 0x346   : > { %v1312_v2 = vmul.f32 1.442695, %v1224_v21  ;;  %5123 = vmatprep.mubr.f32.mxu1 %v5502_v40  ;;  %v1171_v57 = vpop.xlane.xlu0 %1170 }
 0x347   : > { %5515 = vpow2.f32 %v1282_v26  ;;  %1336 = vadd.xlane.f32.xlu1 %v6746_v19  ;;  %1398 = vadd.xlane.f32.xlu0 %v5496_v25  ;;  %v1225_v58 = vsub.f32 %v6663_v34, %v1171_v57  ;;  %v1141_v36 = vpop.xlane.xlu1 %1140  ;;  %v8440_v34 = vld [vmem:[#allocation40_spill] sm:$0xff] }
 0x348   : > { %v5504_v17 = vpop.eup %5503  ;;  %5517 = vpow2.f32 %v1312_v2  ;;  %v1210_v12 = vsub.f32 %v8439_v33, %v1141_v36 }
 0x349   : > { %v5506_v13 = vpop.eup %5505  ;;  %v1314_v61 = vmul.f32 1.442695, %v1225_v58  ;;  %5124 = vmatmul.mubr.f32.gmra.mxu1 %v5504_v17 }
 0x34a   : > { %v1284_v49 = vmul.f32 1.442695, %v1210_v12  ;;  %5070 = vmatprep.mubr.f32.mxu0 %v5506_v13  ;;  %v1143_v14 = vpop.xlane.xlu0 %1142 }
 0x34b   : > { %5519 = vpow2.f32 %v1314_v61  ;;  %1338 = vadd.xlane.f32.xlu1 %v6760_v27  ;;  %1368 = vadd.xlane.f32.xlu0 %v5498_v41  ;;  %v1211_v19 = vsub.f32 %v6673_v20, %v1143_v14  ;;  %v1173_v54 = vpop.xlane.xlu1 %1172  ;;  %v8441_v61 = vmov 0.0  }
 0x34c   : > { %v5508_v50 = vpop.eup %5507  ;;  %5521 = vpow2.f32 %v1284_v49  ;;  %v1226_v38 = vsub.f32 %v8440_v34, %v1173_v54 }
 0x34d   : > { %v5510_v0 = vpop.eup %5509  ;;  %v1286_v42 = vmul.f32 1.442695, %v1211_v19  ;;  %5071 = vmatmul.mubr.f32.gmra.mxu0 %v5508_v50 }
 0x34e   : > { %v1316_v46 = vmul.f32 1.442695, %v1226_v38  ;;  %5126 = vmatprep.mubr.f32.mxu1 %v5510_v0  ;;  %v1175_v8 = vpop.xlane.xlu0 %1174 }
 0x34f   : > { %5523 = vpow2.f32 %v1286_v42  ;;  %1400 = vadd.xlane.f32.xlu1 %v5502_v40  ;;  %1370 = vadd.xlane.f32.xlu0 %v5500_v59  ;;  %v1227_v7 = vsub.f32 %v6683_v11, %v1175_v8  ;;  %v1145_v27 = vpop.xlane.xlu1 %1144 }
 0x350   : > { %v5512_v47 = vpop.eup %5511  ;;  %5525 = vpow2.f32 %v1316_v46  ;;  %v1212_v20 = vsub.f32 %v6686_v9, %v1145_v27 }
 0x351   : > { %v5514_v18 = vpop.eup %5513  ;;  %v1318_v43 = vmul.f32 1.442695, %v1227_v7  ;;  %5127 = vmatmul.mubr.f32.gmra.mxu1 %v5512_v47 }
 0x352   : > { %v1288_v37 = vmul.f32 1.442695, %v1212_v20  ;;  %5073 = vmatprep.mubr.f32.mxu0 %v5514_v18  ;;  %v1147_v15 = vpop.xlane.xlu0 %1146 }
 0x353   : > { %5527 = vpow2.f32 %v1318_v43  ;;  %1340 = vadd.xlane.f32.xlu1 %v6766_v45  ;;  %1402 = vadd.xlane.f32.xlu0 %v5504_v17  ;;  %v1213_v25 = vsub.f32 %v6693_v29, %v1147_v15  ;;  %v1177_v32 = vpop.xlane.xlu1 %1176 }
 0x354   : > { %v5516_v51 = vpop.eup %5515  ;;  %5529 = vpow2.f32 %v1288_v37  ;;  %v1228_v11 = vsub.f32 %v6696_v28, %v1177_v32 }
 0x355   : > { %v5518_v41 = vpop.eup %5517  ;;  %v1290_v44 = vmul.f32 1.442695, %v1213_v25  ;;  %5074 = vmatmul.mubr.f32.gmra.mxu0 %v5516_v51 }
 0x356   : > { %v1320_v9 = vmul.f32 1.442695, %v1228_v11  ;;  %5129 = vmatprep.mubr.f32.mxu1 %v5518_v41  ;;  %v1179_v62 = vpop.xlane.xlu0 %1178 }
 0x357   : > { %5531 = vpow2.f32 %v1290_v44  ;;  %1342 = vadd.xlane.f32.xlu1 %v6780_v6  ;;  %1372 = vadd.xlane.f32.xlu0 %v5506_v13  ;;  %v1229_v45 = vsub.f32 %v6703_v23, %v1179_v62  ;;  %v1149_v35 = vpop.xlane.xlu1 %1148 }
 0x358   : > { %v5520_v39 = vpop.eup %5519  ;;  %5533 = vpow2.f32 %v1320_v9  ;;  %v1214_v29 = vsub.f32 %v6706_v24, %v1149_v35 }
 0x359   : > { %v5522_v22 = vpop.eup %5521  ;;  %v1322_v59 = vmul.f32 1.442695, %v1229_v45  ;;  %5130 = vmatmul.mubr.f32.gmra.mxu1 %v5520_v39 }
 0x35a   : > { %v1292_v28 = vmul.f32 1.442695, %v1214_v29  ;;  %5076 = vmatprep.mubr.f32.mxu0 %v5522_v22  ;;  %v1151_v60 = vpop.xlane.xlu0 %1150 }
 0x35b   : > { %5535 = vpow2.f32 %v1322_v59  ;;  %1404 = vadd.xlane.f32.xlu1 %v5510_v0  ;;  %1374 = vadd.xlane.f32.xlu0 %v5508_v50  ;;  %v1215_v21 = vsub.f32 %v6711_v63, %v1151_v60  ;;  %v1181_v6 = vpop.xlane.xlu1 %1180 }
 0x35c   : > { %v5524_v40 = vpop.eup %5523  ;;  %5537 = vpow2.f32 %v1292_v28  ;;  %v1230_v23 = vsub.f32 %v6714_v4, %v1181_v6 }
 0x35d   : > { %v5526_v26 = vpop.eup %5525  ;;  %v1294_v2 = vmul.f32 1.442695, %v1215_v21  ;;  %5077 = vmatmul.mubr.f32.gmra.mxu0 %v5524_v40 }
 0x35e   : > { %v1324_v24 = vmul.f32 1.442695, %v1230_v23  ;;  %5132 = vmatprep.mubr.f32.mxu1 %v5526_v26  ;;  %v1183_v57 = vpop.xlane.xlu0 %1182 }
 0x35f   : > { %5539 = vpow2.f32 %v1294_v2  ;;  %1344 = vadd.xlane.f32.xlu1 %v6786_v5  ;;  %1406 = vadd.xlane.f32.xlu0 %v5512_v47  ;;  %v1231_v58 = vsub.f32 %v6719_v56, %v1183_v57 }
 0x360   : > { %v5528_v36 = vpop.eup %5527  ;;  %5541 = vpow2.f32 %v1324_v24 }
 0x361   : > { %v5530_v63 = vpop.eup %5529  ;;  %v1326_v17 = vmul.f32 1.442695, %v1231_v58  ;;  %5133 = vmatmul.mubr.f32.gmra.mxu1 %v5528_v36 }
 0x362   : > { %5079 = vmatprep.mubr.f32.mxu0 %v5530_v63 }
 0x363   : > { %5543 = vpow2.f32 %v1326_v17  ;;  %1346 = vadd.xlane.f32.xlu1 %v6800_v31  ;;  %1376 = vadd.xlane.f32.xlu0 %v5514_v18 }
 0x364   : > { %v5532_v4 = vpop.eup %5531 }
 0x365   : > { %v5534_v33 = vpop.eup %5533  ;;  %5080 = vmatmul.mubr.f32.gmra.mxu0 %v5532_v4 }
 0x366   : > { %5135 = vmatprep.mubr.f32.mxu1 %v5534_v33 }
 0x367   : > { %1408 = vadd.xlane.f32.xlu1 %v5518_v41  ;;  %1378 = vadd.xlane.f32.xlu0 %v5516_v51 }
 0x368   : > { %v5536_v5 = vpop.eup %5535 }
 0x369   : > { %v5538_v12 = vpop.eup %5537  ;;  %5136 = vmatmul.mubr.f32.gmra.mxu1 %v5536_v5 }
 0x36a   : > { %5082 = vmatprep.mubr.f32.mxu0 %v5538_v12 }
 0x36b   : > { %1348 = vadd.xlane.f32.xlu1 %v6806_v1  ;;  %1410 = vadd.xlane.f32.xlu0 %v5520_v39  ;;  %v308_v1 = vld [vmem:[%s8285_s2 + $0x28] sm:$0xff] }
 0x36c   : > { %v5540_v56 = vpop.eup %5539  ;;  %5141 = vmatprep.subr.mxu0 %v308_v1 }
 0x36d   : > { %v5542_v13 = vpop.eup %5541  ;;  %5083 = vmatmul.mubr.f32.gmra.mxu0 %v5540_v56 }
 0x36e   : > { %5138 = vmatprep.mubr.f32.mxu1 %v5542_v13  ;;  %5142 = vmatpush3.msra.mxu0 %v308_v1 }
 0x36f   : > { %1350 = vadd.xlane.f32.xlu1 %v6820_v16  ;;  %1380 = vadd.xlane.f32.xlu0 %v5522_v22  ;;  %v307_v16 = vld [vmem:[%s8285_s2 + $0x20] sm:$0xff] }
 0x370   : > { %v5544_v31 = vpop.eup %5543  ;;  %5143 = vmatprep.subr.mxu0 %v307_v16 }
 0x371   : > { %5139 = vmatmul.mubr.f32.gmra.mxu1 %v5544_v31  ;;  %5144 = vmatpush3.msra.mxu0 %v307_v16 }
 0x372   : > { %5203 = vmatprep.mubr.msk.f32.mxu1 %vm5960_vm1, %v8441_v61 }
 0x373   : > { %1412 = vadd.xlane.f32.xlu1 %v5526_v26  ;;  %1382 = vadd.xlane.f32.xlu0 %v5524_v40 }
 0x377   : > { %1352 = vadd.xlane.f32.xlu1 %v6826_v3  ;;  %1414 = vadd.xlane.f32.xlu0 %v5528_v36  ;;  %v306_v3 = vld [vmem:[%s8285_s2 + $0x18] sm:$0xff] }
 0x378   : > { %5145 = vmatprep.subr.mxu0 %v306_v3 }
 0x379   : > { %5146 = vmatpush3.msra.mxu0 %v306_v3 }
 0x37b   : > { %1354 = vadd.xlane.f32.xlu1 %v6840_v52  ;;  %1384 = vadd.xlane.f32.xlu0 %v5530_v63 }
 0x37f   : > { %1416 = vadd.xlane.f32.xlu1 %v5534_v33  ;;  %1386 = vadd.xlane.f32.xlu0 %v5532_v4 }
 0x383   : > { %1356 = vadd.xlane.f32.xlu1 %v6846_v53  ;;  %1418 = vadd.xlane.f32.xlu0 %v5536_v5 }
 0x387   : > { %1358 = vadd.xlane.f32.xlu1 %v6860_v10  ;;  %1388 = vadd.xlane.f32.xlu0 %v5538_v12 }
 0x38b   : > { %1420 = vadd.xlane.f32.xlu1 %v5542_v13  ;;  %1390 = vadd.xlane.f32.xlu0 %v5540_v56 }
 0x38f   : > { %1422 = vadd.xlane.f32.xlu0 %v5544_v31 }
 0x39a   : > { %v1329_v52 = vpop.xlane.xlu1 %1328 }
 0x39f   : > { %v1331_v10 = vpop.xlane.xlu1 %1330 }
 0x3a0   : > { %5545 = vrcp.f32 %v1331_v10 }
 0x3a1   : > { %5547 = vrcp.f32 %v1329_v52 }
 0x3ad   : > { %v5546_v58 = vpop.eup %5545 }
 0x3ae   : > { %v5548_v63 = vpop.eup %5547 }
 0x3bb   : > { %v1361_v53 = vpop.xlane.xlu0 %1360 }
 0x3bc   : > { %5549 = vrcp.f32 %v1361_v53 }
 0x3c0   : > { %v1393_v49 = vpop.xlane.xlu1 %1392  ;;  %v1363_v14 = vpop.xlane.xlu0 %1362 }
 0x3c1   : > { %5551 = vrcp.f32 %v1363_v14 }
 0x3c4   : > { %v1333_v19 = vpop.xlane.xlu1 %1332  ;;  %v1395_v54 = vpop.xlane.xlu0 %1394 }
 0x3c5   : > { %5553 = vrcp.f32 %v1395_v54 }
 0x3c6   : > { %5555 = vrcp.f32 %v1393_v49 }
 0x3c7   : > { %5557 = vrcp.f32 %v1333_v19 }
 0x3c8   : > { %v1335_v50 = vpop.xlane.xlu1 %1334  ;;  %v1365_v34 = vpop.xlane.xlu0 %1364 }
 0x3c9   : > { %5559 = vrcp.f32 %v1335_v50  ;;  %v5550_v4 = vpop.eup %5549 }
 0x3cc   : > { %v1397_v38 = vpop.xlane.xlu1 %1396  ;;  %v1367_v0 = vpop.xlane.xlu0 %1366 }
 0x3cd   : > { %5561 = vrcp.f32 %v1367_v0 }
 0x3ce   : > { %5563 = vrcp.f32 %v1365_v34  ;;  %v5552_v5 = vpop.eup %5551 }
 0x3d0   : > { %v1337_v42 = vpop.xlane.xlu1 %1336  ;;  %v1399_v46 = vpop.xlane.xlu0 %1398 }
 0x3d1   : > { %5565 = vrcp.f32 %v1337_v42 }
 0x3d2   : > { %5567 = vrcp.f32 %v1399_v46  ;;  %v5554_v13 = vpop.eup %5553 }
 0x3d3   : > { %v5556_v3 = vpop.eup %5555 }
 0x3d4   : > { %v1339_v8 = vpop.xlane.xlu1 %1338  ;;  %v1369_v7 = vpop.xlane.xlu0 %1368 }
 0x3d5   : > { %5569 = vrcp.f32 %v1339_v8  ;;  %v5558_v49 = vpop.eup %5557 }
 0x3d6   : > { %v5007_v27 = vpop.f32.mrf.mxu0  ;;  %5571 = vrcp.f32 %v1397_v38  ;;  %v5560_v34 = vpop.eup %5559 }
 0x3d7   : > { %v2001_v17 = vmul.f32 %v5546_v58, %v5007_v27  ;;  %5573 = vrcp.f32 %v1369_v7 }
 0x3d8   : > { %v1401_v47 = vpop.xlane.xlu1 %1400  ;;  %v1371_v20 = vpop.xlane.xlu0 %1370 }
 0x3d9   : > { %v1583_v18 = vpop.f32.mrf.mxu0  ;;  %5575 = vrcp.f32 %v1371_v20  ;;  %v2053_v52 = vsel %vm518_vm6, %v2001_v17, 0.0 }
 0x3da   : > { %v2000_v33 = vmul.f32 %v5548_v63, %v1583_v18  ;;  %5577 = vrcp.f32 %v1401_v47  ;;  %v6995_v47 = vld [vmem:[%s8285_s2 + $0x10] ss:$0 sm:$0xff] }
 0x3db   : > { %v6930_v43 = vpop.f32.mrf.mxu0 }
 0x3dc   : > { %v1341_v37 = vpop.xlane.xlu1 %1340  ;;  %v1403_v15 = vpop.xlane.xlu0 %1402  ;;  %v2048_v14 = vsel %vm518_vm6, %v2000_v33, 0.0  ;;  %v2003_v8 = vmul.f32 %v5560_v34, %v6930_v43 }
 0x3dd   : > { %v6932_v25 = vpop.f32.mrf.mxu0  ;;  %5579 = vrcp.f32 %v1341_v37  ;;  %v5562_v37 = vpop.eup %5561 }
 0x3de   : > { %5581 = vrcp.f32 %v1403_v15  ;;  %v2002_v7 = vmul.f32 %v5558_v49, %v6932_v25  ;;  %v5564_v43 = vpop.eup %5563 }
 0x3df   : > { %v6934_v32 = vpop.f32.mrf.mxu0  ;;  %v5566_v63 = vpop.eup %5565 }
 0x3e0   : > { %v6936_v51 = vpop.xlane.xlu1 %1342  ;;  %v6938_v11 = vpop.xlane.xlu0 %1372 }
 0x3e1   : > { %v6940_v41 = vpop.f32.mrf.mxu0  ;;  %5583 = vrcp.f32 %v6936_v51 }
 0x3e3   : > { %v6942_v44 = vpop.f32.mrf.mxu0 }
 0x3e4   : > { %v6944_v9 = vpop.xlane.xlu1 %1404  ;;  %v6946_v62 = vpop.xlane.xlu0 %1374 }
 0x3e5   : > { %v6948_v45 = vpop.f32.mrf.mxu0 }
 0x3e7   : > { %v6950_v35 = vpop.f32.mrf.mxu0 }
 0x3e8   : > { %v1345_v39 = vpop.xlane.xlu1 %1344  ;;  %v6952_v29 = vpop.xlane.xlu0 %1406 }
 0x3e9   : > { %v6954_v22 = vpop.f32.mrf.mxu0  ;;  %5585 = vrcp.f32 %v1345_v39 }
 0x3eb   : > { %v6956_v59 = vpop.f32.mrf.mxu0 }
 0x3ec   : > { %v1347_v28 = vpop.xlane.xlu1 %1346  ;;  %v6958_v60 = vpop.xlane.xlu0 %1376 }
 0x3ed   : > { %v6960_v21 = vpop.f32.mrf.mxu0  ;;  %5587 = vrcp.f32 %v1347_v28  ;;  %v2063_v28 = vsel %vm518_vm6, %v2003_v8, 0.0 }
 0x3ee   : > { %5589 = vrcp.f32 %v6938_v11 }
 0x3ef   : > { %v6962_v6 = vpop.f32.mrf.mxu0  ;;  %5591 = vrcp.f32 %v6946_v62 }
 0x3f0   : > { %v6964_v40 = vpop.xlane.xlu1 %1408  ;;  %v6966_v23 = vpop.xlane.xlu0 %1378  ;;  %5593 = vrcp.f32 %v6944_v9  ;;  %v2004_v9 = vmul.f32 %v5566_v63, %v6940_v41 }
 0x3f1   : > { %v6968_v26 = vpop.f32.mrf.mxu0  ;;  %5595 = vrcp.f32 %v6952_v29 }
 0x3f2   : > { %5597 = vrcp.f32 %v6958_v60 }
 0x3f3   : > { %v6970_v2 = vpop.f32.mrf.mxu0 }
 0x3f4   : > { %v6972_v24 = vpop.xlane.xlu1 %1348  ;;  %v6974_v57 = vpop.xlane.xlu0 %1410 }
 0x3f5   : > { %v6976_v36 = vpop.f32.mrf.mxu0 }
 0x3f8   : > { %v5063_v12 = vpop.f32.mrf.mxu0  ;;  %v6978_v56 = vpop.xlane.xlu1 %1350 }
 0x3f9   : > { %v2017_v31 = vmul.f32 %v5552_v5, %v5063_v12  ;;  %v6980_v1 = vpop.xlane.xlu0 %1380  ;;  %v5119_v16 = vpop.f32.mrf.mxu1 }
 0x3fa   : > { %v1728_v53 = vpop.f32.mrf.mxu0  ;;  %v2033_v10 = vmul.f32 %v5554_v13, %v5119_v16  ;;  %v5568_v5 = vpop.eup %5567  ;;  %v2058_v16 = vsel %vm518_vm6, %v2002_v7, 0.0 }
 0x3fb   : > { %v2054_v19 = vsel %vm518_vm6, %v2017_v31, 0.0  ;;  %v2016_v54 = vmul.f32 %v5550_v4, %v1728_v53  ;;  %v1873_v50 = vpop.f32.mrf.mxu1  ;;  %v5570_v31 = vpop.eup %5569 }
 0x3fc   : > { %v2055_v38 = vadd.f32 %v2054_v19, %v2053_v52  ;;  %v2056_v0 = vsel %vm518_vm6, %v2033_v10, 0.0  ;;  %v6987_v42 = vpop.xlane.xlu1 %1412  ;;  %v2032_v46 = vmul.f32 %v5556_v3, %v1873_v50  ;;  %v5572_v53 = vpop.eup %5571 }
 0x3fd   : > { %v2049_v27 = vsel %vm518_vm6, %v2016_v54, 0.0  ;;  %v6997_v20 = vpop.xlane.xlu0 %1382  ;;  %v5066_v18 = vpop.f32.mrf.mxu0 }
 0x3fe   : > { %v2050_v15 = vadd.f32 %v2049_v27, %v2048_v14  ;;  %v2057_v51 = vadd.f32 %v2056_v0, %v2055_v38  ;;  %v2051_v58 = vsel %vm518_vm6, %v2032_v46, 0.0  ;;  %v2019_v25 = vmul.f32 %v5562_v37, %v5066_v18  ;;  %v5574_v19 = vpop.eup %5573 }
 0x3ff   : > { %v1738_v39 = vpop.f32.mrf.mxu0  ;;  %v5576_v34 = vpop.eup %5575  ;;  %v2005_v38 = vmul.f32 %v5570_v31, %v6934_v32 }
 0x400   : > { %v7003_v17 = vadd.f32 %v6995_v47, %v2057_v51  ;;  %v2052_v4 = vadd.f32 %v2051_v58, %v2050_v15  ;;  %v2018_v33 = vmul.f32 %v5564_v43, %v1738_v39  ;;  %v2064_v12 = vsel %vm518_vm6, %v2019_v25, 0.0  ;;  %v7016_v52 = vpop.xlane.xlu1 %1352  ;;  %v5578_v8 = vpop.eup %5577 }
 0x401   : > { %v7008_v13 = vpop.xlane.xlu0 %1414  ;;  %v5122_v11 = vpop.f32.mrf.mxu1  ;;  %v2065_v54 = vadd.f32 %v2064_v12, %v2063_v28  ;;  %v2073_v63 = vsel %vm518_vm6, %v2005_v38, 0.0 }
 0x402   : > { %v2166_v62 = vmul.f32 1.442695, %v7003_v17  ;;  %v7014_v3 = vadd.f32 %v6995_v47, %v2052_v4  ;;  %v2059_v10 = vsel %vm518_vm6, %v2018_v33, 0.0  ;;  %v2035_v49 = vmul.f32 %v5568_v5, %v5122_v11  ;;  %v5580_v37 = vpop.eup %5579 }
 0x403   : > { %v1883_v14 = vpop.f32.mrf.mxu1  ;;  %v2060_v0 = vadd.f32 %v2059_v10, %v2058_v16  ;;  %v5582_v32 = vpop.eup %5581  ;;  %v2068_v4 = vsel %vm518_vm6, %v2004_v9, 0.0  ;;  %v2006_v16 = vmul.f32 %v5580_v37, %v6948_v45  ;;  %vm2149_vm12 = vcmp.gt.f32.partialorder %v7003_v17, 0.0 }
 0x404   : > { %5599 = vpow2.f32 %v2166_v62  ;;  %v2164_v29 = vmul.f32 1.442695, %v7014_v3  ;;  %v2034_v50 = vmul.f32 %v5572_v53, %v1883_v14  ;;  %v2066_v41 = vsel %vm518_vm6, %v2035_v49, 0.0  ;;  %v1355_v58 = vpop.xlane.xlu1 %1354  ;;  %v5584_v39 = vpop.eup %5583 }
 0x405   : > { %5601 = vrcp.f32 %v6972_v24  ;;  %v7025_v46 = vpop.xlane.xlu0 %1384  ;;  %v5069_v60 = vpop.f32.mrf.mxu0  ;;  %v2067_v7 = vadd.f32 %v2066_v41, %v2065_v54  ;;  %v2007_v10 = vmul.f32 %v5584_v39, %v6942_v44  ;;  %v2078_v41 = vsel %vm518_vm6, %v2006_v16, 0.0 }
 0x406   : > { %5603 = vpow2.f32 %v2164_v29  ;;  %v2061_v27 = vsel %vm518_vm6, %v2034_v50, 0.0  ;;  %v2021_v18 = vmul.f32 %v5576_v34, %v5069_v60  ;;  %v5586_v5 = vpop.eup %5585  ;;  %vm2148_vm13 = vcmp.gt.f32.partialorder %v7014_v3, 0.0 }
 0x407   : > { %5605 = vrcp.f32 %v6966_v23  ;;  %v2062_v15 = vadd.f32 %v2061_v27, %v2060_v0  ;;  %v1748_v51 = vpop.f32.mrf.mxu0  ;;  %v7031_v24 = vadd.f32 %v6995_v47, %v2067_v7  ;;  %v5588_v31 = vpop.eup %5587  ;;  %v2083_v27 = vsel %vm518_vm6, %v2007_v10, 0.0 }
 0x408   : > { %5607 = vrcp.f32 %v6978_v56  ;;  %v2074_v43 = vsel %vm518_vm6, %v2021_v18, 0.0  ;;  %v2020_v25 = vmul.f32 %v5574_v19, %v1748_v51  ;;  %v5590_v9 = vpop.eup %5589  ;;  %v2008_v19 = vmul.f32 %v5586_v5, %v6954_v22 }
 0x409   : > { %5609 = vrcp.f32 %v6964_v40  ;;  %v7038_v23 = vadd.f32 %v6995_v47, %v2062_v15  ;;  %v7040_v33 = vpop.xlane.xlu0 %1386  ;;  %v5125_v56 = vpop.f32.mrf.mxu1  ;;  %v2170_v28 = vmul.f32 1.442695, %v7031_v24  ;;  %v2075_v62 = vadd.f32 %v2074_v43, %v2073_v63 }
 0x40a   : > { %5611 = vrcp.f32 %v6974_v57  ;;  %v2069_v12 = vsel %vm518_vm6, %v2020_v25, 0.0  ;;  %v2037_v11 = vmul.f32 %v5582_v32, %v5125_v56  ;;  %v5592_v14 = vpop.eup %5591  ;;  %v2009_v44 = vmul.f32 %v5588_v31, %v6950_v35 }
 0x40b   : > { %5613 = vrcp.f32 %v6980_v1  ;;  %v2168_v40 = vmul.f32 1.442695, %v7038_v23  ;;  %v1893_v53 = vpop.f32.mrf.mxu1  ;;  %v2070_v29 = vadd.f32 %v2069_v12, %v2068_v4  ;;  %v5594_v50 = vpop.eup %5593  ;;  %v7067_v15 = vsel %vm518_vm6, %v2008_v19, 0.0 }
 0x40c   : > { %5615 = vpow2.f32 %v2170_v28  ;;  %v2076_v57 = vsel %vm518_vm6, %v2037_v11, 0.0  ;;  %v2036_v49 = vmul.f32 %v5578_v8, %v1893_v53  ;;  %v7052_v1 = vpop.xlane.xlu1 %1416  ;;  %v5596_v0 = vpop.eup %5595  ;;  %v2093_v39 = vsel %vm518_vm6, %v2009_v44, 0.0 }
 0x40d   : > { %5617 = vpow2.f32 %v2168_v40  ;;  %v2077_v54 = vadd.f32 %v2076_v57, %v2075_v62  ;;  %v5072_v45 = vpop.f32.mrf.mxu0  ;;  %v7061_v60 = vpop.xlane.xlu0 %1418  ;;  %vm2150_vm14 = vcmp.gt.f32.partialorder %v7038_v23, 0.0  ;;  %vm2151_vm15 = vcmp.gt.f32.partialorder %v7031_v24, 0.0 }
 0x40e   : > { %5619 = vrcp.f32 %v6987_v42  ;;  %v2071_v34 = vsel %vm518_vm6, %v2036_v49, 0.0  ;;  %v2023_v38 = vmul.f32 %v5592_v14, %v5072_v45  ;;  %v5598_v42 = vpop.eup %5597 }
 0x40f   : > { %5621 = vrcp.f32 %v6997_v20  ;;  %v7059_v22 = vadd.f32 %v6995_v47, %v2077_v54  ;;  %v2072_v8 = vadd.f32 %v2071_v34, %v2070_v29  ;;  %v1758_v7 = vpop.f32.mrf.mxu0 }
 0x410   : > { %5623 = vrcp.f32 %v7016_v52  ;;  %v2084_v18 = vsel %vm518_vm6, %v2023_v38, 0.0  ;;  %v2022_v35 = vmul.f32 %v5590_v9, %v1758_v7  ;;  %v1357_v12 = vpop.xlane.xlu1 %1356 }
 0x411   : > { %v5600_v37 = vpop.eup %5599  ;;  %5625 = vrcp.f32 %v1355_v58  ;;  %v2174_v20 = vmul.f32 1.442695, %v7059_v22  ;;  %v7071_v51 = vadd.f32 %v6995_v47, %v2072_v8  ;;  %v5128_v32 = vpop.f32.mrf.mxu1  ;;  %v2085_v56 = vadd.f32 %v2084_v18, %v2083_v27 }
 0x412   : > { %v5602_v43 = vpop.eup %5601  ;;  %v2079_v25 = vsel %vm518_vm6, %v2022_v35, 0.0  ;;  %v2039_v52 = vmul.f32 %v5596_v0, %v5128_v32  ;;  %v4494_v5 = vadd.f32 -1.0, %v5600_v37  ;;  %v7079_v53 = vpop.xlane.xlu0 %1388  ;;  %vm2153_vm1 = vcmp.gt.f32.partialorder %v7059_v22, 0.0 }
 0x413   : > { %v5604_v63 = vpop.eup %5603  ;;  %5627 = vpow2.f32 %v2174_v20  ;;  %v2172_v4 = vmul.f32 1.442695, %v7071_v51  ;;  %v1903_v58 = vpop.f32.mrf.mxu1  ;;  %v2080_v62 = vadd.f32 %v2079_v25, %v2078_v41  ;;  %v2010_v19 = vmul.f32 %v5602_v43, %v6960_v21 }
 0x414   : > { %v5606_v28 = vpop.eup %5605  ;;  %5629 = vrcp.f32 %v7008_v13  ;;  %v2086_v11 = vsel %vm518_vm6, %v2039_v52, 0.0  ;;  %v2038_v31 = vmul.f32 %v5594_v50, %v1903_v58  ;;  %v4493_v16 = vadd.f32 -1.0, %v5604_v63 }
 0x415   : > { %v5608_v40 = vpop.eup %5607  ;;  %5631 = vpow2.f32 %v2172_v4  ;;  %v2087_v9 = vadd.f32 %v2086_v11, %v2085_v56  ;;  %v5075_v10 = vpop.f32.mrf.mxu0  ;;  %v2213_v34 = vsel %vm2149_vm12, %v7003_v17, %v4494_v5  ;;  %vm2152_vm0 = vcmp.gt.f32.partialorder %v7071_v51, 0.0 }
 0x416   : > { %v5610_v57 = vpop.eup %5609  ;;  %v2081_v49 = vsel %vm518_vm6, %v2038_v31, 0.0  ;;  %v2025_v14 = vmul.f32 %v5606_v28, %v5075_v10  ;;  %v2212_v13 = vsel %vm2148_vm13, %v7014_v3, %v4493_v16  ;;  %5633 = vrcp.f32 %v7025_v46 }
 0x417   : > { %v5612_v29 = vpop.eup %5611  ;;  %v7087_v54 = vadd.f32 %v6995_v47, %v2087_v9  ;;  %v2082_v45 = vadd.f32 %v2081_v49, %v2080_v62  ;;  %5147 = vmatprep.mubr.msk.f32.mxu0 %vm518_vm6, %v2212_v13  ;;  %v1768_v50 = vpop.f32.mrf.mxu0  ;;  %5635 = vrcp.f32 %v7040_v33  ;;  %v2011_v46 = vmul.f32 %v5608_v40, %v6956_v59 }
 0x418   : > { %v5614_v38 = vpop.eup %5613  ;;  %v2094_v3 = vsel %vm518_vm6, %v2025_v14, 0.0  ;;  %v2024_v21 = vmul.f32 %v5598_v42, %v1768_v50  ;;  %5148 = vmatmul.mubr.msk.f32.vlgmr.msra.gmra.mxu0 %vm518_vm6, %v2213_v34  ;;  %5637 = vrcp.f32 %v7052_v1  ;;  %v1359_v33 = vpop.xlane.xlu1 %1358  ;;  %v2098_v16 = vsel %vm518_vm6, %v2010_v19, 0.0 }
 0x419   : > { %v5616_v44 = vpop.eup %5615  ;;  %v2178_v0 = vmul.f32 1.442695, %v7087_v54  ;;  %v7100_v41 = vadd.f32 %v6995_v47, %v2082_v45  ;;  %v5131_v8 = vpop.f32.mrf.mxu1  ;;  %5639 = vrcp.f32 %v1357_v12  ;;  %v2095_v35 = vadd.f32 %v2094_v3, %v2093_v39 }
 0x41a   : > { %v5618_v17 = vpop.eup %5617  ;;  %v2089_v7 = vsel %vm518_vm6, %v2024_v21, 0.0  ;;  %v2041_v42 = vmul.f32 %v5612_v29, %v5131_v8  ;;  %v4496_v27 = vadd.f32 -1.0, %v5616_v44  ;;  %v1391_v59 = vpop.xlane.xlu0 %1390  ;;  %vm2155_vm2 = vcmp.gt.f32.partialorder %v7087_v54, 0.0 }
 0x41b   : > { %v5620_v18 = vpop.eup %5619  ;;  %5641 = vpow2.f32 %v2178_v0  ;;  %v2176_v1 = vmul.f32 1.442695, %v7100_v41  ;;  %v1913_v37 = vpop.f32.mrf.mxu1  ;;  %v4495_v20 = vadd.f32 -1.0, %v5618_v17  ;;  %v2090_v63 = vadd.f32 %v2089_v7, %v7067_v15 }
 0x41c   : > { %v5622_v32 = vpop.eup %5621  ;;  %5643 = vrcp.f32 %v7061_v60  ;;  %v2096_v43 = vsel %vm518_vm6, %v2041_v42, 0.0  ;;  %v2040_v25 = vmul.f32 %v5610_v57, %v1913_v37  ;;  %v2215_v28 = vsel %vm2151_vm15, %v7031_v24, %v4496_v27 }
 0x41d   : > { %v5624_v52 = vpop.eup %5623  ;;  %5645 = vpow2.f32 %v2176_v1  ;;  %v2097_v4 = vadd.f32 %v2096_v43, %v2095_v35  ;;  %v5078_v56 = vpop.f32.mrf.mxu0  ;;  %v2214_v39 = vsel %vm2150_vm14, %v7038_v23, %v4495_v20  ;;  %v2103_v15 = vsel %vm518_vm6, %v2011_v46, 0.0 }
 0x41e   : > { %v5626_v58 = vpop.eup %5625  ;;  %5647 = vrcp.f32 %v1359_v33  ;;  %v2091_v5 = vsel %vm518_vm6, %v2040_v25, 0.0  ;;  %v2027_v60 = vmul.f32 %v5622_v32, %v5078_v56  ;;  %5150 = vmatprep.mubr.msk.f32.mxu0 %vm518_vm6, %v2214_v39  ;;  %v2012_v9 = vmul.f32 %v5624_v52, %v6968_v26  ;;  %v1423_v24 = vpop.xlane.xlu0 %1422 }
 0x41f   : > { %v7116_v12 = vadd.f32 %v6995_v47, %v2097_v4  ;;  %v2092_v11 = vadd.f32 %v2091_v5, %v2090_v63  ;;  %v1778_v31 = vpop.f32.mrf.mxu0  ;;  %5151 = vmatmul.mubr.msk.f32.gmra.mxu0 %vm518_vm6, %v2215_v28  ;;  %5649 = vrcp.f32 %v1391_v59  ;;  %v2013_v13 = vmul.f32 %v5626_v58, %v6962_v6  ;;  %v1421_v26 = vpop.xlane.xlu1 %1420 }
 0x420   : > { %v5628_v23 = vpop.eup %5627  ;;  %v2104_v40 = vsel %vm518_vm6, %v2027_v60, 0.0  ;;  %v2026_v62 = vmul.f32 %v5614_v38, %v1778_v31  ;;  %5651 = vrcp.f32 %v7079_v53  ;;  %v2108_v63 = vsel %vm518_vm6, %v2012_v9, 0.0 }
 0x421   : > { %v5630_v10 = vpop.eup %5629  ;;  %v2182_v57 = vmul.f32 1.442695, %v7116_v12  ;;  %v7126_v49 = vadd.f32 %v6995_v47, %v2092_v11  ;;  %v5134_v14 = vpop.f32.mrf.mxu1  ;;  %v4498_v50 = vadd.f32 -1.0, %v5628_v23  ;;  %v2105_v34 = vadd.f32 %v2104_v40, %v2103_v15 }
 0x422   : > { %v5632_v19 = vpop.eup %5631  ;;  %v2099_v29 = vsel %vm518_vm6, %v2026_v62, 0.0  ;;  %v2043_v45 = vmul.f32 %v5630_v10, %v5134_v14  ;;  %vm2154_vm3 = vcmp.gt.f32.partialorder %v7100_v41, 0.0  ;;  %vm2157_vm5 = vcmp.gt.f32.partialorder %v7116_v12, 0.0 }
 0x423   : > { %5653 = vpow2.f32 %v2182_v57  ;;  %v2180_v53 = vmul.f32 1.442695, %v7126_v49  ;;  %v1923_v38 = vpop.f32.mrf.mxu1  ;;  %v4497_v3 = vadd.f32 -1.0, %v5632_v19  ;;  %v5634_v21 = vpop.eup %5633  ;;  %v2100_v0 = vadd.f32 %v2099_v29, %v2098_v16 }
 0x424   : > { %5655 = vrcp.f32 %v1423_v24  ;;  %v2106_v46 = vsel %vm518_vm6, %v2043_v45, 0.0  ;;  %v2042_v44 = vmul.f32 %v5620_v18, %v1923_v38  ;;  %v5636_v6 = vpop.eup %5635  ;;  %v2217_v18 = vsel %vm2153_vm1, %v7059_v22, %v4498_v50 }
 0x425   : > { %5657 = vpow2.f32 %v2180_v53  ;;  %v2107_v8 = vadd.f32 %v2106_v46, %v2105_v34  ;;  %v5081_v17 = vpop.f32.mrf.mxu0  ;;  %v2216_v33 = vsel %vm2152_vm0, %v7071_v51, %v4497_v3  ;;  %v5638_v7 = vpop.eup %5637  ;;  %v2113_v22 = vsel %vm518_vm6, %v2013_v13, 0.0 }
 0x426   : > { %5659 = vrcp.f32 %v1421_v26  ;;  %v2101_v42 = vsel %vm518_vm6, %v2042_v44, 0.0  ;;  %v2029_v27 = vmul.f32 %v5636_v6, %v5081_v17  ;;  %5153 = vmatprep.mubr.msk.f32.mxu0 %vm518_vm6, %v2216_v33  ;;  %v5640_v59 = vpop.eup %5639  ;;  %vm2156_vm4 = vcmp.gt.f32.partialorder %v7126_v49, 0.0 }
 0x427   : > { %v7141_v1 = vadd.f32 %v6995_v47, %v2107_v8  ;;  %v2102_v35 = vadd.f32 %v2101_v42, %v2100_v0  ;;  %v1788_v37 = vpop.f32.mrf.mxu0  ;;  %5154 = vmatmul.mubr.msk.f32.gmra.mxu0 %vm518_vm6, %v2217_v18  ;;  %v2014_v40 = vmul.f32 %v5640_v59, %v6976_v36 }
 0x428   : > { %v5642_v20 = vpop.eup %5641  ;;  %v2114_v51 = vsel %vm518_vm6, %v2029_v27, 0.0  ;;  %v2028_v32 = vmul.f32 %v5634_v21, %v1788_v37 }
 0x429   : > { %v5644_v43 = vpop.eup %5643  ;;  %v2186_v25 = vmul.f32 1.442695, %v7141_v1  ;;  %v7147_v52 = vadd.f32 %v6995_v47, %v2102_v35  ;;  %v5137_v4 = vpop.f32.mrf.mxu1  ;;  %v4500_v5 = vadd.f32 -1.0, %v5642_v20  ;;  %v2115_v11 = vadd.f32 %v2114_v51, %v2113_v22 }
 0x42a   : > { %v5646_v56 = vpop.eup %5645  ;;  %v2109_v39 = vsel %vm518_vm6, %v2028_v32, 0.0  ;;  %v2045_v58 = vmul.f32 %v5644_v43, %v5137_v4  ;;  %v2118_v21 = vsel %vm518_vm6, %v2014_v40, 0.0  ;;  %vm2159_vm10 = vcmp.gt.f32.partialorder %v7141_v1, 0.0 }
 0x42b   : > { %v5648_v60 = vpop.eup %5647  ;;  %5661 = vpow2.f32 %v2186_v25  ;;  %v2184_v28 = vmul.f32 1.442695, %v7147_v52  ;;  %v1933_v15 = vpop.f32.mrf.mxu1  ;;  %v4499_v31 = vadd.f32 -1.0, %v5646_v56  ;;  %v2110_v9 = vadd.f32 %v2109_v39, %v2108_v63 }
 0x42c   : > { %v2116_v16 = vsel %vm518_vm6, %v2045_v58, 0.0  ;;  %v2044_v23 = vmul.f32 %v5638_v7, %v1933_v15  ;;  %v5650_v62 = vpop.eup %5649  ;;  %v2015_v19 = vmul.f32 %v5648_v60, %v6970_v2  ;;  %v2219_v45 = vsel %vm2155_vm2, %v7087_v54, %v4500_v5 }
 0x42d   : > { %5663 = vpow2.f32 %v2184_v28  ;;  %v2117_v10 = vadd.f32 %v2116_v16, %v2115_v11  ;;  %v5084_v24 = vpop.f32.mrf.mxu0  ;;  %v2218_v57 = vsel %vm2154_vm3, %v7100_v41, %v4499_v31  ;;  %v5652_v14 = vpop.eup %5651  ;;  %vm2158_vm8 = vcmp.gt.f32.partialorder %v7147_v52, 0.0 }
 0x42e   : > { %v2111_v13 = vsel %vm518_vm6, %v2044_v23, 0.0  ;;  %v2031_v29 = vmul.f32 %v5650_v62, %v5084_v24  ;;  %5156 = vmatprep.mubr.msk.f32.mxu0 %vm518_vm6, %v2218_v57  ;;  %v2123_v54 = vsel %vm518_vm6, %v2015_v19, 0.0 }
 0x42f   : > { %v2145_v36 = vadd.f32 %v6995_v47, %v2117_v10  ;;  %v2112_v50 = vadd.f32 %v2111_v13, %v2110_v9  ;;  %v1798_v26 = vpop.f32.mrf.mxu0  ;;  %5157 = vmatmul.mubr.msk.f32.gmra.mxu0 %vm518_vm6, %v2219_v45 }
 0x430   : > { %v5654_v53 = vpop.eup %5653  ;;  %v2124_v41 = vsel %vm518_vm6, %v2031_v29, 0.0  ;;  %v2030_v34 = vmul.f32 %v5652_v14, %v1798_v26 }
 0x431   : > { %v5656_v38 = vpop.eup %5655  ;;  %v2190_v3 = vmul.f32 1.442695, %v2145_v36  ;;  %v2144_v2 = vadd.f32 %v6995_v47, %v2112_v50  ;;  %v5140_v46 = vpop.f32.mrf.mxu1  ;;  %v4502_v8 = vadd.f32 -1.0, %v5654_v53  ;;  %v2125_v7 = vadd.f32 %v2124_v41, %v2123_v54 }
 0x432   : > { %v5658_v44 = vpop.eup %5657  ;;  %v2119_v6 = vsel %vm518_vm6, %v2030_v34, 0.0  ;;  %v2047_v0 = vmul.f32 %v5656_v38, %v5140_v46  ;;  %vm2161_vm13 = vcmp.gt.f32.partialorder %v2145_v36, 0.0  ;;  %v8452_v46 = vld [vmem:[#allocation14_spill] sm:$0xff] }
 0x433   : > { %v5660_v17 = vpop.eup %5659  ;;  %5665 = vpow2.f32 %v2190_v3  ;;  %v2188_v33 = vmul.f32 1.442695, %v2144_v2  ;;  %v1943_v42 = vpop.f32.mrf.mxu1  ;;  %v4501_v27 = vadd.f32 -1.0, %v5658_v44  ;;  %v2120_v35 = vadd.f32 %v2119_v6, %v2118_v21  ;;  %v8453_v6 = vld [vmem:[#allocation5_spill] sm:$0xff]  ;;  %v8459_v21 = vld [vmem:[#allocation20_spill] sm:$0xff] }
 0x434   : > { %v2126_v18 = vsel %vm518_vm6, %v2047_v0, 0.0  ;;  %v2046_v59 = vmul.f32 %v5660_v17, %v1943_v42  ;;  %v2221_v32 = vsel %vm2157_vm5, %v7116_v12, %v4502_v8  ;;  %vm2160_vm12 = vcmp.gt.f32.partialorder %v2144_v2, 0.0 }
 0x435   : > { %5667 = vpow2.f32 %v2188_v33  ;;  %v2127_v37 = vadd.f32 %v2126_v18, %v2125_v7  ;;  %v2220_v20 = vsel %vm2156_vm4, %v7126_v49, %v4501_v27  ;;  %v8454_v0 = vsub.s32 1, %v8453_v6  ;;  %v8456_v7 = vld [vmem:[#allocation9_spill] sm:$0xff] }
 0x436   : > { %v2121_v51 = vsel %vm518_vm6, %v2046_v59, 0.0  ;;  %5159 = vmatprep.mubr.msk.f32.mxu0 %vm518_vm6, %v2220_v20  ;;  %v8455_v17 = vsub.s32 2, %v8453_v6 }
 0x437   : > { %v2147_v43 = vadd.f32 %v6995_v47, %v2127_v37  ;;  %v2122_v25 = vadd.f32 %v2121_v51, %v2120_v35  ;;  %5160 = vmatmul.mubr.msk.f32.gmra.mxu0 %vm518_vm6, %v2221_v32 }
 0x438   : > { %v5662_v22 = vpop.eup %5661 }
 0x439   : > { %v2194_v63 = vmul.f32 1.442695, %v2147_v43  ;;  %v2146_v4 = vadd.f32 %v6995_v47, %v2122_v25  ;;  %v4504_v39 = vadd.f32 -1.0, %v5662_v22  ;;  %vm2163_vm15 = vcmp.gt.f32.partialorder %v2147_v43, 0.0 }
 0x43a   : > { %v5664_v56 = vpop.eup %5663 }
 0x43b   : > { %5669 = vpow2.f32 %v2194_v63  ;;  %v2192_v58 = vmul.f32 1.442695, %v2146_v4  ;;  %v4503_v49 = vadd.f32 -1.0, %v5664_v56  ;;  %v2223_v12 = vsel %vm2159_vm10, %v7141_v1, %v4504_v39  ;;  %v8457_v39 = vld [vmem:[#allocation17_spill] sm:$0xff] }
 0x43c   : > { %vm2162_vm14 = vcmp.gt.f32.partialorder %v2146_v4, 0.0 }
 0x43d   : > { %5671 = vpow2.f32 %v2192_v58  ;;  %v2222_v5 = vsel %vm2158_vm8, %v7147_v52, %v4503_v49 }
 0x43e   : > { %5162 = vmatprep.mubr.msk.f32.mxu0 %vm518_vm6, %v2222_v5 }
 0x43f   : > { %5163 = vmatmul.mubr.msk.f32.gmra.mxu0 %vm518_vm6, %v2223_v12 }
 0x440   : > { %v5666_v60 = vpop.eup %5665 }
 0x441   : > { %v4506_v28 = vadd.f32 -1.0, %v5666_v60 }
 0x442   : > { %v5668_v47 = vpop.eup %5667 }
 0x443   : > { %v4505_v11 = vadd.f32 -1.0, %v5668_v47  ;;  %v2225_v31 = vsel %vm2161_vm13, %v2145_v36, %v4506_v28 }
 0x445   : > { %v2224_v15 = vsel %vm2160_vm12, %v2144_v2, %v4505_v11  ;;  %v309_v2 = vld [vmem:[%s8285_s2 + $0x30] sm:$0x3f] }
 0x446   : > { %5165 = vmatprep.mubr.msk.f32.mxu0 %vm518_vm6, %v2224_v15  ;;  %v8458_v15 = vld [vmem:[#allocation18_spill] sm:$0xff] }
 0x447   : > { %5166 = vmatmul.mubr.msk.f32.gmra.mxu0 %vm518_vm6, %v2225_v31 }
 0x448   : > { %v5670_v52 = vpop.eup %5669 }
 0x449   : > { %v4508_v23 = vadd.f32 -1.0, %v5670_v52 }
 0x44a   : > { %v5672_v16 = vpop.eup %5671 }
 0x44b   : > { %v4507_v40 = vadd.f32 -1.0, %v5672_v16  ;;  %v2227_v62 = vsel %vm2163_vm15, %v2147_v43, %v4508_v23 }
 0x44d   : > { %v2226_v1 = vsel %vm2162_vm14, %v2146_v4, %v4507_v40 }
 0x44e   : > { %5168 = vmatprep.mubr.msk.f32.mxu0 %vm518_vm6, %v2226_v1 }
 0x44f   : > { %5169 = vmatmul.mubr.msk.f32.gmra.mxu0 %vm518_vm6, %v2227_v62 }
 0x4d8   : > { %v7191_v9 = vpop.f32.mrf.mxu0 }
 0x4d9   : > { %8442 = vst [vmem:[#allocation31_spill] sm:$0xff] %v7191_v9 }
 0x4da   : > { %v7193_v10 = vpop.f32.mrf.mxu0 }
 0x4db   : > { %8443 = vst [vmem:[#allocation13_spill] sm:$0xff] %v7193_v10 }
 0x4df   : > { %v7195_v24 = vpop.f32.mrf.mxu0 }
 0x4e0   : > { %8444 = vst [vmem:[#allocation11_spill] sm:$0xff] %v7195_v24 }
 0x4e1   : > { %v7197_v57 = vpop.f32.mrf.mxu0 }
 0x4e2   : > { %8445 = vst [vmem:[#allocation32_spill] sm:$0xff] %v7197_v57 }
 0x4e7   : > { %v7199_v14 = vpop.f32.mrf.mxu0 }
 0x4e8   : > { %8446 = vst [vmem:[#allocation12_spill] sm:$0xff] %v7199_v14 }
 0x4e9   : > { %v7201_v13 = vpop.f32.mrf.mxu0 }
 0x4ea   : > { %8447 = vst [vmem:[#allocation8_spill] sm:$0xff] %v7201_v13 }
 0x4ef   : > { %v7203_v19 = vpop.f32.mrf.mxu0 }
 0x4f0   : > { %8448 = vst [vmem:[#allocation33_spill] sm:$0xff] %v7203_v19 }
 0x4f1   : > { %v7205_v29 = vpop.f32.mrf.mxu0 }
 0x4f2   : > { %8449 = vst [vmem:[#allocation10_spill] sm:$0xff] %v7205_v29 }
 0x4f7   : > { %v7207_v45 = vpop.f32.mrf.mxu0 }
 0x4f9   : > { %v7209_v36 = vpop.f32.mrf.mxu0 }
 0x4ff   : > { %v7211_v50 = vpop.f32.mrf.mxu0 }
 0x501   : > { %v7213_v26 = vpop.f32.mrf.mxu0 }
 0x507   : > { %v7215_v53 = vpop.f32.mrf.mxu0 }
 0x509   : > { %v7217_v41 = vpop.f32.mrf.mxu0 }
 0x50f   : > { %v7219_v34 = vpop.f32.mrf.mxu0 }
 0x510   : > { %5172 = vmatpush3.xpose.msk.msra.mxu1 %vm518_vm6, %v7219_v34  ;;  %5206 = vmatprep.subr.msk.mxu0 %vm6128_vm7, %v7219_v34 }
 0x511   : > { %v7226_v3 = vpop.f32.mrf.mxu0  ;;  %5207 = vmatpush3.msk.msra.mxu0 %vm6128_vm7, %v7219_v34  ;;  %5173 = vmatprep.subr.mxu1 %v8441_v61 }
 0x512   : > { %5208 = vmatprep.subr.msk.mxu0 %vm6128_vm7, %v7226_v3 }
 0x513   : > { %5209 = vmatpush3.msk.msra.mxu0 %vm6128_vm7, %v7226_v3 }
 0x514   : > { %5174 = vmatpush3.xpose.msk.msra.mxu1 %vm518_vm6, %v7226_v3  ;;  %5210 = vmatprep.subr.msk.mxu0 %vm6128_vm7, %v7215_v53 }
 0x515   : > { %5211 = vmatpush3.msk.msra.mxu0 %vm6128_vm7, %v7215_v53  ;;  %5175 = vmatprep.subr.mxu1 %v8441_v61 }
 0x516   : > { %5212 = vmatprep.subr.msk.mxu0 %vm6128_vm7, %v7217_v41 }
 0x517   : > { %5213 = vmatpush3.msk.msra.mxu0 %vm6128_vm7, %v7217_v41 }
 0x518   : > { %5176 = vmatpush3.xpose.msk.msra.mxu1 %vm518_vm6, %v7215_v53  ;;  %5214 = vmatprep.subr.msk.mxu0 %vm6128_vm7, %v7211_v50 }
 0x519   : > { %5215 = vmatpush3.msk.msra.mxu0 %vm6128_vm7, %v7211_v50  ;;  %5177 = vmatprep.subr.mxu1 %v8441_v61 }
 0x51a   : > { %5216 = vmatprep.subr.msk.mxu0 %vm6128_vm7, %v7213_v26 }
 0x51b   : > { %5217 = vmatpush3.msk.msra.mxu0 %vm6128_vm7, %v7213_v26 }
 0x51c   : > { %5178 = vmatpush3.xpose.msk.msra.mxu1 %vm518_vm6, %v7217_v41  ;;  %5218 = vmatprep.subr.msk.mxu0 %vm6128_vm7, %v7207_v45 }
 0x51d   : > { %5219 = vmatpush3.msk.msra.mxu0 %vm6128_vm7, %v7207_v45  ;;  %5179 = vmatprep.subr.mxu1 %v8441_v61 }
 0x51e   : > { %5220 = vmatprep.subr.msk.mxu0 %vm6128_vm7, %v7209_v36 }
 0x51f   : > { %5221 = vmatpush3.msk.msra.mxu0 %vm6128_vm7, %v7209_v36 }
 0x520   : > { %5180 = vmatpush3.xpose.msk.msra.mxu1 %vm518_vm6, %v7211_v50  ;;  %5222 = vmatprep.subr.msk.mxu0 %vm6128_vm7, %v7203_v19 }
 0x521   : > { %5223 = vmatpush3.msk.msra.mxu0 %vm6128_vm7, %v7203_v19  ;;  %5181 = vmatprep.subr.mxu1 %v8441_v61 }
 0x522   : > { %5224 = vmatprep.subr.msk.mxu0 %vm6128_vm7, %v7205_v29 }
 0x523   : > { %5225 = vmatpush3.msk.msra.mxu0 %vm6128_vm7, %v7205_v29 }
 0x524   : > { %5182 = vmatpush3.xpose.msk.msra.mxu1 %vm518_vm6, %v7213_v26  ;;  %5226 = vmatprep.subr.msk.mxu0 %vm6128_vm7, %v7199_v14 }
 0x525   : > { %5227 = vmatpush3.msk.msra.mxu0 %vm6128_vm7, %v7199_v14  ;;  %5183 = vmatprep.subr.mxu1 %v8441_v61 }
 0x526   : > { %5228 = vmatprep.subr.msk.mxu0 %vm6128_vm7, %v7201_v13 }
 0x527   : > { %5229 = vmatpush3.msk.msra.mxu0 %vm6128_vm7, %v7201_v13 }
 0x528   : > { %5184 = vmatpush3.xpose.msk.msra.mxu1 %vm518_vm6, %v7207_v45  ;;  %5230 = vmatprep.subr.msk.mxu0 %vm6128_vm7, %v7195_v24 }
 0x529   : > { %5231 = vmatpush3.msk.msra.mxu0 %vm6128_vm7, %v7195_v24  ;;  %5185 = vmatprep.subr.mxu1 %v8441_v61 }
 0x52a   : > { %5232 = vmatprep.subr.msk.mxu0 %vm6128_vm7, %v7197_v57 }
 0x52b   : > { %5233 = vmatpush3.msk.msra.mxu0 %vm6128_vm7, %v7197_v57 }
 0x52c   : > { %5186 = vmatpush3.xpose.msk.msra.mxu1 %vm518_vm6, %v7209_v36  ;;  %5234 = vmatprep.subr.msk.mxu0 %vm6128_vm7, %v7191_v9 }
 0x52d   : > { %5235 = vmatpush3.msk.msra.mxu0 %vm6128_vm7, %v7191_v9  ;;  %5187 = vmatprep.subr.mxu1 %v8441_v61 }
 0x52e   : > { %5236 = vmatprep.subr.msk.mxu0 %vm6128_vm7, %v7193_v10 }
 0x52f   : > { %5237 = vmatpush3.msk.msra.mxu0 %vm6128_vm7, %v7193_v10 }
 0x530   : > { %5188 = vmatpush3.xpose.msk.msra.mxu1 %vm518_vm6, %v7203_v19  ;;  %5262 = vmatprep.subr.msk.mxu0 %vm6253_vm9, %v7219_v34 }
 0x531   : > { %5189 = vmatprep.subr.mxu1 %v8441_v61 }
 0x534   : > { %5190 = vmatpush3.xpose.msk.msra.mxu1 %vm518_vm6, %v7205_v29 }
 0x535   : > { %5191 = vmatprep.subr.mxu1 %v8441_v61 }
 0x538   : > { %5192 = vmatpush3.xpose.msk.msra.mxu1 %vm518_vm6, %v7199_v14 }
 0x539   : > { %5193 = vmatprep.subr.mxu1 %v8441_v61 }
 0x53c   : > { %5194 = vmatpush3.xpose.msk.msra.mxu1 %vm518_vm6, %v7201_v13 }
 0x53d   : > { %5195 = vmatprep.subr.mxu1 %v8441_v61 }
 0x540   : > { %5196 = vmatpush3.xpose.msk.msra.mxu1 %vm518_vm6, %v7195_v24 }
 0x541   : > { %5197 = vmatprep.subr.mxu1 %v8441_v61 }
 0x544   : > { %5198 = vmatpush3.xpose.msk.msra.mxu1 %vm518_vm6, %v7197_v57 }
 0x545   : > { %5199 = vmatprep.subr.mxu1 %v8441_v61 }
 0x548   : > { %5200 = vmatpush3.xpose.msk.msra.mxu1 %vm518_vm6, %v7191_v9 }
 0x549   : > { %5201 = vmatprep.subr.mxu1 %v8441_v61 }
 0x54c   : > { %5202 = vmatpush3.xpose.msk.msra.mxu1 %vm518_vm6, %v7193_v10 }
 0x54d   : > { %5318 = vmatprep.subr.msk.mxu1 %vm6291_vm11, %v7219_v34 }
 0x54f   : > { %5204 = vmatmul.mubr.msk.f32.vlgmr.msra.gmra.mxu1 %vm518_vm6, %v309_v2 }
 0x550   : > { %5319 = vmatpush3.msk.msra.mxu1 %vm6291_vm11, %v7219_v34 }
 0x551   : > { %5320 = vmatprep.subr.msk.mxu1 %vm6291_vm11, %v7226_v3 }
 0x552   : > { %5321 = vmatpush3.msk.msra.mxu1 %vm6291_vm11, %v7226_v3 }
 0x553   : > { %5322 = vmatprep.subr.msk.mxu1 %vm6291_vm11, %v7215_v53 }
 0x554   : > { %5323 = vmatpush3.msk.msra.mxu1 %vm6291_vm11, %v7215_v53 }
 0x555   : > { %5324 = vmatprep.subr.msk.mxu1 %vm6291_vm11, %v7217_v41 }
 0x556   : > { %5325 = vmatpush3.msk.msra.mxu1 %vm6291_vm11, %v7217_v41 }
 0x557   : > { %5326 = vmatprep.subr.msk.mxu1 %vm6291_vm11, %v7211_v50 }
 0x558   : > { %5327 = vmatpush3.msk.msra.mxu1 %vm6291_vm11, %v7211_v50 }
 0x559   : > { %5328 = vmatprep.subr.msk.mxu1 %vm6291_vm11, %v7213_v26 }
 0x55a   : > { %5329 = vmatpush3.msk.msra.mxu1 %vm6291_vm11, %v7213_v26 }
 0x55b   : > { %5330 = vmatprep.subr.msk.mxu1 %vm6291_vm11, %v7207_v45 }
 0x55c   : > { %5331 = vmatpush3.msk.msra.mxu1 %vm6291_vm11, %v7207_v45 }
 0x55d   : > { %5332 = vmatprep.subr.msk.mxu1 %vm6291_vm11, %v7209_v36 }
 0x55e   : > { %5333 = vmatpush3.msk.msra.mxu1 %vm6291_vm11, %v7209_v36 }
 0x55f   : > { %5334 = vmatprep.subr.msk.mxu1 %vm6291_vm11, %v7203_v19 }
 0x560   : > { %5335 = vmatpush3.msk.msra.mxu1 %vm6291_vm11, %v7203_v19 }
 0x561   : > { %5336 = vmatprep.subr.msk.mxu1 %vm6291_vm11, %v7205_v29 }
 0x562   : > { %5337 = vmatpush3.msk.msra.mxu1 %vm6291_vm11, %v7205_v29 }
 0x563   : > { %5338 = vmatprep.subr.msk.mxu1 %vm6291_vm11, %v7199_v14 }
 0x564   : > { %5339 = vmatpush3.msk.msra.mxu1 %vm6291_vm11, %v7199_v14 }
 0x565   : > { %5340 = vmatprep.subr.msk.mxu1 %vm6291_vm11, %v7201_v13 }
 0x566   : > { %5341 = vmatpush3.msk.msra.mxu1 %vm6291_vm11, %v7201_v13 }
 0x567   : > { %5342 = vmatprep.subr.msk.mxu1 %vm6291_vm11, %v7195_v24 }
 0x568   : > { %5343 = vmatpush3.msk.msra.mxu1 %vm6291_vm11, %v7195_v24 }
 0x569   : > { %5344 = vmatprep.subr.msk.mxu1 %vm6291_vm11, %v7197_v57 }
 0x56a   : > { %5345 = vmatpush3.msk.msra.mxu1 %vm6291_vm11, %v7197_v57  ;;  %v8470_v57 = vld [vmem:[#allocation29_spill] sm:$0xff] }
 0x56b   : > { %5346 = vmatprep.subr.msk.mxu1 %vm6291_vm11, %v7191_v9 }
 0x56c   : > { %5347 = vmatpush3.msk.msra.mxu1 %vm6291_vm11, %v7191_v9 }
 0x56d   : > { %5348 = vmatprep.subr.msk.mxu1 %vm6291_vm11, %v7193_v10 }
 0x56e   : > { %5349 = vmatpush3.msk.msra.mxu1 %vm6291_vm11, %v7193_v10 }
 0x60f   : > { %v7469_v61 = vpop.f32.mrf.mxu1 }
 0x610   : > { %v2545_v44 = vrot.slane %v7469_v61, %v8452_v46  ;;  %v2612_v8 = vrot.slane %v7469_v61, %v8454_v0  ;;  %v2679_v33 = vrot.slane %v7469_v61, %v8455_v17  ;;  %v2751_v42 = vrot.slane %v7469_v61, %v8456_v7 }
 0x611   : > { %v5205_v54 = vpop.f32.mrf.mxu1 }
 0x612   : > { %2551 = vbcast.lane.b32.xlu0 %v2545_v44, 264  ;;  %2547 = vbcast.lane.b32.xlu1 %v2545_v44, 256  ;;  %v2759_v27 = vcombine.high %v2751_v42, %v2751_v42 }
 0x614   : > { %v2774_v18 = vrot.slane %v2759_v27, %v8456_v7 }
 0x616   : > { %2563 = vbcast.lane.b32.xlu0 %v2545_v44, 288  ;;  %2555 = vbcast.lane.b32.xlu1 %v2545_v44, 272  ;;  %v2782_v59 = vcombine.high %v2774_v18, %v2774_v18 }
 0x618   : > { %v7483_v35 = vrot.slane %v2782_v59, %v8452_v46  ;;  %v2744_v59 = vcombine.high %v7469_v61, %v7469_v61 }
 0x61a   : > { %2571 = vbcast.lane.b32.xlu0 %v2545_v44, 304  ;;  %2559 = vbcast.lane.b32.xlu1 %v2545_v44, 280  ;;  %v2758_v61 = vrot.slane %v2744_v59, %v8456_v7 }
 0x61e   : > { %2579 = vbcast.lane.b32.xlu0 %v2545_v44, 320  ;;  %2567 = vbcast.lane.b32.xlu1 %v2545_v44, 296 }
 0x622   : > { %2587 = vbcast.lane.b32.xlu0 %v2545_v44, 336  ;;  %2575 = vbcast.lane.b32.xlu1 %v2545_v44, 312 }
 0x626   : > { %2595 = vbcast.lane.b32.xlu0 %v2545_v44, 352  ;;  %2583 = vbcast.lane.b32.xlu1 %v2545_v44, 328 }
 0x62a   : > { %2603 = vbcast.lane.b32.xlu0 %v2545_v44, 368  ;;  %2591 = vbcast.lane.b32.xlu1 %v2545_v44, 344 }
 0x62e   : > { %2614 = vbcast.lane.b32.xlu0 %v2612_v8, 256  ;;  %2599 = vbcast.lane.b32.xlu1 %v2545_v44, 360 }
 0x632   : > { %2681 = vbcast.lane.b32.xlu0 %v2679_v33, 256  ;;  %2607 = vbcast.lane.b32.xlu1 %v2545_v44, 376 }
 0x636   : > { %2622 = vbcast.lane.b32.xlu0 %v2612_v8, 272  ;;  %2618 = vbcast.lane.b32.xlu1 %v2612_v8, 264 }
 0x63a   : > { %2689 = vbcast.lane.b32.xlu0 %v2679_v33, 272  ;;  %2685 = vbcast.lane.b32.xlu1 %v2679_v33, 264 }
 0x63e   : > { %2630 = vbcast.lane.b32.xlu0 %v2612_v8, 288  ;;  %2626 = vbcast.lane.b32.xlu1 %v2612_v8, 280 }
 0x642   : > { %2697 = vbcast.lane.b32.xlu0 %v2679_v33, 288  ;;  %2693 = vbcast.lane.b32.xlu1 %v2679_v33, 280 }
 0x646   : > { %2638 = vbcast.lane.b32.xlu0 %v2612_v8, 304  ;;  %2634 = vbcast.lane.b32.xlu1 %v2612_v8, 296 }
 0x64a   : > { %2705 = vbcast.lane.b32.xlu0 %v2679_v33, 304  ;;  %2701 = vbcast.lane.b32.xlu1 %v2679_v33, 296 }
 0x64e   : > { %2646 = vbcast.lane.b32.xlu0 %v2612_v8, 320  ;;  %2642 = vbcast.lane.b32.xlu1 %v2612_v8, 312 }
 0x652   : > { %2713 = vbcast.lane.b32.xlu0 %v2679_v33, 320  ;;  %2709 = vbcast.lane.b32.xlu1 %v2679_v33, 312 }
 0x656   : > { %2654 = vbcast.lane.b32.xlu0 %v2612_v8, 336  ;;  %2650 = vbcast.lane.b32.xlu1 %v2612_v8, 328 }
 0x65a   : > { %2721 = vbcast.lane.b32.xlu0 %v2679_v33, 336  ;;  %2717 = vbcast.lane.b32.xlu1 %v2679_v33, 328 }
 0x65e   : > { %2662 = vbcast.lane.b32.xlu0 %v2612_v8, 352  ;;  %2658 = vbcast.lane.b32.xlu1 %v2612_v8, 344 }
 0x662   : > { %2729 = vbcast.lane.b32.xlu0 %v2679_v33, 352  ;;  %2725 = vbcast.lane.b32.xlu1 %v2679_v33, 344 }
 0x666   : > { %2670 = vbcast.lane.b32.xlu0 %v2612_v8, 368  ;;  %2666 = vbcast.lane.b32.xlu1 %v2612_v8, 360 }
 0x66a   : > { %2737 = vbcast.lane.b32.xlu0 %v2679_v33, 368  ;;  %2733 = vbcast.lane.b32.xlu1 %v2679_v33, 360 }
 0x66e   : > { %2674 = vbcast.lane.b32.xlu1 %v2612_v8, 376 }
 0x672   : > { %2741 = vbcast.lane.b32.xlu1 %v2679_v33, 376  ;;  %v8460_v33 = vld [vmem:[#allocation19_spill] sm:$0xff] }
 0x684   : > { %v2552_v37 = vpop.permute.xlu0 %2551  ;;  %v2548_v20 = vpop.permute.xlu1 %2547 }
 0x685   : > { %v2798_v51 = vadd.f32 %v7483_v35, %v2548_v20  ;;  %v2799_v43 = vadd.f32 %v7483_v35, %v2552_v37  ;;  %v8461_v20 = vld [vmem:[#allocation22_spill] sm:$0xff] }
 0x687   : > { %v2846_v32 = vmul.f32 0.2, %v2798_v51  ;;  %v2847_v49 = vmul.f32 0.2, %v2799_v43 }
 0x688   : > { %v2564_v25 = vpop.permute.xlu0 %2563  ;;  %v2556_v22 = vpop.permute.xlu1 %2555 }
 0x689   : > { %v2894_v63 = vmax.f32 %v2798_v51, %v2846_v32  ;;  %v2800_v4 = vadd.f32 %v7483_v35, %v2556_v22  ;;  %v2802_v5 = vadd.f32 %v7483_v35, %v2564_v25  ;;  %v2895_v52 = vmax.f32 %v2799_v43, %v2847_v49 }
 0x68b   : > { %v2848_v56 = vmul.f32 0.2, %v2800_v4  ;;  %v7489_v58 = vadd.f32 %v2894_v63, %v8457_v39  ;;  %v2850_v16 = vmul.f32 0.2, %v2802_v5  ;;  %v7505_v42 = vadd.f32 %v2895_v52, %v8460_v33 }
 0x68c   : > { %v2572_v12 = vpop.permute.xlu0 %2571  ;;  %v2560_v60 = vpop.permute.xlu1 %2559 }
 0x68d   : > { %v2896_v47 = vmax.f32 %v2800_v4, %v2848_v56  ;;  %v2801_v28 = vadd.f32 %v7483_v35, %v2560_v60  ;;  %2990 = vmax.xlane.f32.xlu0 %v7489_v58  ;;  %v2804_v23 = vadd.f32 %v7483_v35, %v2572_v12  ;;  %v2898_v54 = vmax.f32 %v2802_v5, %v2850_v16  ;;  %v8462_v4 = vld [vmem:[#allocation21_spill] sm:$0xff]  ;;  %v8463_v60 = vld [vmem:[#allocation24_spill] sm:$0xff] }
 0x68f   : > { %v2849_v11 = vmul.f32 0.2, %v2801_v28  ;;  %v7495_v31 = vadd.f32 %v2896_v47, %v8458_v15  ;;  %v2852_v6 = vmul.f32 0.2, %v2804_v23  ;;  %v7517_v56 = vadd.f32 %v2898_v54, %v8462_v4 }
 0x690   : > { %v2580_v40 = vpop.permute.xlu0 %2579  ;;  %v2568_v1 = vpop.permute.xlu1 %2567  ;;  %v2767_v54 = vrot.slane %v2758_v61, %v8456_v7 }
 0x691   : > { %v2897_v62 = vmax.f32 %v2801_v28, %v2849_v11  ;;  %v2803_v38 = vadd.f32 %v7483_v35, %v2568_v1  ;;  %2994 = vmax.xlane.f32.xlu0 %v7495_v31  ;;  %v2806_v0 = vadd.f32 %v7483_v35, %v2580_v40  ;;  %v2900_v32 = vmax.f32 %v2804_v23, %v2852_v6  ;;  %v8464_v40 = vld [vmem:[#allocation23_spill] sm:$0xff] }
 0x693   : > { %v2851_v2 = vmul.f32 0.2, %v2803_v38  ;;  %v7501_v44 = vadd.f32 %v2897_v62, %v8459_v21  ;;  %v2854_v43 = vmul.f32 0.2, %v2806_v0  ;;  %v7528_v1 = vadd.f32 %v2900_v32, %v8464_v40  ;;  %v8466_v32 = vld [vmem:[#allocation25_spill] sm:$0xff] }
 0x694   : > { %v2588_v8 = vpop.permute.xlu0 %2587  ;;  %v2576_v17 = vpop.permute.xlu1 %2575 }
 0x695   : > { %v2899_v27 = vmax.f32 %v2803_v38, %v2851_v2  ;;  %v2805_v18 = vadd.f32 %v7483_v35, %v2576_v17  ;;  %2996 = vmax.xlane.f32.xlu0 %v7501_v44  ;;  %v2808_v25 = vadd.f32 %v7483_v35, %v2588_v8  ;;  %v2902_v28 = vmax.f32 %v2806_v0, %v2854_v43  ;;  %v8465_v0 = vld [vmem:[#allocation26_spill] sm:$0xff] }
 0x696   : > { %2992 = vmax.xlane.f32.xlu1 %v7505_v42  ;;  %v2760_v2 = vcombine.high %v2758_v61, %v2758_v61  ;;  %v8467_v61 = vld [vmem:[#allocation28_spill] sm:$0xff] }
 0x697   : > { %v2853_v37 = vmul.f32 0.2, %v2805_v18  ;;  %v7513_v51 = vadd.f32 %v2899_v27, %v8461_v20  ;;  %v2856_v11 = vmul.f32 0.2, %v2808_v25  ;;  %v7539_v43 = vadd.f32 %v2902_v28, %v8466_v32 }
 0x698   : > { %v2596_v22 = vpop.permute.xlu0 %2595  ;;  %v2584_v63 = vpop.permute.xlu1 %2583 }
 0x699   : > { %v2901_v49 = vmax.f32 %v2805_v18, %v2853_v37  ;;  %v2807_v5 = vadd.f32 %v7483_v35, %v2584_v63  ;;  %3000 = vmax.xlane.f32.xlu0 %v7513_v51  ;;  %v2810_v52 = vadd.f32 %v7483_v35, %v2596_v22  ;;  %v2904_v17 = vmax.f32 %v2808_v25, %v2856_v11 }
 0x69a   : > { %2998 = vmax.xlane.f32.xlu1 %v7517_v56 }
 0x69b   : > { %v2855_v12 = vmul.f32 0.2, %v2807_v5  ;;  %v7524_v47 = vadd.f32 %v2901_v49, %v8463_v60  ;;  %v2858_v27 = vmul.f32 0.2, %v2810_v52  ;;  %v2781_v49 = vrot.slane %v2760_v2, %v8456_v7 }
 0x69c   : > { %v2604_v16 = vpop.permute.xlu0 %2603  ;;  %v2592_v23 = vpop.permute.xlu1 %2591 }
 0x69d   : > { %v2903_v62 = vmax.f32 %v2807_v5, %v2855_v12  ;;  %v2809_v38 = vadd.f32 %v7483_v35, %v2592_v23  ;;  %3004 = vmax.xlane.f32.xlu0 %v7524_v47  ;;  %v2812_v18 = vadd.f32 %v7483_v35, %v2604_v16  ;;  %v7545_v5 = vrot.slane %v2767_v54, %v8452_v46 }
 0x69e   : > { %3002 = vmax.xlane.f32.xlu1 %v7528_v1  ;;  %v2906_v11 = vmax.f32 %v2810_v52, %v2858_v27  ;;  %v7558_v2 = vrot.slane %v2781_v49, %v8452_v46  ;;  %v8469_v49 = vld [vmem:[#allocation30_spill] sm:$0xff] }
 0x69f   : > { %v2857_v6 = vmul.f32 0.2, %v2809_v38  ;;  %v7535_v8 = vadd.f32 %v2903_v62, %v8465_v0  ;;  %v2860_v16 = vmul.f32 0.2, %v2812_v18 }
 0x6a0   : > { %v2615_v59 = vpop.permute.xlu0 %2614  ;;  %v2600_v37 = vpop.permute.xlu1 %2599 }
 0x6a1   : > { %v2905_v22 = vmax.f32 %v2809_v38, %v2857_v6  ;;  %v2811_v63 = vadd.f32 %v7483_v35, %v2600_v37  ;;  %3008 = vmax.xlane.f32.xlu0 %v7535_v8  ;;  %v2814_v28 = vadd.f32 %v7545_v5, %v2615_v59  ;;  %v8468_v38 = vld [vmem:[#allocation27_spill] sm:$0xff]  ;;  %v2908_v27 = vmax.f32 %v2812_v18, %v2860_v16 }
 0x6a2   : > { %3006 = vmax.xlane.f32.xlu1 %v7539_v43  ;;  %v7553_v6 = vadd.f32 %v2904_v17, %v8468_v38 }
 0x6a3   : > { %v2859_v25 = vmul.f32 0.2, %v2811_v63  ;;  %v7549_v12 = vadd.f32 %v2905_v22, %v8467_v61  ;;  %v2862_v59 = vmul.f32 0.2, %v2814_v28 }
 0x6a4   : > { %v2682_v23 = vpop.permute.xlu0 %2681  ;;  %v2608_v62 = vpop.permute.xlu1 %2607 }
 0x6a5   : > { %v2907_v37 = vmax.f32 %v2811_v63, %v2859_v25  ;;  %v2813_v7 = vadd.f32 %v7483_v35, %v2608_v62  ;;  %3012 = vmax.xlane.f32.xlu0 %v7549_v12  ;;  %v2830_v22 = vadd.f32 %v7558_v2, %v2682_v23  ;;  %v7566_v63 = vadd.f32 %v2906_v11, %v6517_v48 }
 0x6a6   : > { %3010 = vmax.xlane.f32.xlu1 %v7553_v6  ;;  %v2910_v18 = vmax.f32 %v2814_v28, %v2862_v59  ;;  %v7576_v11 = vadd.f32 %v2908_v27, %v8470_v57 }
 0x6a7   : > { %v2861_v54 = vmul.f32 0.2, %v2813_v7  ;;  %v7562_v52 = vadd.f32 %v2907_v37, %v6536_v30  ;;  %v2878_v16 = vmul.f32 0.2, %v2830_v22 }
 0x6a8   : > { %v2623_v17 = vpop.permute.xlu0 %2622  ;;  %v2619_v10 = vpop.permute.xlu1 %2618  ;;  %v7586_v27 = vadd.f32 %v2910_v18, %v8457_v39 }
 0x6a9   : > { %v2909_v35 = vmax.f32 %v2813_v7, %v2861_v54  ;;  %v2815_v25 = vadd.f32 %v7545_v5, %v2619_v10  ;;  %3016 = vmax.xlane.f32.xlu0 %v7562_v52  ;;  %v2816_v23 = vadd.f32 %v7545_v5, %v2623_v17  ;;  %v2926_v28 = vmax.f32 %v2830_v22, %v2878_v16 }
 0x6aa   : > { %3014 = vmax.xlane.f32.xlu1 %v7566_v63 }
 0x6ab   : > { %v2863_v46 = vmul.f32 0.2, %v2815_v25  ;;  %v7572_v62 = vadd.f32 %v2909_v35, %v8469_v49  ;;  %v2864_v59 = vmul.f32 0.2, %v2816_v23  ;;  %v7596_v18 = vadd.f32 %v2926_v28, %v8457_v39 }
 0x6ac   : > { %v2690_v37 = vpop.permute.xlu0 %2689  ;;  %v2686_v9 = vpop.permute.xlu1 %2685 }
 0x6ad   : > { %v2911_v7 = vmax.f32 %v2815_v25, %v2863_v46  ;;  %v2831_v10 = vadd.f32 %v7558_v2, %v2686_v9  ;;  %3020 = vmax.xlane.f32.xlu0 %v7572_v62  ;;  %v2832_v17 = vadd.f32 %v7558_v2, %v2690_v37  ;;  %v2912_v22 = vmax.f32 %v2816_v23, %v2864_v59 }
 0x6ae   : > { %3018 = vmax.xlane.f32.xlu1 %v7576_v11  ;;  %8471 = vst [vmem:[#allocation6_spill] sm:$0xff] %v7596_v18 }
 0x6af   : > { %v2879_v54 = vmul.f32 0.2, %v2831_v10  ;;  %v7582_v35 = vadd.f32 %v2911_v7, %v8460_v33  ;;  %v2880_v16 = vmul.f32 0.2, %v2832_v17  ;;  %v7606_v39 = vadd.f32 %v2912_v22, %v8458_v15 }
 0x6b0   : > { %v2631_v24 = vpop.permute.xlu0 %2630  ;;  %v2627_v13 = vpop.permute.xlu1 %2626 }
 0x6b1   : > { %v2927_v25 = vmax.f32 %v2831_v10, %v2879_v54  ;;  %v2817_v9 = vadd.f32 %v7545_v5, %v2627_v13  ;;  %3024 = vmax.xlane.f32.xlu0 %v7582_v35  ;;  %v2818_v37 = vadd.f32 %v7545_v5, %v2631_v24  ;;  %v2928_v23 = vmax.f32 %v2832_v17, %v2880_v16 }
 0x6b2   : > { %3022 = vmax.xlane.f32.xlu1 %v7586_v27  ;;  %8472 = vst [vmem:[#allocation34_spill] sm:$0xff] %v7606_v39 }
 0x6b3   : > { %v2865_v46 = vmul.f32 0.2, %v2817_v9  ;;  %v7592_v7 = vadd.f32 %v2927_v25, %v8460_v33  ;;  %v2866_v59 = vmul.f32 0.2, %v2818_v37  ;;  %v7616_v22 = vadd.f32 %v2928_v23, %v8458_v15 }
 0x6b4   : > { %v2698_v14 = vpop.permute.xlu0 %2697  ;;  %v2694_v29 = vpop.permute.xlu1 %2693 }
 0x6b5   : > { %v2913_v10 = vmax.f32 %v2817_v9, %v2865_v46  ;;  %v2833_v13 = vadd.f32 %v7558_v2, %v2694_v29  ;;  %3056 = vmax.xlane.f32.xlu0 %v7592_v7  ;;  %v2834_v24 = vadd.f32 %v7558_v2, %v2698_v14  ;;  %v2914_v17 = vmax.f32 %v2818_v37, %v2866_v59 }
 0x6b6   : > { %3054 = vmax.xlane.f32.xlu1 %v7596_v18  ;;  %8473 = vst [vmem:[#allocation7_spill] sm:$0xff] %v7616_v22 }
 0x6b7   : > { %v2881_v54 = vmul.f32 0.2, %v2833_v13  ;;  %v7602_v33 = vadd.f32 %v2913_v10, %v8459_v21  ;;  %v2882_v16 = vmul.f32 0.2, %v2834_v24  ;;  %v7626_v15 = vadd.f32 %v2914_v17, %v8462_v4 }
 0x6b8   : > { %v2639_v25 = vpop.permute.xlu0 %2638  ;;  %v2635_v19 = vpop.permute.xlu1 %2634 }
 0x6b9   : > { %v2929_v28 = vmax.f32 %v2833_v13, %v2881_v54  ;;  %v2819_v29 = vadd.f32 %v7545_v5, %v2635_v19  ;;  %3028 = vmax.xlane.f32.xlu0 %v7602_v33  ;;  %v2820_v14 = vadd.f32 %v7545_v5, %v2639_v25  ;;  %v2930_v37 = vmax.f32 %v2834_v24, %v2882_v16 }
 0x6ba   : > { %3026 = vmax.xlane.f32.xlu1 %v7606_v39  ;;  %8474 = vst [vmem:[#allocation35_spill] sm:$0xff] %v7626_v15 }
 0x6bb   : > { %v2867_v9 = vmul.f32 0.2, %v2819_v29  ;;  %v7612_v46 = vadd.f32 %v2929_v28, %v8459_v21  ;;  %v2868_v59 = vmul.f32 0.2, %v2820_v14  ;;  %v7636_v17 = vadd.f32 %v2930_v37, %v8462_v4 }
 0x6bc   : > { %v2706_v10 = vpop.permute.xlu0 %2705  ;;  %v2702_v18 = vpop.permute.xlu1 %2701 }
 0x6bd   : > { %v2915_v13 = vmax.f32 %v2819_v29, %v2867_v9  ;;  %v2835_v19 = vadd.f32 %v7558_v2, %v2702_v18  ;;  %3060 = vmax.xlane.f32.xlu0 %v7612_v46  ;;  %v2836_v25 = vadd.f32 %v7558_v2, %v2706_v10  ;;  %v2916_v24 = vmax.f32 %v2820_v14, %v2868_v59 }
 0x6be   : > { %3058 = vmax.xlane.f32.xlu1 %v7616_v22  ;;  %8475 = vst [vmem:[#allocation36_spill] sm:$0xff] %v7636_v17 }
 0x6bf   : > { %v2883_v54 = vmul.f32 0.2, %v2835_v19  ;;  %v7622_v21 = vadd.f32 %v2915_v13, %v8461_v20  ;;  %v2884_v16 = vmul.f32 0.2, %v2836_v25  ;;  %v7646_v4 = vadd.f32 %v2916_v24, %v8464_v40 }
 0x6c0   : > { %v2647_v28 = vpop.permute.xlu0 %2646  ;;  %v2643_v39 = vpop.permute.xlu1 %2642 }
 0x6c1   : > { %v2931_v23 = vmax.f32 %v2835_v19, %v2883_v54  ;;  %v2821_v18 = vadd.f32 %v7545_v5, %v2643_v39  ;;  %3032 = vmax.xlane.f32.xlu0 %v7622_v21  ;;  %v2822_v10 = vadd.f32 %v7545_v5, %v2647_v28  ;;  %v2932_v14 = vmax.f32 %v2836_v25, %v2884_v16 }
 0x6c2   : > { %3030 = vmax.xlane.f32.xlu1 %v7626_v15  ;;  %8476 = vst [vmem:[#allocation37_spill] sm:$0xff] %v7646_v4 }
 0x6c3   : > { %v2869_v29 = vmul.f32 0.2, %v2821_v18  ;;  %v7632_v9 = vadd.f32 %v2931_v23, %v8461_v20  ;;  %v2870_v59 = vmul.f32 0.2, %v2822_v10  ;;  %v7656_v24 = vadd.f32 %v2932_v14, %v8464_v40 }
 0x6c4   : > { %v2714_v13 = vpop.permute.xlu0 %2713  ;;  %v2710_v22 = vpop.permute.xlu1 %2709 }
 0x6c5   : > { %v2917_v19 = vmax.f32 %v2821_v18, %v2869_v29  ;;  %v2837_v39 = vadd.f32 %v7558_v2, %v2710_v22  ;;  %3064 = vmax.xlane.f32.xlu0 %v7632_v9  ;;  %v2838_v28 = vadd.f32 %v7558_v2, %v2714_v13  ;;  %v2918_v25 = vmax.f32 %v2822_v10, %v2870_v59 }
 0x6c6   : > { %3062 = vmax.xlane.f32.xlu1 %v7636_v17  ;;  %8477 = vst [vmem:[#allocation38_spill] sm:$0xff] %v7656_v24 }
 0x6c7   : > { %v2885_v54 = vmul.f32 0.2, %v2837_v39  ;;  %v7642_v20 = vadd.f32 %v2917_v19, %v8463_v60  ;;  %v2886_v16 = vmul.f32 0.2, %v2838_v28  ;;  %v7666_v40 = vadd.f32 %v2918_v25, %v8466_v32 }
 0x6c8   : > { %v2655_v23 = vpop.permute.xlu0 %2654  ;;  %v2651_v15 = vpop.permute.xlu1 %2650 }
 0x6c9   : > { %v2933_v37 = vmax.f32 %v2837_v39, %v2885_v54  ;;  %v2823_v22 = vadd.f32 %v7545_v5, %v2651_v15  ;;  %3036 = vmax.xlane.f32.xlu0 %v7642_v20  ;;  %v2824_v13 = vadd.f32 %v7545_v5, %v2655_v23  ;;  %v2934_v10 = vmax.f32 %v2838_v28, %v2886_v16 }
 0x6ca   : > { %3034 = vmax.xlane.f32.xlu1 %v7646_v4  ;;  %8478 = vst [vmem:[#allocation39_spill] sm:$0xff] %v7666_v40 }
 0x6cb   : > { %v2871_v18 = vmul.f32 0.2, %v2823_v22  ;;  %v7652_v29 = vadd.f32 %v2933_v37, %v8463_v60  ;;  %v2872_v59 = vmul.f32 0.2, %v2824_v13  ;;  %v7676_v25 = vadd.f32 %v2934_v10, %v8466_v32 }
 0x6cc   : > { %v2722_v19 = vpop.permute.xlu0 %2721  ;;  %v2718_v17 = vpop.permute.xlu1 %2717 }
 0x6cd   : > { %v2919_v39 = vmax.f32 %v2823_v22, %v2871_v18  ;;  %v2839_v15 = vadd.f32 %v7558_v2, %v2718_v17  ;;  %3068 = vmax.xlane.f32.xlu0 %v7652_v29  ;;  %v2840_v23 = vadd.f32 %v7558_v2, %v2722_v19  ;;  %v2920_v28 = vmax.f32 %v2824_v13, %v2872_v59 }
 0x6ce   : > { %3066 = vmax.xlane.f32.xlu1 %v7656_v24  ;;  %8479 = vst [vmem:[#allocation40_spill] sm:$0xff] %v7676_v25 }
 0x6cf   : > { %v2887_v54 = vmul.f32 0.2, %v2839_v15  ;;  %v7662_v60 = vadd.f32 %v2919_v39, %v8465_v0  ;;  %v2888_v16 = vmul.f32 0.2, %v2840_v23  ;;  %v7686_v32 = vadd.f32 %v2920_v28, %v8468_v38 }
 0x6d0   : > { %v2663_v37 = vpop.permute.xlu0 %2662  ;;  %v2659_v4 = vpop.permute.xlu1 %2658 }
 0x6d1   : > { %v2935_v14 = vmax.f32 %v2839_v15, %v2887_v54  ;;  %v2825_v17 = vadd.f32 %v7545_v5, %v2659_v4  ;;  %3040 = vmax.xlane.f32.xlu0 %v7662_v60  ;;  %v2826_v19 = vadd.f32 %v7545_v5, %v2663_v37  ;;  %v2936_v13 = vmax.f32 %v2840_v23, %v2888_v16 }
 0x6d2   : > { %3038 = vmax.xlane.f32.xlu1 %v7666_v40 }
 0x6d3   : > { %v2873_v22 = vmul.f32 0.2, %v2825_v17  ;;  %v7672_v18 = vadd.f32 %v2935_v14, %v8465_v0  ;;  %v2874_v59 = vmul.f32 0.2, %v2826_v19 }
 0x6d4   : > { %v2730_v39 = vpop.permute.xlu0 %2729  ;;  %v2726_v24 = vpop.permute.xlu1 %2725 }
 0x6d5   : > { %v2921_v15 = vmax.f32 %v2825_v17, %v2873_v22  ;;  %v2841_v4 = vadd.f32 %v7558_v2, %v2726_v24  ;;  %3072 = vmax.xlane.f32.xlu0 %v7672_v18  ;;  %v2842_v37 = vadd.f32 %v7558_v2, %v2730_v39  ;;  %v2922_v23 = vmax.f32 %v2826_v19, %v2874_v59 }
 0x6d6   : > { %3070 = vmax.xlane.f32.xlu1 %v7676_v25  ;;  %v7696_v25 = vadd.f32 %v2936_v13, %v8468_v38 }
 0x6d7   : > { %v2889_v54 = vmul.f32 0.2, %v2841_v4  ;;  %v7682_v0 = vadd.f32 %v2921_v15, %v8467_v61  ;;  %v2890_v16 = vmul.f32 0.2, %v2842_v37  ;;  %v7706_v38 = vadd.f32 %v2922_v23, %v6517_v48 }
 0x6d8   : > { %v2671_v14 = vpop.permute.xlu0 %2670  ;;  %v2667_v40 = vpop.permute.xlu1 %2666  ;;  %8480 = vst [vmem:[#allocation15_spill] sm:$0xff] %v7696_v25 }
 0x6d9   : > { %v2937_v10 = vmax.f32 %v2841_v4, %v2889_v54  ;;  %v2827_v24 = vadd.f32 %v7545_v5, %v2667_v40  ;;  %3044 = vmax.xlane.f32.xlu0 %v7682_v0  ;;  %v2828_v39 = vadd.f32 %v7545_v5, %v2671_v14  ;;  %v2938_v19 = vmax.f32 %v2842_v37, %v2890_v16 }
 0x6da   : > { %3042 = vmax.xlane.f32.xlu1 %v7686_v32 }
 0x6db   : > { %v2875_v17 = vmul.f32 0.2, %v2827_v24  ;;  %v7692_v22 = vadd.f32 %v2937_v10, %v8467_v61  ;;  %v2876_v59 = vmul.f32 0.2, %v2828_v39 }
 0x6dc   : > { %v2734_v15 = vpop.permute.xlu1 %2733  ;;  %v2738_v4 = vpop.permute.xlu0 %2737 }
 0x6dd   : > { %v2923_v28 = vmax.f32 %v2827_v24, %v2875_v17  ;;  %v2843_v40 = vadd.f32 %v7558_v2, %v2734_v15  ;;  %3076 = vmax.xlane.f32.xlu0 %v7692_v22  ;;  %v2844_v14 = vadd.f32 %v7558_v2, %v2738_v4  ;;  %v7715_v4 = vadd.f32 %v2938_v19, %v6517_v48 }
 0x6de   : > { %3074 = vmax.xlane.f32.xlu1 %v7696_v25 }
 0x6df   : > { %v2891_v54 = vmul.f32 0.2, %v2843_v40  ;;  %v7702_v61 = vadd.f32 %v2923_v28, %v6536_v30  ;;  %v2924_v28 = vmax.f32 %v2828_v39, %v2876_v59  ;;  %v2892_v37 = vmul.f32 0.2, %v2844_v14 }
 0x6e0   : > { %v2675_v10 = vpop.permute.xlu1 %2674 }
 0x6e1   : > { %v2939_v13 = vmax.f32 %v2843_v40, %v2891_v54  ;;  %v2829_v24 = vadd.f32 %v7545_v5, %v2675_v10  ;;  %3048 = vmax.xlane.f32.xlu0 %v7702_v61  ;;  %v2940_v54 = vmax.f32 %v2844_v14, %v2892_v37 }
 0x6e2   : > { %3046 = vmax.xlane.f32.xlu1 %v7706_v38 }
 0x6e3   : > { %v2877_v17 = vmul.f32 0.2, %v2829_v24  ;;  %v7712_v15 = vadd.f32 %v2939_v13, %v6536_v30  ;;  %v7724_v30 = vadd.f32 %v2924_v28, %v8470_v57 }
 0x6e4   : > { %v2742_v16 = vpop.permute.xlu1 %2741 }
 0x6e5   : > { %v2925_v25 = vmax.f32 %v2829_v24, %v2877_v17  ;;  %v2845_v23 = vadd.f32 %v7558_v2, %v2742_v16  ;;  %3080 = vmax.xlane.f32.xlu0 %v7712_v15  ;;  %v7732_v2 = vadd.f32 %v2940_v54, %v8470_v57 }
 0x6e6   : > { %3078 = vmax.xlane.f32.xlu1 %v7715_v4 }
 0x6e7   : > { %v2893_v5 = vmul.f32 0.2, %v2845_v23  ;;  %v7721_v40 = vadd.f32 %v2925_v25, %v8469_v49 }
 0x6e9   : > { %v2941_v39 = vmax.f32 %v2845_v23, %v2893_v5  ;;  %3052 = vmax.xlane.f32.xlu0 %v7721_v40 }
 0x6ea   : > { %3050 = vmax.xlane.f32.xlu1 %v7724_v30 }
 0x6eb   : > { %v7729_v48 = vadd.f32 %v2941_v39, %v8469_v49 }
 0x6ed   : > { %3084 = vmax.xlane.f32.xlu0 %v7729_v48 }
 0x6ee   : > { %3082 = vmax.xlane.f32.xlu1 %v7732_v2 }
 0x716   : > { %v2991_v25 = vpop.xlane.xlu0 %2990 }
 0x717   : > { %v3086_v19 = vsub.f32 %v7489_v58, %v2991_v25 }
 0x719   : > { %v3134_v59 = vmul.f32 1.442695, %v3086_v19 }
 0x71a   : > { %v2995_v14 = vpop.xlane.xlu0 %2994 }
 0x71b   : > { %5673 = vpow2.f32 %v3134_v59  ;;  %v3088_v10 = vsub.f32 %v7495_v31, %v2995_v14 }
 0x71d   : > { %v3138_v57 = vmul.f32 1.442695, %v3088_v10 }
 0x71e   : > { %v2997_v13 = vpop.xlane.xlu0 %2996 }
 0x71f   : > { %v3089_v24 = vsub.f32 %v7501_v44, %v2997_v13  ;;  %v2993_v49 = vpop.xlane.xlu1 %2992 }
 0x720   : > { %v3087_v17 = vsub.f32 %v7505_v42, %v2993_v49 }
 0x721   : > { %v3140_v16 = vmul.f32 1.442695, %v3089_v24 }
 0x722   : > { %v3136_v28 = vmul.f32 1.442695, %v3087_v17  ;;  %v3001_v37 = vpop.xlane.xlu0 %3000 }
 0x723   : > { %v3091_v23 = vsub.f32 %v7513_v51, %v3001_v37  ;;  %v2999_v5 = vpop.xlane.xlu1 %2998 }
 0x724   : > { %5675 = vpow2.f32 %v3136_v28  ;;  %v3090_v58 = vsub.f32 %v7517_v56, %v2999_v5 }
 0x725   : > { %5677 = vpow2.f32 %v3138_v57  ;;  %v3144_v31 = vmul.f32 1.442695, %v3091_v23 }
 0x726   : > { %v3142_v54 = vmul.f32 1.442695, %v3090_v58  ;;  %v3005_v39 = vpop.xlane.xlu0 %3004  ;;  %5679 = vpow2.f32 %v3140_v16 }
 0x727   : > { %v3093_v44 = vsub.f32 %v7524_v47, %v3005_v39  ;;  %v3003_v25 = vpop.xlane.xlu1 %3002 }
 0x728   : > { %v5674_v19 = vpop.eup %5673  ;;  %5681 = vpow2.f32 %v3142_v54  ;;  %v3092_v42 = vsub.f32 %v7528_v1, %v3003_v25 }
 0x729   : > { %3230 = vadd.xlane.f32.xlu1 %v5674_v19  ;;  %5238 = vmatprep.mubr.f32.mxu0 %v5674_v19  ;;  %5683 = vpow2.f32 %v3144_v31  ;;  %v3148_v14 = vmul.f32 1.442695, %v3093_v44 }
 0x72a   : > { %v3146_v59 = vmul.f32 1.442695, %v3092_v42  ;;  %v3009_v51 = vpop.xlane.xlu0 %3008 }
 0x72b   : > { %v3095_v56 = vsub.f32 %v7535_v8, %v3009_v51  ;;  %v3007_v10 = vpop.xlane.xlu1 %3006 }
 0x72c   : > { %5685 = vpow2.f32 %v3146_v59  ;;  %v3094_v13 = vsub.f32 %v7539_v43, %v3007_v10 }
 0x72d   : > { %5687 = vpow2.f32 %v3148_v14  ;;  %v3152_v47 = vmul.f32 1.442695, %v3095_v56  ;;  %v8481_v56 = vld [vmem:[#allocation6_spill] sm:$0xff] }
 0x72e   : > { %v3150_v24 = vmul.f32 1.442695, %v3094_v13  ;;  %v3013_v49 = vpop.xlane.xlu0 %3012 }
 0x72f   : > { %v3097_v17 = vsub.f32 %v7549_v12, %v3013_v49  ;;  %v3011_v57 = vpop.xlane.xlu1 %3010 }
 0x730   : > { %5689 = vpow2.f32 %v3150_v24  ;;  %v3096_v1 = vsub.f32 %v7553_v6, %v3011_v57  ;;  %v8482_v24 = vld [vmem:[#allocation33_spill] sm:$0xff]  ;;  %v8483_v57 = vld [vmem:[#allocation10_spill] sm:$0xff] }
 0x731   : > { %v5676_v28 = vpop.eup %5675  ;;  %5691 = vpow2.f32 %v3152_v47  ;;  %v3156_v8 = vmul.f32 1.442695, %v3097_v17 }
 0x732   : > { %v7748_v37 = vpop.eup %5677  ;;  %v3154_v16 = vmul.f32 1.442695, %v3096_v1  ;;  %v3017_v23 = vpop.xlane.xlu0 %3016  ;;  %3232 = vadd.xlane.f32.xlu1 %v5676_v28  ;;  %5239 = vmatmul.mubr.f32.vlgmr.msra.gmra.mxu0 %v5676_v28  ;;  %v8484_v1 = vld [vmem:[#allocation34_spill] sm:$0xff] }
 0x733   : > { %v3099_v43 = vsub.f32 %v7562_v52, %v3017_v23  ;;  %5263 = vmatpush3.msk.msra.mxu0 %vm6253_vm9, %v7219_v34  ;;  %5241 = vmatprep.mubr.f32.mxu0 %v7748_v37  ;;  %v3015_v12 = vpop.xlane.xlu1 %3014  ;;  %v7755_v5 = vpop.eup %5679 }
 0x734   : > { %5693 = vpow2.f32 %v3154_v16  ;;  %5264 = vmatprep.subr.msk.mxu0 %vm6253_vm9, %v7226_v3  ;;  %v3098_v6 = vsub.f32 %v7566_v63, %v3015_v12 }
 0x735   : > { %v7761_v58 = vpop.eup %5681  ;;  %5265 = vmatpush3.msk.msra.mxu0 %vm6253_vm9, %v7226_v3  ;;  %5695 = vpow2.f32 %v3156_v8  ;;  %v3160_v54 = vmul.f32 1.442695, %v3099_v43  ;;  %v8485_v8 = vld [vmem:[#allocation12_spill] sm:$0xff] }
 0x736   : > { %v3158_v52 = vmul.f32 1.442695, %v3098_v6  ;;  %5266 = vmatprep.subr.msk.mxu0 %vm6253_vm9, %v7215_v53  ;;  %v3021_v34 = vpop.xlane.xlu0 %3020  ;;  %5242 = vmatmul.mubr.f32.gmra.mxu0 %v7755_v5  ;;  %v7775_v3 = vpop.eup %5683 }
 0x737   : > { %v3101_v39 = vsub.f32 %v7572_v62, %v3021_v34  ;;  %5267 = vmatpush3.msk.msra.mxu0 %vm6253_vm9, %v7215_v53  ;;  %5244 = vmatprep.mubr.f32.mxu0 %v7761_v58  ;;  %v3019_v63 = vpop.xlane.xlu1 %3018  ;;  %v8486_v34 = vld [vmem:[#allocation8_spill] sm:$0xff] }
 0x738   : > { %5697 = vpow2.f32 %v3158_v52  ;;  %5268 = vmatprep.subr.msk.mxu0 %vm6253_vm9, %v7217_v41  ;;  %v3100_v31 = vsub.f32 %v7576_v11, %v3019_v63 }
 0x739   : > { %v7781_v44 = vpop.eup %5685  ;;  %5269 = vmatpush3.msk.msra.mxu0 %vm6253_vm9, %v7217_v41  ;;  %5699 = vpow2.f32 %v3160_v54  ;;  %v3164_v25 = vmul.f32 1.442695, %v3101_v39  ;;  %v8487_v54 = vld [vmem:[#allocation7_spill] sm:$0xff] }
 0x73a   : > { %v3162_v62 = vmul.f32 1.442695, %v3100_v31  ;;  %5270 = vmatprep.subr.msk.mxu0 %vm6253_vm9, %v7211_v50  ;;  %v3025_v53 = vpop.xlane.xlu0 %3024  ;;  %5245 = vmatmul.mubr.f32.gmra.mxu0 %v7775_v3  ;;  %v7795_v41 = vpop.eup %5687 }
 0x73b   : > { %v3103_v19 = vsub.f32 %v7582_v35, %v3025_v53  ;;  %5271 = vmatpush3.msk.msra.mxu0 %vm6253_vm9, %v7211_v50  ;;  %5247 = vmatprep.mubr.f32.mxu0 %v7781_v44  ;;  %v3023_v11 = vpop.xlane.xlu1 %3022 }
 0x73c   : > { %5701 = vpow2.f32 %v3162_v62  ;;  %5272 = vmatprep.subr.msk.mxu0 %vm6253_vm9, %v7213_v26  ;;  %v3102_v42 = vsub.f32 %v7586_v27, %v3023_v11  ;;  %v8488_v62 = vld [vmem:[#allocation11_spill] sm:$0xff] }
 0x73d   : > { %v7801_v59 = vpop.eup %5689  ;;  %5273 = vmatpush3.msk.msra.mxu0 %vm6253_vm9, %v7213_v26  ;;  %5703 = vpow2.f32 %v3164_v25  ;;  %v3168_v51 = vmul.f32 1.442695, %v3103_v19 }
 0x73e   : > { %v3166_v35 = vmul.f32 1.442695, %v3102_v42  ;;  %5274 = vmatprep.subr.msk.mxu0 %vm6253_vm9, %v7207_v45  ;;  %v3057_v50 = vpop.xlane.xlu0 %3056  ;;  %5248 = vmatmul.mubr.f32.gmra.mxu0 %v7795_v41  ;;  %v7815_v26 = vpop.eup %5691  ;;  %v8489_v42 = vld [vmem:[#allocation32_spill] sm:$0xff] }
 0x73f   : > { %v3119_v14 = vsub.f32 %v7592_v7, %v3057_v50  ;;  %5275 = vmatpush3.msk.msra.mxu0 %vm6253_vm9, %v7207_v45  ;;  %5250 = vmatprep.mubr.f32.mxu0 %v7801_v59  ;;  %v3055_v27 = vpop.xlane.xlu1 %3054 }
 0x740   : > { %5705 = vpow2.f32 %v3166_v35  ;;  %5276 = vmatprep.subr.msk.mxu0 %vm6253_vm9, %v7209_v36  ;;  %v3118_v10 = vsub.f32 %v8481_v56, %v3055_v27  ;;  %v8490_v35 = vld [vmem:[#allocation35_spill] sm:$0xff] }
 0x741   : > { %v7821_v13 = vpop.eup %5693  ;;  %5277 = vmatpush3.msk.msra.mxu0 %vm6253_vm9, %v7209_v36  ;;  %v3200_v7 = vmul.f32 1.442695, %v3119_v14  ;;  %5707 = vpow2.f32 %v3168_v51  ;;  %v8491_v27 = vld [vmem:[#allocation31_spill] sm:$0xff] }
 0x742   : > { %v3198_v45 = vmul.f32 1.442695, %v3118_v10  ;;  %5278 = vmatprep.subr.msk.mxu0 %vm6253_vm9, %v8482_v24  ;;  %v3029_v49 = vpop.xlane.xlu0 %3028  ;;  %5251 = vmatmul.mubr.f32.gmra.mxu0 %v7815_v26  ;;  %v7835_v36 = vpop.eup %5695 }
 0x743   : > { %v3105_v47 = vsub.f32 %v7602_v33, %v3029_v49  ;;  %5279 = vmatpush3.msk.msra.mxu0 %vm6253_vm9, %v8482_v24  ;;  %5253 = vmatprep.mubr.f32.mxu0 %v7821_v13  ;;  %v3027_v17 = vpop.xlane.xlu1 %3026  ;;  %v8492_v24 = vld [vmem:[#allocation13_spill] sm:$0xff]  ;;  %v8493_v49 = vld [vmem:[#allocation36_spill] sm:$0xff] }
 0x744   : > { %5709 = vpow2.f32 %v3198_v45  ;;  %5280 = vmatprep.subr.msk.mxu0 %vm6253_vm9, %v8483_v57  ;;  %v3104_v28 = vsub.f32 %v8484_v1, %v3027_v17 }
 0x745   : > { %v7841_v16 = vpop.eup %5697  ;;  %v3172_v23 = vmul.f32 1.442695, %v3105_v47  ;;  %5281 = vmatpush3.msk.msra.mxu0 %vm6253_vm9, %v8483_v57  ;;  %5711 = vpow2.f32 %v3200_v7 }
 0x746   : > { %v3170_v33 = vmul.f32 1.442695, %v3104_v28  ;;  %5282 = vmatprep.subr.msk.mxu0 %vm6253_vm9, %v8485_v8  ;;  %v3061_v43 = vpop.xlane.xlu0 %3060  ;;  %5254 = vmatmul.mubr.f32.gmra.mxu0 %v7835_v36  ;;  %v7855_v52 = vpop.eup %5699 }
 0x747   : > { %v3121_v12 = vsub.f32 %v7612_v46, %v3061_v43  ;;  %5283 = vmatpush3.msk.msra.mxu0 %vm6253_vm9, %v8485_v8  ;;  %5256 = vmatprep.mubr.f32.mxu0 %v7841_v16  ;;  %v3059_v6 = vpop.xlane.xlu1 %3058  ;;  %v8494_v8 = vld [vmem:[#allocation37_spill] sm:$0xff] }
 0x748   : > { %5713 = vpow2.f32 %v3170_v33  ;;  %5284 = vmatprep.subr.msk.mxu0 %vm6253_vm9, %v8486_v34  ;;  %v3120_v39 = vsub.f32 %v8487_v54, %v3059_v6 }
 0x749   : > { %v7861_v63 = vpop.eup %5701  ;;  %5715 = vpow2.f32 %v3172_v23  ;;  %v3204_v46 = vmul.f32 1.442695, %v3121_v12  ;;  %5285 = vmatpush3.msk.msra.mxu0 %vm6253_vm9, %v8486_v34 }
 0x74a   : > { %v3202_v31 = vmul.f32 1.442695, %v3120_v39  ;;  %5286 = vmatprep.subr.msk.mxu0 %vm6253_vm9, %v8488_v62  ;;  %v3033_v53 = vpop.xlane.xlu0 %3032  ;;  %5257 = vmatmul.mubr.f32.gmra.mxu0 %v7855_v52  ;;  %v7875_v11 = vpop.eup %5703 }
 0x74b   : > { %v3107_v25 = vsub.f32 %v7622_v21, %v3033_v53  ;;  %5287 = vmatpush3.msk.msra.mxu0 %vm6253_vm9, %v8488_v62  ;;  %5259 = vmatprep.mubr.f32.mxu0 %v7861_v63  ;;  %v3031_v19 = vpop.xlane.xlu1 %3030 }
 0x74c   : > { %5717 = vpow2.f32 %v3202_v31  ;;  %5288 = vmatprep.subr.msk.mxu0 %vm6253_vm9, %v8489_v42  ;;  %v3106_v50 = vsub.f32 %v8490_v35, %v3031_v19  ;;  %v8496_v35 = vld [vmem:[#allocation39_spill] sm:$0xff] }
 0x74d   : > { %v5706_v51 = vpop.eup %5705  ;;  %5719 = vpow2.f32 %v3204_v46  ;;  %v3176_v14 = vmul.f32 1.442695, %v3107_v25  ;;  %5289 = vmatpush3.msk.msra.mxu0 %vm6253_vm9, %v8489_v42  ;;  %v8495_v46 = vld [vmem:[#allocation38_spill] sm:$0xff] }
 0x74e   : > { %v3174_v21 = vmul.f32 1.442695, %v3106_v50  ;;  %5290 = vmatprep.subr.msk.mxu0 %vm6253_vm9, %v8491_v27  ;;  %v3065_v56 = vpop.xlane.xlu0 %3064  ;;  %5260 = vmatmul.mubr.f32.gmra.mxu0 %v7875_v11  ;;  %v5708_v45 = vpop.eup %5707 }
 0x74f   : > { %v3123_v10 = vsub.f32 %v7632_v9, %v3065_v56  ;;  %5291 = vmatpush3.msk.msra.mxu0 %vm6253_vm9, %v8491_v27  ;;  %3262 = vadd.xlane.f32.xlu0 %v5706_v51  ;;  %v3063_v7 = vpop.xlane.xlu1 %3062 }
 0x750   : > { %5721 = vpow2.f32 %v3174_v21  ;;  %5292 = vmatprep.subr.msk.mxu0 %vm6253_vm9, %v8492_v24  ;;  %5294 = vmatprep.mubr.f32.mxu0 %v5706_v51  ;;  %v3122_v47 = vsub.f32 %v8493_v49, %v3063_v7 }
 0x751   : > { %v5710_v17 = vpop.eup %5709  ;;  %5723 = vpow2.f32 %v3176_v14  ;;  %v3208_v57 = vmul.f32 1.442695, %v3123_v10  ;;  %5293 = vmatpush3.msk.msra.mxu0 %vm6253_vm9, %v8492_v24 }
 0x752   : > { %v3206_v9 = vmul.f32 1.442695, %v3122_v47  ;;  %v3037_v1 = vpop.xlane.xlu0 %3036  ;;  %5295 = vmatmul.mubr.f32.vlgmr.msra.gmra.mxu0 %v5708_v45  ;;  %3294 = vadd.xlane.f32.xlu1 %v5710_v17  ;;  %v5712_v28 = vpop.eup %5711 }
 0x753   : > { %v3109_v23 = vsub.f32 %v7642_v20, %v3037_v1  ;;  %3264 = vadd.xlane.f32.xlu0 %v5708_v45  ;;  %5350 = vmatprep.mubr.f32.mxu1 %v5710_v17  ;;  %v3035_v33 = vpop.xlane.xlu1 %3034 }
 0x754   : > { %5725 = vpow2.f32 %v3206_v9  ;;  %5351 = vmatmul.mubr.f32.vlgmr.msra.gmra.mxu1 %v5712_v28  ;;  %v3108_v43 = vsub.f32 %v8494_v8, %v3035_v33 }
 0x755   : > { %v5714_v12 = vpop.eup %5713  ;;  %5727 = vpow2.f32 %v3208_v57  ;;  %v3180_v6 = vmul.f32 1.442695, %v3109_v23 }
 0x756   : > { %v5716_v34 = vpop.eup %5715  ;;  %v3178_v55 = vmul.f32 1.442695, %v3108_v43  ;;  %v3069_v54 = vpop.xlane.xlu0 %3068  ;;  %3234 = vadd.xlane.f32.xlu1 %v7748_v37  ;;  %5297 = vmatprep.mubr.f32.mxu0 %v5714_v12  ;;  %v8498_v43 = vld [vmem:[#allocation15_spill] sm:$0xff] }
 0x757   : > { %v3125_v39 = vsub.f32 %v7652_v29, %v3069_v54  ;;  %3296 = vadd.xlane.f32.xlu0 %v5712_v28  ;;  %5298 = vmatmul.mubr.f32.gmra.mxu0 %v5716_v34  ;;  %v3067_v20 = vpop.xlane.xlu1 %3066 }
 0x758   : > { %5729 = vpow2.f32 %v3178_v55  ;;  %v3124_v31 = vsub.f32 %v8495_v46, %v3067_v20 }
 0x759   : > { %v5718_v62 = vpop.eup %5717  ;;  %5731 = vpow2.f32 %v3180_v6  ;;  %v3212_v53 = vmul.f32 1.442695, %v3125_v39 }
 0x75a   : > { %v5720_v25 = vpop.eup %5719  ;;  %v3210_v19 = vmul.f32 1.442695, %v3124_v31  ;;  %v3041_v42 = vpop.xlane.xlu0 %3040  ;;  %3236 = vadd.xlane.f32.xlu1 %v7755_v5  ;;  %5353 = vmatprep.mubr.f32.mxu1 %v5718_v62 }
 0x75b   : > { %v3111_v37 = vsub.f32 %v7662_v60, %v3041_v42  ;;  %3266 = vadd.xlane.f32.xlu0 %v5714_v12  ;;  %5354 = vmatmul.mubr.f32.gmra.mxu1 %v5720_v25  ;;  %v3039_v29 = vpop.xlane.xlu1 %3038  ;;  %v8497_v60 = vld [vmem:[#allocation40_spill] sm:$0xff] }
 0x75c   : > { %5733 = vpow2.f32 %v3210_v19  ;;  %v3110_v50 = vsub.f32 %v8496_v35, %v3039_v29 }
 0x75d   : > { %v5722_v51 = vpop.eup %5721  ;;  %5735 = vpow2.f32 %v3212_v53  ;;  %v3184_v14 = vmul.f32 1.442695, %v3111_v37 }
 0x75e   : > { %v5724_v21 = vpop.eup %5723  ;;  %v3182_v27 = vmul.f32 1.442695, %v3110_v50  ;;  %v3073_v56 = vpop.xlane.xlu0 %3072  ;;  %3298 = vadd.xlane.f32.xlu1 %v5718_v62  ;;  %5300 = vmatprep.mubr.f32.mxu0 %v5722_v51 }
 0x75f   : > { %v3127_v10 = vsub.f32 %v7672_v18, %v3073_v56  ;;  %3268 = vadd.xlane.f32.xlu0 %v5716_v34  ;;  %5301 = vmatmul.mubr.f32.gmra.mxu0 %v5724_v21  ;;  %v3071_v5 = vpop.xlane.xlu1 %3070 }
 0x760   : > { %5737 = vpow2.f32 %v3182_v27  ;;  %v3126_v7 = vsub.f32 %v8497_v60, %v3071_v5 }
 0x761   : > { %v5726_v45 = vpop.eup %5725  ;;  %5739 = vpow2.f32 %v3184_v14  ;;  %v3216_v24 = vmul.f32 1.442695, %v3127_v10 }
 0x762   : > { %v5728_v49 = vpop.eup %5727  ;;  %v3214_v47 = vmul.f32 1.442695, %v3126_v7  ;;  %v3045_v17 = vpop.xlane.xlu0 %3044  ;;  %3238 = vadd.xlane.f32.xlu1 %v7761_v58  ;;  %5356 = vmatprep.mubr.f32.mxu1 %v5726_v45 }
 0x763   : > { %v3113_v57 = vsub.f32 %v7682_v0, %v3045_v17  ;;  %3300 = vadd.xlane.f32.xlu0 %v5720_v25  ;;  %5357 = vmatmul.mubr.f32.gmra.mxu1 %v5728_v49  ;;  %v3043_v18 = vpop.xlane.xlu1 %3042 }
 0x764   : > { %5741 = vpow2.f32 %v3214_v47  ;;  %v3112_v9 = vsub.f32 %v7686_v32, %v3043_v18 }
 0x765   : > { %v5730_v1 = vpop.eup %5729  ;;  %5743 = vpow2.f32 %v3216_v24  ;;  %v3188_v28 = vmul.f32 1.442695, %v3113_v57 }
 0x766   : > { %v5732_v23 = vpop.eup %5731  ;;  %v3186_v33 = vmul.f32 1.442695, %v3112_v9  ;;  %v3077_v8 = vpop.xlane.xlu0 %3076  ;;  %3240 = vadd.xlane.f32.xlu1 %v7775_v3  ;;  %5303 = vmatprep.mubr.f32.mxu0 %v5730_v1 }
 0x767   : > { %v3129_v58 = vsub.f32 %v7692_v22, %v3077_v8  ;;  %3270 = vadd.xlane.f32.xlu0 %v5722_v51  ;;  %5304 = vmatmul.mubr.f32.gmra.mxu0 %v5732_v23  ;;  %v3075_v0 = vpop.xlane.xlu1 %3074 }
 0x768   : > { %5745 = vpow2.f32 %v3186_v33  ;;  %v3128_v12 = vsub.f32 %v8498_v43, %v3075_v0 }
 0x769   : > { %v5734_v6 = vpop.eup %5733  ;;  %5747 = vpow2.f32 %v3188_v28  ;;  %v3220_v32 = vmul.f32 1.442695, %v3129_v58 }
 0x76a   : > { %v5736_v34 = vpop.eup %5735  ;;  %v3218_v55 = vmul.f32 1.442695, %v3128_v12  ;;  %v3049_v54 = vpop.xlane.xlu0 %3048  ;;  %3302 = vadd.xlane.f32.xlu1 %v5726_v45  ;;  %5359 = vmatprep.mubr.f32.mxu1 %v5734_v6 }
 0x76b   : > { %v3115_v39 = vsub.f32 %v7702_v61, %v3049_v54  ;;  %3272 = vadd.xlane.f32.xlu0 %v5724_v21  ;;  %5360 = vmatmul.mubr.f32.gmra.mxu1 %v5736_v34  ;;  %v3047_v3 = vpop.xlane.xlu1 %3046 }
 0x76c   : > { %5749 = vpow2.f32 %v3218_v55  ;;  %v3114_v22 = vsub.f32 %v7706_v38, %v3047_v3 }
 0x76d   : > { %v5738_v20 = vpop.eup %5737  ;;  %5751 = vpow2.f32 %v3220_v32  ;;  %v3192_v46 = vmul.f32 1.442695, %v3115_v39 }
 0x76e   : > { %v5740_v31 = vpop.eup %5739  ;;  %v3190_v62 = vmul.f32 1.442695, %v3114_v22  ;;  %v3081_v53 = vpop.xlane.xlu0 %3080  ;;  %3242 = vadd.xlane.f32.xlu1 %v7781_v44  ;;  %5306 = vmatprep.mubr.f32.mxu0 %v5738_v20 }
 0x76f   : > { %v3131_v25 = vsub.f32 %v7712_v15, %v3081_v53  ;;  %3304 = vadd.xlane.f32.xlu0 %v5728_v49  ;;  %5307 = vmatmul.mubr.f32.gmra.mxu0 %v5740_v31  ;;  %v3079_v61 = vpop.xlane.xlu1 %3078 }
 0x770   : > { %5753 = vpow2.f32 %v3190_v62  ;;  %v3130_v19 = vsub.f32 %v7715_v4, %v3079_v61 }
 0x771   : > { %v5742_v42 = vpop.eup %5741  ;;  %5755 = vpow2.f32 %v3192_v46  ;;  %v3224_v38 = vmul.f32 1.442695, %v3131_v25 }
 0x772   : > { %v5744_v37 = vpop.eup %5743  ;;  %v3222_v29 = vmul.f32 1.442695, %v3130_v19  ;;  %v3053_v35 = vpop.xlane.xlu0 %3052  ;;  %3244 = vadd.xlane.f32.xlu1 %v7795_v41  ;;  %5362 = vmatprep.mubr.f32.mxu1 %v5742_v42 }
 0x773   : > { %v3117_v44 = vsub.f32 %v7721_v40, %v3053_v35  ;;  %3274 = vadd.xlane.f32.xlu0 %v5730_v1  ;;  %5363 = vmatmul.mubr.f32.gmra.mxu1 %v5744_v37  ;;  %v3051_v15 = vpop.xlane.xlu1 %3050 }
 0x774   : > { %5757 = vpow2.f32 %v3222_v29  ;;  %v3116_v50 = vsub.f32 %v7724_v30, %v3051_v15 }
 0x775   : > { %v5746_v51 = vpop.eup %5745  ;;  %5759 = vpow2.f32 %v3224_v38  ;;  %v3196_v4 = vmul.f32 1.442695, %v3117_v44 }
 0x776   : > { %v5748_v14 = vpop.eup %5747  ;;  %v3194_v21 = vmul.f32 1.442695, %v3116_v50  ;;  %v3085_v27 = vpop.xlane.xlu0 %3084  ;;  %3306 = vadd.xlane.f32.xlu1 %v5734_v6  ;;  %5309 = vmatprep.mubr.f32.mxu0 %v5746_v51 }
 0x777   : > { %v3133_v56 = vsub.f32 %v7729_v48, %v3085_v27  ;;  %3276 = vadd.xlane.f32.xlu0 %v5732_v23  ;;  %5310 = vmatmul.mubr.f32.gmra.mxu0 %v5748_v14  ;;  %v3083_v41 = vpop.xlane.xlu1 %3082 }
 0x778   : > { %5761 = vpow2.f32 %v3194_v21  ;;  %v3132_v40 = vsub.f32 %v7732_v2, %v3083_v41 }
 0x779   : > { %v5750_v10 = vpop.eup %5749  ;;  %5763 = vpow2.f32 %v3196_v4  ;;  %v3228_v5 = vmul.f32 1.442695, %v3133_v56 }
 0x77a   : > { %v5752_v30 = vpop.eup %5751  ;;  %v3226_v60 = vmul.f32 1.442695, %v3132_v40  ;;  %3246 = vadd.xlane.f32.xlu1 %v7801_v59  ;;  %5365 = vmatprep.mubr.f32.mxu1 %v5750_v10 }
 0x77b   : > { %3308 = vadd.xlane.f32.xlu0 %v5736_v34  ;;  %5366 = vmatmul.mubr.f32.gmra.mxu1 %v5752_v30 }
 0x77c   : > { %5765 = vpow2.f32 %v3226_v60 }
 0x77d   : > { %v5754_v7 = vpop.eup %5753  ;;  %5767 = vpow2.f32 %v3228_v5 }
 0x77e   : > { %v5756_v48 = vpop.eup %5755  ;;  %3248 = vadd.xlane.f32.xlu1 %v7815_v26  ;;  %5312 = vmatprep.mubr.f32.mxu0 %v5754_v7  ;;  %v313_v26 = vld [vmem:[%s8286_s3 + $0x10] sm:$0xff] }
 0x77f   : > { %3278 = vadd.xlane.f32.xlu0 %v5738_v20  ;;  %5313 = vmatmul.mubr.f32.gmra.mxu0 %v5756_v48 }
 0x780   : > { %5374 = vmatprep.subr.mxu0 %v313_v26 }
 0x781   : > { %v5758_v2 = vpop.eup %5757  ;;  %5375 = vmatpush3.msra.mxu0 %v313_v26 }
 0x782   : > { %v5760_v45 = vpop.eup %5759  ;;  %3310 = vadd.xlane.f32.xlu1 %v5742_v42  ;;  %5368 = vmatprep.mubr.f32.mxu1 %v5758_v2 }
 0x783   : > { %3280 = vadd.xlane.f32.xlu0 %v5740_v31  ;;  %5369 = vmatmul.mubr.f32.gmra.mxu1 %v5760_v45 }
 0x785   : > { %v5762_v24 = vpop.eup %5761 }
 0x786   : > { %v5764_v59 = vpop.eup %5763  ;;  %3250 = vadd.xlane.f32.xlu1 %v7821_v13  ;;  %5315 = vmatprep.mubr.f32.mxu0 %v5762_v24  ;;  %v312_v13 = vld [vmem:[%s8286_s3 + $0x8] sm:$0xff] }
 0x787   : > { %3312 = vadd.xlane.f32.xlu0 %v5744_v37  ;;  %5316 = vmatmul.mubr.f32.gmra.mxu0 %v5764_v59 }
 0x788   : > { %5376 = vmatprep.subr.mxu0 %v312_v13 }
 0x789   : > { %v5766_v49 = vpop.eup %5765  ;;  %5377 = vmatpush3.msra.mxu0 %v312_v13 }
 0x78a   : > { %v5768_v47 = vpop.eup %5767  ;;  %3252 = vadd.xlane.f32.xlu1 %v7835_v36  ;;  %5371 = vmatprep.mubr.f32.mxu1 %v5766_v49  ;;  %v311_v36 = vld [vmem:[%s8286_s3] sm:$0xff] }
 0x78b   : > { %3282 = vadd.xlane.f32.xlu0 %v5746_v51  ;;  %5372 = vmatmul.mubr.f32.gmra.mxu1 %v5768_v47 }
 0x78c   : > { %5378 = vmatprep.subr.mxu0 %v311_v36 }
 0x78d   : > { %5379 = vmatpush3.msra.mxu0 %v311_v36 }
 0x78e   : > { %3314 = vadd.xlane.f32.xlu1 %v5750_v10 }
 0x78f   : > { %3284 = vadd.xlane.f32.xlu0 %v5748_v14 }
 0x792   : > { %3254 = vadd.xlane.f32.xlu1 %v7841_v16 }
 0x793   : > { %3316 = vadd.xlane.f32.xlu0 %v5752_v30 }
 0x796   : > { %3256 = vadd.xlane.f32.xlu1 %v7855_v52 }
 0x797   : > { %3286 = vadd.xlane.f32.xlu0 %v5754_v7 }
 0x79a   : > { %3318 = vadd.xlane.f32.xlu1 %v5758_v2 }
 0x79b   : > { %3288 = vadd.xlane.f32.xlu0 %v5756_v48 }
 0x79e   : > { %3258 = vadd.xlane.f32.xlu1 %v7861_v63 }
 0x79f   : > { %3320 = vadd.xlane.f32.xlu0 %v5760_v45 }
 0x7a2   : > { %3260 = vadd.xlane.f32.xlu1 %v7875_v11 }
 0x7a3   : > { %3290 = vadd.xlane.f32.xlu0 %v5762_v24 }
 0x7a6   : > { %3322 = vadd.xlane.f32.xlu1 %v5766_v49 }
 0x7a7   : > { %3292 = vadd.xlane.f32.xlu0 %v5764_v59 }
 0x7ab   : > { %3324 = vadd.xlane.f32.xlu0 %v5768_v47 }
 0x7b2   : > { %v3231_v16 = vpop.xlane.xlu1 %3230 }
 0x7b3   : > { %5769 = vrcp.f32 %v3231_v16 }
 0x7bb   : > { %v3233_v52 = vpop.xlane.xlu1 %3232 }
 0x7bc   : > { %5771 = vrcp.f32 %v3233_v52 }
 0x7c0   : > { %v5770_v21 = vpop.eup %5769 }
 0x7c9   : > { %v5772_v56 = vpop.eup %5771 }
 0x7d8   : > { %v3263_v63 = vpop.xlane.xlu0 %3262 }
 0x7d9   : > { %5773 = vrcp.f32 %v3263_v63 }
 0x7db   : > { %v3295_v11 = vpop.xlane.xlu1 %3294 }
 0x7dc   : > { %v3265_v17 = vpop.xlane.xlu0 %3264 }
 0x7dd   : > { %5775 = vrcp.f32 %v3265_v17 }
 0x7de   : > { %5777 = vrcp.f32 %v3295_v11 }
 0x7df   : > { %v3235_v57 = vpop.xlane.xlu1 %3234 }
 0x7e0   : > { %v3297_v18 = vpop.xlane.xlu0 %3296 }
 0x7e1   : > { %5779 = vrcp.f32 %v3297_v18 }
 0x7e2   : > { %5781 = vrcp.f32 %v3235_v57 }
 0x7e3   : > { %v3237_v9 = vpop.xlane.xlu1 %3236 }
 0x7e4   : > { %v3267_v1 = vpop.xlane.xlu0 %3266  ;;  %5783 = vrcp.f32 %v3237_v9 }
 0x7e6   : > { %v5774_v10 = vpop.eup %5773 }
 0x7e7   : > { %v3299_v28 = vpop.xlane.xlu1 %3298 }
 0x7e8   : > { %v3269_v23 = vpop.xlane.xlu0 %3268 }
 0x7e9   : > { %5785 = vrcp.f32 %v3269_v23 }
 0x7ea   : > { %5787 = vrcp.f32 %v3267_v1  ;;  %v5776_v30 = vpop.eup %5775  ;;  %v7999_v1 = vld [vmem:[%s8285_s2 + $0x38] ss:$0 sm:$0xff] }
 0x7eb   : > { %v3239_v33 = vpop.xlane.xlu1 %3238  ;;  %5789 = vrcp.f32 %v3299_v28  ;;  %v5778_v48 = vpop.eup %5777 }
 0x7ec   : > { %v3301_v8 = vpop.xlane.xlu0 %3300  ;;  %5791 = vrcp.f32 %v3239_v33 }
 0x7ee   : > { %v5780_v24 = vpop.eup %5779 }
 0x7ef   : > { %v3241_v58 = vpop.xlane.xlu1 %3240  ;;  %v5782_v47 = vpop.eup %5781 }
 0x7f0   : > { %v3271_v0 = vpop.xlane.xlu0 %3270  ;;  %5793 = vrcp.f32 %v3241_v58 }
 0x7f1   : > { %5795 = vrcp.f32 %v3301_v8  ;;  %v5784_v52 = vpop.eup %5783 }
 0x7f2   : > { %v5240_v43 = vpop.f32.mrf.mxu0  ;;  %5797 = vrcp.f32 %v3271_v0 }
 0x7f3   : > { %v3303_v12 = vpop.xlane.xlu1 %3302  ;;  %v3858_v5 = vmul.f32 %v5772_v56, %v5240_v43 }
 0x7f4   : > { %v3273_v6 = vpop.xlane.xlu0 %3272  ;;  %v3440_v32 = vpop.f32.mrf.mxu0  ;;  %5799 = vrcp.f32 %v3303_v12 }
 0x7f5   : > { %5801 = vrcp.f32 %v3273_v6  ;;  %v3857_v60 = vmul.f32 %v5770_v21, %v3440_v32  ;;  %v3910_v26 = vsel %vm518_vm6, %v3858_v5, 0.0 }
 0x7f6   : > { %v7942_v34 = vpop.f32.mrf.mxu0  ;;  %v5786_v18 = vpop.eup %5785 }
 0x7f7   : > { %v3243_v55 = vpop.xlane.xlu1 %3242  ;;  %v3905_v63 = vsel %vm518_vm6, %v3857_v60, 0.0  ;;  %v3860_v9 = vmul.f32 %v5784_v52, %v7942_v34  ;;  %v5788_v58 = vpop.eup %5787 }
 0x7f8   : > { %v3305_v54 = vpop.xlane.xlu0 %3304  ;;  %v7944_v39 = vpop.f32.mrf.mxu0  ;;  %5803 = vrcp.f32 %v3243_v55 }
 0x7f9   : > { %5805 = vrcp.f32 %v3305_v54  ;;  %v3859_v0 = vmul.f32 %v5782_v47, %v7944_v39  ;;  %v5790_v34 = vpop.eup %5789  ;;  %v3920_v39 = vsel %vm518_vm6, %v3860_v9, 0.0 }
 0x7fa   : > { %v7946_v3 = vpop.f32.mrf.mxu0 }
 0x7fb   : > { %v3245_v22 = vpop.xlane.xlu1 %3244 }
 0x7fc   : > { %v7948_v20 = vpop.xlane.xlu0 %3274  ;;  %v7950_v46 = vpop.f32.mrf.mxu0  ;;  %5807 = vrcp.f32 %v3245_v22 }
 0x7fe   : > { %v7952_v31 = vpop.f32.mrf.mxu0 }
 0x7ff   : > { %v7954_v62 = vpop.xlane.xlu1 %3306 }
 0x800   : > { %v7956_v53 = vpop.xlane.xlu0 %3276  ;;  %v7958_v25 = vpop.f32.mrf.mxu0 }
 0x802   : > { %v7960_v61 = vpop.f32.mrf.mxu0 }
 0x803   : > { %v3247_v19 = vpop.xlane.xlu1 %3246 }
 0x804   : > { %v7962_v42 = vpop.xlane.xlu0 %3308  ;;  %v7964_v38 = vpop.f32.mrf.mxu0  ;;  %5809 = vrcp.f32 %v3247_v19 }
 0x805   : > { %v5792_v19 = vpop.eup %5791 }
 0x806   : > { %v7966_v37 = vpop.f32.mrf.mxu0  ;;  %v5794_v56 = vpop.eup %5793 }
 0x807   : > { %v3249_v29 = vpop.xlane.xlu1 %3248  ;;  %v5796_v60 = vpop.eup %5795 }
 0x808   : > { %v7968_v35 = vpop.xlane.xlu0 %3278  ;;  %v7970_v44 = vpop.f32.mrf.mxu0  ;;  %5811 = vrcp.f32 %v3249_v29 }
 0x809   : > { %5813 = vrcp.f32 %v7956_v53 }
 0x80a   : > { %v7972_v15 = vpop.f32.mrf.mxu0  ;;  %5815 = vrcp.f32 %v7948_v20  ;;  %v3861_v20 = vmul.f32 %v5792_v19, %v7950_v46 }
 0x80b   : > { %v7974_v50 = vpop.xlane.xlu1 %3310  ;;  %5817 = vrcp.f32 %v7962_v42  ;;  %v3862_v42 = vmul.f32 %v5794_v56, %v7946_v3 }
 0x80c   : > { %v7976_v51 = vpop.xlane.xlu0 %3280  ;;  %v7978_v4 = vpop.f32.mrf.mxu0 }
 0x80e   : > { %v7980_v14 = vpop.f32.mrf.mxu0 }
 0x80f   : > { %v7982_v27 = vpop.xlane.xlu1 %3250 }
 0x810   : > { %v7984_v41 = vpop.xlane.xlu0 %3312  ;;  %v7986_v40 = vpop.f32.mrf.mxu0  ;;  %5819 = vrcp.f32 %v7982_v27 }
 0x812   : > { %v5296_v7 = vpop.f32.mrf.mxu0 }
 0x813   : > { %v3874_v2 = vmul.f32 %v5776_v30, %v5296_v7  ;;  %v7988_v45 = vpop.xlane.xlu1 %3252  ;;  %v3915_v7 = vsel %vm518_vm6, %v3859_v0, 0.0 }
 0x814   : > { %v7990_v59 = vpop.xlane.xlu0 %3282  ;;  %v5352_v49 = vpop.f32.mrf.mxu1 }
 0x815   : > { %v3911_v13 = vsel %vm518_vm6, %v3874_v2, 0.0  ;;  %v3890_v36 = vmul.f32 %v5780_v24, %v5352_v49  ;;  %v3585_v16 = vpop.f32.mrf.mxu0  ;;  %v5798_v49 = vpop.eup %5797 }
 0x816   : > { %v3912_v11 = vadd.f32 %v3911_v13, %v3910_v26  ;;  %v3873_v17 = vmul.f32 %v5774_v10, %v3585_v16  ;;  %v3730_v57 = vpop.f32.mrf.mxu1 }
 0x817   : > { %v3913_v28 = vsel %vm518_vm6, %v3890_v36, 0.0  ;;  %v3889_v23 = vmul.f32 %v5778_v48, %v3730_v57  ;;  %v5299_v33 = vpop.f32.mrf.mxu0  ;;  %v8002_v8 = vpop.xlane.xlu1 %3314 }
 0x818   : > { %v3914_v43 = vadd.f32 %v3913_v28, %v3912_v11  ;;  %v3906_v12 = vsel %vm518_vm6, %v3873_v17, 0.0  ;;  %v3876_v6 = vmul.f32 %v5786_v18, %v5299_v33  ;;  %v8006_v32 = vpop.xlane.xlu0 %3284  ;;  %v5800_v36 = vpop.eup %5799  ;;  %v3925_v33 = vsel %vm518_vm6, %v3861_v20, 0.0 }
 0x819   : > { %v3907_v55 = vadd.f32 %v3906_v12, %v3905_v63  ;;  %v3908_v54 = vsel %vm518_vm6, %v3889_v23, 0.0  ;;  %v3595_v22 = vpop.f32.mrf.mxu0  ;;  %v5802_v63 = vpop.eup %5801 }
 0x81a   : > { %v8011_v29 = vadd.f32 %v7999_v1, %v3914_v43  ;;  %v3875_v21 = vmul.f32 %v5788_v58, %v3595_v22  ;;  %v3921_v5 = vsel %vm518_vm6, %v3876_v6, 0.0  ;;  %v5804_v57 = vpop.eup %5803 }
 0x81b   : > { %v3909_v10 = vadd.f32 %v3908_v54, %v3907_v55  ;;  %v5355_v30 = vpop.f32.mrf.mxu1  ;;  %v8022_v24 = vpop.xlane.xlu1 %3254  ;;  %v3922_v16 = vadd.f32 %v3921_v5, %v3920_v39  ;;  %v3930_v55 = vsel %vm518_vm6, %v3862_v42, 0.0  ;;  %v3863_v54 = vmul.f32 %v5804_v57, %v7958_v25 }
 0x81c   : > { %v4023_v53 = vmul.f32 1.442695, %v8011_v29  ;;  %v3916_v48 = vsel %vm518_vm6, %v3875_v21, 0.0  ;;  %v8020_v2 = vpop.xlane.xlu0 %3316  ;;  %v3892_v26 = vmul.f32 %v5796_v60, %v5355_v30  ;;  %v5806_v23 = vpop.eup %5805  ;;  %vm4006_vm7 = vcmp.gt.f32.partialorder %v8011_v29, 0.0 }
 0x81d   : > { %v8027_v47 = vadd.f32 %v7999_v1, %v3909_v10  ;;  %v3740_v13 = vpop.f32.mrf.mxu1  ;;  %v3917_v17 = vadd.f32 %v3916_v48, %v3915_v7  ;;  %v5808_v0 = vpop.eup %5807 }
 0x81e   : > { %5821 = vpow2.f32 %v4023_v53  ;;  %v3891_v52 = vmul.f32 %v5790_v34, %v3740_v13  ;;  %v3923_v46 = vsel %vm518_vm6, %v3892_v26, 0.0  ;;  %v5810_v34 = vpop.eup %5809  ;;  %v3864_v5 = vmul.f32 %v5808_v0, %v7952_v31 }
 0x81f   : > { %5823 = vrcp.f32 %v7954_v62  ;;  %v4021_v11 = vmul.f32 1.442695, %v8027_v47  ;;  %v5302_v27 = vpop.f32.mrf.mxu0  ;;  %v3924_v18 = vadd.f32 %v3923_v46, %v3922_v16  ;;  %v8043_v12 = vpop.xlane.xlu1 %3256  ;;  %v3865_v60 = vmul.f32 %v5810_v34, %v7964_v38 }
 0x820   : > { %5825 = vrcp.f32 %v7988_v45  ;;  %v3918_v9 = vsel %vm518_vm6, %v3891_v52, 0.0  ;;  %v3878_v28 = vmul.f32 %v5802_v63, %v5302_v27  ;;  %v8035_v3 = vpop.xlane.xlu0 %3286  ;;  %vm4005_vm9 = vcmp.gt.f32.partialorder %v8027_v47, 0.0 }
 0x821   : > { %5827 = vpow2.f32 %v4021_v11  ;;  %v3919_v62 = vadd.f32 %v3918_v9, %v3917_v17  ;;  %v3605_v58 = vpop.f32.mrf.mxu0  ;;  %v8040_v43 = vadd.f32 %v7999_v1, %v3924_v18 }
 0x822   : > { %5829 = vrcp.f32 %v7976_v51  ;;  %v3931_v45 = vsel %vm518_vm6, %v3878_v28, 0.0  ;;  %v3877_v6 = vmul.f32 %v5798_v49, %v3605_v58  ;;  %v5812_v51 = vpop.eup %5811 }
 0x823   : > { %5831 = vrcp.f32 %v7968_v35  ;;  %v8049_v22 = vadd.f32 %v7999_v1, %v3919_v62  ;;  %v5358_v19 = vpop.f32.mrf.mxu1  ;;  %v4027_v21 = vmul.f32 1.442695, %v8040_v43  ;;  %v3932_v35 = vadd.f32 %v3931_v45, %v3930_v55  ;;  %v5814_v53 = vpop.eup %5813 }
 0x824   : > { %5833 = vrcp.f32 %v7974_v50  ;;  %v3926_v56 = vsel %vm518_vm6, %v3877_v6, 0.0  ;;  %v8054_v39 = vpop.xlane.xlu0 %3288  ;;  %v3894_v10 = vmul.f32 %v5806_v23, %v5358_v19  ;;  %v3866_v26 = vmul.f32 %v5812_v51, %v7960_v61  ;;  %v5816_v31 = vpop.eup %5815 }
 0x825   : > { %5835 = vrcp.f32 %v7984_v41  ;;  %v4025_v25 = vmul.f32 1.442695, %v8049_v22  ;;  %v3750_v30 = vpop.f32.mrf.mxu1  ;;  %v3927_v48 = vadd.f32 %v3926_v56, %v3925_v33  ;;  %v3935_v41 = vsel %vm518_vm6, %v3863_v54, 0.0  ;;  %v8064_v13 = vpop.xlane.xlu1 %3318 }
 0x826   : > { %5837 = vpow2.f32 %v4027_v21  ;;  %v3933_v50 = vsel %vm518_vm6, %v3894_v10, 0.0  ;;  %v3893_v7 = vmul.f32 %v5800_v36, %v3750_v30  ;;  %v5818_v16 = vpop.eup %5817  ;;  %v3940_v36 = vsel %vm518_vm6, %v3864_v5, 0.0 }
 0x827   : > { %5839 = vpow2.f32 %v4025_v25  ;;  %v3934_v49 = vadd.f32 %v3933_v50, %v3932_v35  ;;  %v5305_v20 = vpop.f32.mrf.mxu0  ;;  %v5820_v17 = vpop.eup %5819  ;;  %v3950_v28 = vsel %vm518_vm6, %v3866_v26, 0.0  ;;  %vm4007_vm11 = vcmp.gt.f32.partialorder %v8049_v22, 0.0 }
 0x828   : > { %5841 = vrcp.f32 %v7990_v59  ;;  %v3928_v38 = vsel %vm518_vm6, %v3893_v7, 0.0  ;;  %v3880_v42 = vmul.f32 %v5814_v53, %v5305_v20  ;;  %v8072_v61 = vpop.xlane.xlu0 %3320  ;;  %v8075_v59 = vsel %vm518_vm6, %v3865_v60, 0.0 }
 0x829   : > { %5843 = vrcp.f32 %v8006_v32  ;;  %v8070_v52 = vadd.f32 %v7999_v1, %v3934_v49  ;;  %v3929_v63 = vadd.f32 %v3928_v38, %v3927_v48  ;;  %v3615_v11 = vpop.f32.mrf.mxu0  ;;  %v8090_v45 = vmul.f32 %v5820_v17, %v7970_v44  ;;  %v3259_v34 = vpop.xlane.xlu1 %3258 }
 0x82a   : > { %5845 = vrcp.f32 %v8022_v24  ;;  %v3941_v46 = vsel %vm518_vm6, %v3880_v42, 0.0  ;;  %v3879_v27 = vmul.f32 %v5816_v31, %v3615_v11  ;;  %vm4008_vm0 = vcmp.gt.f32.partialorder %v8040_v43, 0.0 }
 0x82b   : > { %v5822_v57 = vpop.eup %5821  ;;  %5847 = vrcp.f32 %v8002_v8  ;;  %v4031_v32 = vmul.f32 1.442695, %v8070_v52  ;;  %v8082_v18 = vadd.f32 %v7999_v1, %v3929_v63  ;;  %v5361_v9 = vpop.f32.mrf.mxu1  ;;  %v3942_v58 = vadd.f32 %v3941_v46, %v3940_v36 }
 0x82c   : > { %v5824_v23 = vpop.eup %5823  ;;  %5849 = vrcp.f32 %v8020_v2  ;;  %v3936_v24 = vsel %vm518_vm6, %v3879_v27, 0.0  ;;  %v3896_v33 = vmul.f32 %v5818_v16, %v5361_v9  ;;  %v4592_v2 = vadd.f32 -1.0, %v5822_v57  ;;  %v8094_v21 = vpop.xlane.xlu0 %3290 }
 0x82d   : > { %v5826_v62 = vpop.eup %5825  ;;  %5851 = vpow2.f32 %v4031_v32  ;;  %v4029_v8 = vmul.f32 1.442695, %v8082_v18  ;;  %v3760_v0 = vpop.f32.mrf.mxu1  ;;  %v3937_v51 = vadd.f32 %v3936_v24, %v3935_v41  ;;  %vm4009_vm1 = vcmp.gt.f32.partialorder %v8082_v18, 0.0 }
 0x82e   : > { %v5828_v6 = vpop.eup %5827  ;;  %5853 = vrcp.f32 %v8043_v12  ;;  %v3943_v55 = vsel %vm518_vm6, %v3896_v33, 0.0  ;;  %v3895_v54 = vmul.f32 %v5824_v23, %v3760_v0  ;;  %v3868_v53 = vmul.f32 %v5826_v62, %v7966_v37  ;;  %v3261_v41 = vpop.xlane.xlu1 %3260 }
 0x82f   : > { %v5830_v19 = vpop.eup %5829  ;;  %5855 = vpow2.f32 %v4029_v8  ;;  %v3944_v56 = vadd.f32 %v3943_v55, %v3942_v58  ;;  %v5308_v10 = vpop.f32.mrf.mxu0  ;;  %v4591_v5 = vadd.f32 -1.0, %v5828_v6  ;;  %v4070_v20 = vsel %vm4006_vm7, %v8011_v29, %v4592_v2 }
 0x830   : > { %v5832_v25 = vpop.eup %5831  ;;  %5857 = vrcp.f32 %v8035_v3  ;;  %v3938_v44 = vsel %vm518_vm6, %v3895_v54, 0.0  ;;  %v3882_v35 = vmul.f32 %v5830_v19, %v5308_v10  ;;  %v3293_v63 = vpop.xlane.xlu0 %3292  ;;  %v3960_v6 = vsel %vm518_vm6, %v3868_v53, 0.0 }
 0x831   : > { %v5834_v12 = vpop.eup %5833  ;;  %v8100_v30 = vadd.f32 %v7999_v1, %v3944_v56  ;;  %v3939_v60 = vadd.f32 %v3938_v44, %v3937_v51  ;;  %v3625_v50 = vpop.f32.mrf.mxu0  ;;  %v4069_v7 = vsel %vm4005_vm9, %v8027_v47, %v4591_v5  ;;  %5859 = vrcp.f32 %v8054_v39 }
 0x832   : > { %v5836_v48 = vpop.eup %5835  ;;  %v3951_v3 = vsel %vm518_vm6, %v3882_v35, 0.0  ;;  %v3881_v49 = vmul.f32 %v5832_v25, %v3625_v50  ;;  %5380 = vmatprep.mubr.msk.f32.mxu0 %vm518_vm6, %v4069_v7  ;;  %5861 = vrcp.f32 %v8064_v13  ;;  %vm4010_vm2 = vcmp.gt.f32.partialorder %v8070_v52, 0.0 }
 0x833   : > { %v5838_v26 = vpop.eup %5837  ;;  %v4035_v31 = vmul.f32 1.442695, %v8100_v30  ;;  %v8113_v47 = vadd.f32 %v7999_v1, %v3939_v60  ;;  %5381 = vmatmul.mubr.msk.f32.vlgmr.msra.gmra.mxu0 %vm518_vm6, %v4070_v20  ;;  %v5364_v37 = vpop.f32.mrf.mxu1  ;;  %5863 = vrcp.f32 %v3259_v34  ;;  %v3952_v36 = vadd.f32 %v3951_v3, %v3950_v28 }
 0x834   : > { %v5840_v39 = vpop.eup %5839  ;;  %v3946_v38 = vsel %vm518_vm6, %v3881_v49, 0.0  ;;  %v3898_v42 = vmul.f32 %v5836_v48, %v5364_v37  ;;  %v4594_v29 = vadd.f32 -1.0, %v5838_v26  ;;  %v3325_v51 = vpop.xlane.xlu0 %3324  ;;  %vm4012_vm3 = vcmp.gt.f32.partialorder %v8100_v30, 0.0 }
 0x835   : > { %v5842_v16 = vpop.eup %5841  ;;  %5865 = vpow2.f32 %v4035_v31  ;;  %v4033_v13 = vmul.f32 1.442695, %v8113_v47  ;;  %v3770_v11 = vpop.f32.mrf.mxu1  ;;  %v4593_v17 = vadd.f32 -1.0, %v5840_v39  ;;  %v3947_v9 = vadd.f32 %v3946_v38, %v8075_v59 }
 0x836   : > { %v5844_v46 = vpop.eup %5843  ;;  %5867 = vrcp.f32 %v8072_v61  ;;  %v3953_v27 = vsel %vm518_vm6, %v3898_v42, 0.0  ;;  %v3897_v57 = vmul.f32 %v5834_v12, %v3770_v11  ;;  %v4072_v8 = vsel %vm4008_vm0, %v8040_v43, %v4594_v29  ;;  %v3323_v12 = vpop.xlane.xlu1 %3322 }
 0x837   : > { %v5846_v32 = vpop.eup %5845  ;;  %5869 = vpow2.f32 %v4033_v13  ;;  %v3954_v23 = vadd.f32 %v3953_v27, %v3952_v36  ;;  %v5311_v24 = vpop.f32.mrf.mxu0  ;;  %v4071_v28 = vsel %vm4007_vm11, %v8049_v22, %v4593_v17  ;;  %v3955_v22 = vsel %vm518_vm6, %v8090_v45, 0.0 }
 0x838   : > { %v5848_v33 = vpop.eup %5847  ;;  %5871 = vrcp.f32 %v3261_v41  ;;  %v3948_v62 = vsel %vm518_vm6, %v3897_v57, 0.0  ;;  %v3884_v61 = vmul.f32 %v5844_v46, %v5311_v24  ;;  %5383 = vmatprep.mubr.msk.f32.mxu0 %vm518_vm6, %v4071_v28  ;;  %v3869_v43 = vmul.f32 %v5846_v32, %v7978_v4 }
 0x839   : > { %v5850_v58 = vpop.eup %5849  ;;  %v8130_v0 = vadd.f32 %v7999_v1, %v3954_v23  ;;  %v3949_v59 = vadd.f32 %v3948_v62, %v3947_v9  ;;  %v3635_v34 = vpop.f32.mrf.mxu0  ;;  %5384 = vmatmul.mubr.msk.f32.gmra.mxu0 %vm518_vm6, %v4072_v8  ;;  %5873 = vrcp.f32 %v3293_v63  ;;  %vm4011_vm4 = vcmp.gt.f32.partialorder %v8113_v47, 0.0 }
 0x83a   : > { %v5852_v55 = vpop.eup %5851  ;;  %v3961_v54 = vsel %vm518_vm6, %v3884_v61, 0.0  ;;  %v3883_v2 = vmul.f32 %v5842_v16, %v3635_v34  ;;  %5875 = vrcp.f32 %v8094_v21  ;;  %v3965_v27 = vsel %vm518_vm6, %v3869_v43, 0.0 }
 0x83b   : > { %v5854_v19 = vpop.eup %5853  ;;  %v4039_v56 = vmul.f32 1.442695, %v8130_v0  ;;  %v8140_v10 = vadd.f32 %v7999_v1, %v3949_v59  ;;  %v5367_v5 = vpop.f32.mrf.mxu1  ;;  %v4596_v35 = vadd.f32 -1.0, %v5852_v55  ;;  %v3962_v50 = vadd.f32 %v3961_v54, %v3960_v6 }
 0x83c   : > { %v5856_v45 = vpop.eup %5855  ;;  %v3956_v25 = vsel %vm518_vm6, %v3883_v2, 0.0  ;;  %v3900_v44 = vmul.f32 %v5850_v58, %v5367_v5  ;;  %v3870_v49 = vmul.f32 %v5854_v19, %v7972_v15  ;;  %vm4014_vm8 = vcmp.gt.f32.partialorder %v8130_v0, 0.0 }
 0x83d   : > { %v5858_v4 = vpop.eup %5857  ;;  %5877 = vpow2.f32 %v4039_v56  ;;  %v4037_v60 = vmul.f32 1.442695, %v8140_v10  ;;  %v3780_v7 = vpop.f32.mrf.mxu1  ;;  %v4595_v53 = vadd.f32 -1.0, %v5856_v45  ;;  %v3957_v21 = vadd.f32 %v3956_v25, %v3955_v22 }
 0x83e   : > { %5879 = vrcp.f32 %v3325_v51  ;;  %v3963_v48 = vsel %vm518_vm6, %v3900_v44, 0.0  ;;  %v3899_v3 = vmul.f32 %v5848_v33, %v3780_v7  ;;  %v5860_v20 = vpop.eup %5859  ;;  %v4074_v15 = vsel %vm4010_vm2, %v8070_v52, %v4596_v35 }
 0x83f   : > { %5881 = vpow2.f32 %v4037_v60  ;;  %v3964_v26 = vadd.f32 %v3963_v48, %v3962_v50  ;;  %v5314_v31 = vpop.f32.mrf.mxu0  ;;  %v4073_v37 = vsel %vm4009_vm1, %v8082_v18, %v4595_v53  ;;  %v5862_v39 = vpop.eup %5861  ;;  %v3970_v52 = vsel %vm518_vm6, %v3870_v49, 0.0 }
 0x840   : > { %5883 = vrcp.f32 %v3323_v12  ;;  %v3958_v41 = vsel %vm518_vm6, %v3899_v3, 0.0  ;;  %v3886_v38 = vmul.f32 %v5860_v20, %v5314_v31  ;;  %5386 = vmatprep.mubr.msk.f32.mxu0 %vm518_vm6, %v4073_v37  ;;  %v5864_v42 = vpop.eup %5863  ;;  %vm4013_vm5 = vcmp.gt.f32.partialorder %v8140_v10, 0.0 }
 0x841   : > { %v8158_v29 = vadd.f32 %v7999_v1, %v3964_v26  ;;  %v3959_v16 = vadd.f32 %v3958_v41, %v3957_v21  ;;  %v3645_v13 = vpop.f32.mrf.mxu0  ;;  %5387 = vmatmul.mubr.msk.f32.gmra.mxu0 %vm518_vm6, %v4074_v15  ;;  %v3871_v6 = vmul.f32 %v5864_v42, %v7986_v40 }
 0x842   : > { %v5866_v18 = vpop.eup %5865  ;;  %v3971_v36 = vsel %vm518_vm6, %v3886_v38, 0.0  ;;  %v3885_v63 = vmul.f32 %v5858_v4, %v3645_v13 }
 0x843   : > { %v5868_v11 = vpop.eup %5867  ;;  %v4043_v17 = vmul.f32 1.442695, %v8158_v29  ;;  %v8164_v46 = vadd.f32 %v7999_v1, %v3959_v16  ;;  %v5370_v57 = vpop.f32.mrf.mxu1  ;;  %v4598_v24 = vadd.f32 -1.0, %v5866_v18  ;;  %v3972_v62 = vadd.f32 %v3971_v36, %v3970_v52 }
 0x844   : > { %v5870_v32 = vpop.eup %5869  ;;  %v3966_v9 = vsel %vm518_vm6, %v3885_v63, 0.0  ;;  %v3902_v23 = vmul.f32 %v5868_v11, %v5370_v57  ;;  %v3975_v60 = vsel %vm518_vm6, %v3871_v6, 0.0  ;;  %vm4016_vm12 = vcmp.gt.f32.partialorder %v8158_v29, 0.0 }
 0x845   : > { %v5872_v28 = vpop.eup %5871  ;;  %5885 = vpow2.f32 %v4043_v17  ;;  %v4041_v33 = vmul.f32 1.442695, %v8164_v46  ;;  %v3790_v61 = vpop.f32.mrf.mxu1  ;;  %v4597_v8 = vadd.f32 -1.0, %v5870_v32  ;;  %v3967_v22 = vadd.f32 %v3966_v9, %v3965_v27 }
 0x846   : > { %v3973_v58 = vsel %vm518_vm6, %v3902_v23, 0.0  ;;  %v3901_v59 = vmul.f32 %v5862_v39, %v3790_v61  ;;  %v5874_v34 = vpop.eup %5873  ;;  %v3872_v19 = vmul.f32 %v5872_v28, %v7980_v14  ;;  %v4076_v56 = vsel %vm4012_vm3, %v8100_v30, %v4598_v24 }
 0x847   : > { %5887 = vpow2.f32 %v4041_v33  ;;  %v3974_v55 = vadd.f32 %v3973_v58, %v3972_v62  ;;  %v5317_v54 = vpop.f32.mrf.mxu0  ;;  %v4075_v2 = vsel %vm4011_vm4, %v8113_v47, %v4597_v8  ;;  %v5876_v5 = vpop.eup %5875  ;;  %vm4015_vm10 = vcmp.gt.f32.partialorder %v8164_v46, 0.0  ;;  %v4607_v58 = vld [vmem:[%s8286_s3 + $0x18] ss:$0 sm:$0xff] }
 0x848   : > { %v3968_v43 = vsel %vm518_vm6, %v3901_v59, 0.0  ;;  %v3888_v51 = vmul.f32 %v5874_v34, %v5317_v54  ;;  %5389 = vmatprep.mubr.msk.f32.mxu0 %vm518_vm6, %v4075_v2  ;;  %v3980_v30 = vsel %vm518_vm6, %v3872_v19, 0.0 }
 0x849   : > { %v4002_v40 = vadd.f32 %v7999_v1, %v3974_v55  ;;  %v3969_v45 = vadd.f32 %v3968_v43, %v3967_v22  ;;  %v3655_v25 = vpop.f32.mrf.mxu0  ;;  %5390 = vmatmul.mubr.msk.f32.gmra.mxu0 %vm518_vm6, %v4076_v56 }
 0x84a   : > { %v5878_v44 = vpop.eup %5877  ;;  %v3981_v47 = vsel %vm518_vm6, %v3888_v51, 0.0  ;;  %v3887_v35 = vmul.f32 %v5876_v5, %v3655_v25 }
 0x84b   : > { %v5880_v4 = vpop.eup %5879  ;;  %v4047_v14 = vmul.f32 1.442695, %v4002_v40  ;;  %v4001_v12 = vadd.f32 %v7999_v1, %v3969_v45  ;;  %v5373_v50 = vpop.f32.mrf.mxu1  ;;  %v4600_v3 = vadd.f32 -1.0, %v5878_v44  ;;  %v3982_v21 = vadd.f32 %v3981_v47, %v3980_v30 }
 0x84c   : > { %v5882_v7 = vpop.eup %5881  ;;  %v3976_v53 = vsel %vm518_vm6, %v3887_v35, 0.0  ;;  %v3904_v48 = vmul.f32 %v5880_v4, %v5373_v50  ;;  %vm4018_vm14 = vcmp.gt.f32.partialorder %v4002_v40, 0.0 }
 0x84d   : > { %v5884_v49 = vpop.eup %5883  ;;  %5889 = vpow2.f32 %v4047_v14  ;;  %v4045_v20 = vmul.f32 1.442695, %v4001_v12  ;;  %v3800_v26 = vpop.f32.mrf.mxu1  ;;  %v4599_v31 = vadd.f32 -1.0, %v5882_v7  ;;  %v3977_v41 = vadd.f32 %v3976_v53, %v3975_v60 }
 0x84e   : > { %v3983_v37 = vsel %vm518_vm6, %v3904_v48, 0.0  ;;  %v3903_v39 = vmul.f32 %v5884_v49, %v3800_v26  ;;  %v4078_v16 = vsel %vm4014_vm8, %v8130_v0, %v4600_v3  ;;  %vm4017_vm13 = vcmp.gt.f32.partialorder %v4001_v12, 0.0 }
 0x84f   : > { %5891 = vpow2.f32 %v4045_v20  ;;  %v3984_v38 = vadd.f32 %v3983_v37, %v3982_v21  ;;  %v4077_v15 = vsel %vm4013_vm5, %v8140_v10, %v4599_v31 }
 0x850   : > { %v3978_v42 = vsel %vm518_vm6, %v3903_v39, 0.0  ;;  %5392 = vmatprep.mubr.msk.f32.mxu0 %vm518_vm6, %v4077_v15 }
 0x851   : > { %v4004_v13 = vadd.f32 %v7999_v1, %v3984_v38  ;;  %v3979_v18 = vadd.f32 %v3978_v42, %v3977_v41  ;;  %5393 = vmatmul.mubr.msk.f32.gmra.mxu0 %vm518_vm6, %v4078_v16 }
 0x852   : > { %v5886_v36 = vpop.eup %5885 }
 0x853   : > { %v4051_v63 = vmul.f32 1.442695, %v4004_v13  ;;  %v4003_v11 = vadd.f32 %v7999_v1, %v3979_v18  ;;  %v4602_v52 = vadd.f32 -1.0, %v5886_v36  ;;  %vm4020_vm7 = vcmp.gt.f32.partialorder %v4004_v13, 0.0 }
 0x854   : > { %v5888_v17 = vpop.eup %5887 }
 0x855   : > { %5893 = vpow2.f32 %v4051_v63  ;;  %v4049_v27 = vmul.f32 1.442695, %v4003_v11  ;;  %v4601_v10 = vadd.f32 -1.0, %v5888_v17  ;;  %v4080_v0 = vsel %vm4016_vm12, %v8158_v29, %v4602_v52 }
 0x856   : > { %vm4019_vm15 = vcmp.gt.f32.partialorder %v4003_v11, 0.0 }
 0x857   : > { %5895 = vpow2.f32 %v4049_v27  ;;  %v4079_v57 = vsel %vm4015_vm10, %v8164_v46, %v4601_v10 }
 0x858   : > { %5395 = vmatprep.mubr.msk.f32.mxu0 %vm518_vm6, %v4079_v57 }
 0x859   : > { %5396 = vmatmul.mubr.msk.f32.gmra.mxu0 %vm518_vm6, %v4080_v0 }
 0x85a   : > { %v5890_v32 = vpop.eup %5889 }
 0x85b   : > { %v4604_v9 = vadd.f32 -1.0, %v5890_v32 }
 0x85c   : > { %v5892_v1 = vpop.eup %5891 }
 0x85d   : > { %v4603_v23 = vadd.f32 -1.0, %v5892_v1  ;;  %v4082_v46 = vsel %vm4018_vm14, %v4002_v40, %v4604_v9 }
 0x85f   : > { %v4081_v24 = vsel %vm4017_vm13, %v4001_v12, %v4603_v23 }
 0x860   : > { %5398 = vmatprep.mubr.msk.f32.mxu0 %vm518_vm6, %v4081_v24 }
 0x861   : > { %5399 = vmatmul.mubr.msk.f32.gmra.mxu0 %vm518_vm6, %v4082_v46 }
 0x862   : > { %v5894_v28 = vpop.eup %5893 }
 0x863   : > { %v4606_v62 = vadd.f32 -1.0, %v5894_v28 }
 0x864   : > { %v5896_v33 = vpop.eup %5895 }
 0x865   : > { %v4605_v29 = vadd.f32 -1.0, %v5896_v33  ;;  %v4084_v8 = vsel %vm4020_vm7, %v4004_v13, %v4606_v62 }
 0x867   : > { %v4083_v61 = vsel %vm4019_vm15, %v4003_v11, %v4605_v29 }
 0x868   : > { %5401 = vmatprep.mubr.msk.f32.mxu0 %vm518_vm6, %v4083_v61 }
 0x869   : > { %5402 = vmatmul.mubr.msk.f32.gmra.mxu0 %vm518_vm6, %v4084_v8 }
 0x8f3   : > { %v5382_v59 = vpop.f32.mrf.mxu0 }
 0x8f4   : > { %v4209_v6 = vadd.f32 %v5382_v59, %v4607_v58 }
 0x8f5   : > { %v4203_v34 = vpop.f32.mrf.mxu0 }
 0x8f6   : > { %4283 = vst [vmem:[%s8214_s29 + $0x8] sm:$0xff] %v4209_v6  ;;  %v4204_v22 = vadd.f32 %v4607_v58, %v4203_v34 }
 0x8f8   : > { %4282 = vst [vmem:[%s8214_s29] sm:$0xff] %v4204_v22 }
 0x8f9   : > { %v5385_v55 = vpop.f32.mrf.mxu0 }
 0x8fa   : > { %v4219_v54 = vadd.f32 %v5385_v55, %v4607_v58 }
 0x8fb   : > { %v4213_v2 = vpop.f32.mrf.mxu0 }
 0x8fc   : > { %4285 = vst [vmem:[%s8214_s29 + $0x18] sm:$0xff] %v4219_v54  ;;  %v4214_v43 = vadd.f32 %v4607_v58, %v4213_v2 }
 0x8fe   : > { %4284 = vst [vmem:[%s8214_s29 + $0x10] sm:$0xff] %v4214_v43 }
 0x901   : > { %v5388_v19 = vpop.f32.mrf.mxu0 }
 0x902   : > { %v4229_v51 = vadd.f32 %v5388_v19, %v4607_v58 }
 0x903   : > { %v4223_v56 = vpop.f32.mrf.mxu0 }
 0x904   : > { %4287 = vst [vmem:[%s8214_s29 + $0x28] sm:$0xff] %v4229_v51  ;;  %v4224_v5 = vadd.f32 %v4607_v58, %v4223_v56 }
 0x906   : > { %4286 = vst [vmem:[%s8214_s29 + $0x20] sm:$0xff] %v4224_v5 }
 0x909   : > { %v5391_v40 = vpop.f32.mrf.mxu0 }
 0x90a   : > { %v4239_v45 = vadd.f32 %v5391_v40, %v4607_v58 }
 0x90b   : > { %v4233_v25 = vpop.f32.mrf.mxu0 }
 0x90c   : > { %4289 = vst [vmem:[%s8214_s29 + $0x38] sm:$0xff] %v4239_v45  ;;  %v4234_v44 = vadd.f32 %v4607_v58, %v4233_v25 }
 0x90e   : > { %4288 = vst [vmem:[%s8214_s29 + $0x30] sm:$0xff] %v4234_v44 }
 0x911   : > { %v5394_v47 = vpop.f32.mrf.mxu0 }
 0x912   : > { %v4249_v35 = vadd.f32 %v5394_v47, %v4607_v58 }
 0x913   : > { %v4243_v4 = vpop.f32.mrf.mxu0 }
 0x914   : > { %4291 = vst [vmem:[%s8214_s29 + $0x48] sm:$0xff] %v4249_v35  ;;  %v4244_v14 = vadd.f32 %v4607_v58, %v4243_v4 }
 0x916   : > { %4290 = vst [vmem:[%s8214_s29 + $0x40] sm:$0xff] %v4244_v14 }
 0x919   : > { %v5397_v12 = vpop.f32.mrf.mxu0 }
 0x91a   : > { %v4259_v60 = vadd.f32 %v5397_v12, %v4607_v58 }
 0x91b   : > { %v4253_v50 = vpop.f32.mrf.mxu0 }
 0x91c   : > { %4293 = vst [vmem:[%s8214_s29 + $0x58] sm:$0xff] %v4259_v60  ;;  %v4254_v7 = vadd.f32 %v4607_v58, %v4253_v50 }
 0x91e   : > { %4292 = vst [vmem:[%s8214_s29 + $0x50] sm:$0xff] %v4254_v7 }
 0x921   : > { %v5400_v30 = vpop.f32.mrf.mxu0 }
 0x922   : > { %v4269_v53 = vadd.f32 %v5400_v30, %v4607_v58 }
 0x923   : > { %v4263_v48 = vpop.f32.mrf.mxu0 }
 0x924   : > { %4295 = vst [vmem:[%s8214_s29 + $0x68] sm:$0xff] %v4269_v53  ;;  %v4264_v3 = vadd.f32 %v4607_v58, %v4263_v48 }
 0x926   : > { %4294 = vst [vmem:[%s8214_s29 + $0x60] sm:$0xff] %v4264_v3 }
 0x929   : > { %v5403_v49 = vpop.f32.mrf.mxu0 }
 0x92a   : > { %v4279_v20 = vadd.f32 %v5403_v49, %v4607_v58 }
 0x92b   : > { %v4273_v21 = vpop.f32.mrf.mxu0 }
 0x92c   : > { %4297 = vst [vmem:[%s8214_s29 + $0x78] sm:$0xff] %v4279_v20  ;;  %v4274_v26 = vadd.f32 %v4607_v58, %v4273_v21 }
 0x92e   : > { %4296 = vst [vmem:[%s8214_s29 + $0x70] sm:$0xff] %v4274_v26 }
 0x92f   : > { %5910 = shalt.err (!%p5907_p4)
}
 0x930   : > { %s5911_s13 = scalar_lea.hbm %s8235_s8, 2048  ;;  %s5915_s22 = scalar_lea.hbm %s8287_s4, 4096 }
 0x931   : > { %p5912_p7 = scmp.ne.s32.totalorder %s8235_s8, %s5911_s13  ;;  %p5916_p10 = scmp.lt.s32.totalorder %s8235_s8, %s8287_s4 }
 0x932   : > { %p5917_p11 = scmp.lt.s32.totalorder %s5915_s22, %s5911_s13 }
 0x933   : > { %p5913_p8 = pnand %p5912_p7, %p6029_p5 }
 0x934   : > { %p5918_p12 = por %p5917_p11, %p5916_p10 }
 0x935   : > { %p5914_p9 = pneg %p5913_p8 }
 0x937   : > { %p5919_p13 = pnand %p5918_p12, %p5914_p9 }
 0x939   : > { %5922 = shalt.err (!%p5919_p13)
}
 0x93a   : > { %s5964_s28 = smov 128   ;;  %s5965_s29 = smov 8  }
 0x93b   : > { %5404 = dma.vmem_to_hbm [thread:$0]  (%p6029_p5), %s8237_s5, 2048, %s8235_s8, %s8243_s9, %s5964_s28, %s5964_s28, %s5965_s29  }
 0x93c PF: > { %p5410_p0 = scmp.ge.s32.totalorder %s5957_s18, 2  ;;  %s4327_s30 = sand.u32 1, %s5945_s15  }
 0x93d   : > { %s4328_s6 = scalar_lea.sflag [#allocation3], %s4327_s30 }
 0x93e   : > { %p5407_p1 = pnand %p5410_p0, %p6033_p6 }
 0x940   : > { %p5408_p2 = pneg %p5407_p1 }
 0x942   : > { %5940 = dma.done.wait (%p5408_p2), %s4328_s6, 2048  }
 0x943   : > { %5942 = vsyncadd (%p5408_p2), %s4328_s6, 4294965248  ;;  %p14_p3 = scmp.ge.s32.totalorder %s6016_s21, 4   ;;  %s8499_s15 = smov %s5949_s16 }
 0x944   : > { %s8500_s16 = smov %s5953_s17  ;;  %s8501_s17 = smov %s6027_s24 }
 0x945   : > { %s8502_s18 = smov %s6016_s21  ;;  %16 = sbr.rel (!%p14_p3) target bundleno = 3 (0x3), region = 74 }
 0x94a   :  { %4333 = vsyncpa [#allocation3], 1 }
 0x94b   :  { %4335 = vsyncpa [#allocation3 + $0x1], 1 }

</bundles_post_ra>
